<compile_context>
chip_gen: v6e
topology: v6e:2x2x1
jax: 0.10.0
libtpu: 0.0.40
codegen_flags: <defaults>
</compile_context>

<pallas_src>
import functools

import jax
import jax.numpy as jnp
import numpy as np
from jax import lax
from jax.experimental import pallas as pl
from jax.experimental.pallas import tpu as pltpu


def _cbam_kernel(H, W, x_ref, w1t_ref, b1r_ref, w2_ref, b2c_ref,
                 w3_ref, b3_ref, xo_ref, ca_ref, sp_ref,
                 pad_a_ref, pad_m_ref):
    nb = x_ref.shape[0]
    RO = CO = 2            # interior offset inside the padded conv scratch
    PRU = H + 4            # padded rows actually touched by the 5x5 window

    # Zero the (tiny: ~3 vregs each) padded scratches every step.  This keeps
    # the kernel correct even when the parallel grid axis is split across
    # TensorCores (a program_id==0 "zero once" guard would never run on the
    # second core); the cost is a handful of full-lane vector stores.
    pad_a_ref[...] = jnp.zeros_like(pad_a_ref)
    pad_m_ref[...] = jnp.zeros_like(pad_m_ref)

    x = x_ref[...]                                         # (nb, C, HW)

    # ---------------- channel attention (VPU only, no MXU) ----------------
    avg = jnp.mean(x, axis=2, keepdims=True)               # (nb, C, 1)
    mx = jnp.max(x, axis=2, keepdims=True)                 # (nb, C, 1)

    w1t = w1t_ref[...]                                     # (C, Cr)  == conv1.w.T
    w2 = w2_ref[...]                                       # (C, Cr)  == conv2.w
    b1r = b1r_ref[...]                                     # (1, Cr)
    b2c = b2c_ref[...]                                     # (C, 1)

    h_avg = jnp.maximum(
        jnp.sum(w1t[None] * avg, axis=1, keepdims=True) + b1r, 0.0)   # (nb,1,Cr)
    h_max = jnp.maximum(
        jnp.sum(w1t[None] * mx, axis=1, keepdims=True) + b1r, 0.0)    # (nb,1,Cr)
    h_sum = h_avg + h_max
    # conv2(relu(conv1(avg))) + conv2(relu(conv1(max))) = w2 @ (hA+hM) + 2*b2
    z = jnp.sum(w2[None] * h_sum, axis=2, keepdims=True) + 2.0 * b2c  # (nb,C,1)
    ca = 1.0 / (1.0 + jnp.exp(-z))                         # sigmoid (exp on EUP)
    ca_ref[...] = ca
    x_ca = x * ca                                          # (nb, C, HW)

    # ---------------- spatial attention ----------------
    ch_avg = jnp.mean(x_ca, axis=1)                        # (nb, HW)
    ch_max = jnp.max(x_ca, axis=1)                         # (nb, HW)

    for b in range(nb):
        # Scatter the flat rows into the 2-D padded maps (the interior is
        # fully rewritten every sample; the zero border is never touched).
        for i in range(H):
            pad_a_ref[RO + i:RO + i + 1, CO:CO + W] = \
                ch_avg[b:b + 1, W * i:W * i + W]
            pad_m_ref[RO + i:RO + i + 1, CO:CO + W] = \
                ch_max[b:b + 1, W * i:W * i + W]

        # 5x5 cross-correlation (stride 1, pad 2), in-channels = (avg, max).
        # Column (lane) shift dj hoisted out of the tap loop; the inner di
        # loop only takes cheap row (sublane) slices.  5 independent partial
        # accumulators break the serial dependence chain.
        parts = []
        for dj in range(5):
            a_dj = pad_a_ref[0:PRU, dj:dj + W]             # (H+4, W)
            m_dj = pad_m_ref[0:PRU, dj:dj + W]             # (H+4, W)
            acc = jnp.zeros((H, W), jnp.float32)
            for di in range(5):
                k = di * 5 + dj
                acc = acc + w3_ref[k] * a_dj[di:di + H, :]
                acc = acc + w3_ref[25 + k] * m_dj[di:di + H, :]
            parts.append(acc)
        conv = ((parts[0] + parts[1]) + (parts[2] + parts[3])) + parts[4]
        sp2d = 1.0 / (1.0 + jnp.exp(-(conv + b3_ref[0])))  # (H, W)

        # Emit the spatial map lane-dense and scale x_ca by it.
        for i in range(H):
            sp_ref[b, 0:1, W * i:W * i + W] = sp2d[i:i + 1, :]
        xo_ref[b] = x_ca[b] * sp_ref[b, 0:1, :]


def _pick_block_n(n):
    """Largest batch block <= 8 that keeps >= 2 grid steps (v7x has 2 cores)."""
    best = 1
    for d in range(1, n + 1):
        if n % d == 0 and d <= 8 and n // d >= 2:
            best = d
    return best


def cbam_forward(x, w1, b1, w2, b2, w3, b3, *, block_n=None):
    """x: (N, C, H, W) f32; w1:(Cr,C) b1:(Cr,) w2:(C,Cr) b2:(C,) w3:(2,5,5) b3:(1,).

    Returns (x_out, (ca_out, sp_out)) with the same shapes as the torch module.
    """
    N, C, H, W = x.shape
    HW = H * W
    Cr = w1.shape[0]
    nb = _pick_block_n(N) if block_n is None else block_n
    assert N % nb == 0

    x_flat = x.reshape(N, C, HW)                 # free reshape -> lane-dense
    w1t = jnp.transpose(w1)                      # (C, Cr)
    b1r = b1.reshape(1, Cr)
    b2c = b2.reshape(C, 1)
    w3f = w3.reshape(-1).astype(jnp.float32)     # (50,), flat SMEM
    pc = 128 if W + 4 <= 128 else W + 4          # one lane tile for the conv pad

    kernel = functools.partial(_cbam_kernel, H, W)

    out_shapes = (
        jax.ShapeDtypeStruct((N, C, HW), jnp.float32),    # x_out (lane-dense)
        jax.ShapeDtypeStruct((N, C, 1), jnp.float32),     # channel attention
        jax.ShapeDtypeStruct((N, 1, HW), jnp.float32),    # spatial attention
    )

    xo, ca, sp = pl.pallas_call(
        kernel,
        out_shape=out_shapes,
        grid=(N // nb,),
        in_specs=[
            pl.BlockSpec((nb, C, HW), lambda n: (n, 0, 0)),         # x
            pl.BlockSpec((C, Cr), lambda n: (0, 0)),                # w1.T
            pl.BlockSpec((1, Cr), lambda n: (0, 0)),                # b1
            pl.BlockSpec((C, Cr), lambda n: (0, 0)),                # w2
            pl.BlockSpec((C, 1), lambda n: (0, 0)),                 # b2
            pl.BlockSpec(memory_space=pltpu.MemorySpace.SMEM),      # w3 (50,)
            pl.BlockSpec(memory_space=pltpu.MemorySpace.SMEM),      # b3 (1,)
        ],
        out_specs=(
            pl.BlockSpec((nb, C, HW), lambda n: (n, 0, 0)),
            pl.BlockSpec((nb, C, 1), lambda n: (n, 0, 0)),
            pl.BlockSpec((nb, 1, HW), lambda n: (n, 0, 0)),
        ),
        scratch_shapes=[
            pltpu.VMEM((H + 4, pc), jnp.float32),   # padded avg map
            pltpu.VMEM((H + 4, pc), jnp.float32),   # padded max map
        ],
        compiler_params=pltpu.CompilerParams(
            dimension_semantics=("parallel",)),
    )(x_flat, w1t, b1r, w2, b2c, w3f, b3)

    return (xo.reshape(N, C, H, W),
            (ca.reshape(N, C, 1, 1), sp.reshape(N, 1, H, W)))


def cbam_ref(x, w1, b1, w2, b2, w3, b3):
    """Pure-JAX reference mirroring the PyTorch forward (full f32 precision)."""
    hi = lax.Precision.HIGHEST
    avg = jnp.mean(x, axis=(2, 3))                              # (N, C)
    mx = jnp.max(x, axis=(2, 3))                                # (N, C)

    def mlp(v):
        h = jnp.maximum(
            jnp.einsum("nc,rc->nr", v, w1, precision=hi) + b1[None, :], 0.0)
        return jnp.einsum("nr,cr->nc", h, w2, precision=hi) + b2[None, :]

    ca = jax.nn.sigmoid(mlp(avg) + mlp(mx))                     # (N, C)
    x_ca = x * ca[:, :, None, None]
    ch_avg = jnp.mean(x_ca, axis=1, keepdims=True)
    ch_max = jnp.max(x_ca, axis=1, keepdims=True)
    sp_in = jnp.concatenate([ch_avg, ch_max], axis=1)           # (N, 2, H, W)
    conv = lax.conv_general_dilated(
        sp_in, w3.reshape(1, 2, 5, 5), (1, 1), ((2, 2), (2, 2)),
        dimension_numbers=("NCHW", "OIHW", "NCHW"), precision=hi)
    sp = jax.nn.sigmoid(conv + b3[0])                           # (N, 1, H, W)
    return x_ca * sp, (ca[:, :, None, None], sp)


if __name__ == "__main__":
    N, C, H, W = 2, 32, 16, 16
    reduce = 16
    Cr = C // reduce

    key = jax.random.PRNGKey(0)
    kx, k1, kb1, k2, kb2, k3, kb3 = jax.random.split(key, 7)
    x = jax.random.normal(kx, (N, C, H, W), jnp.float32)
    # Small random weights and (non-zero) biases so every term of the forward
    # pass is exercised by the numerical check.
    w1 = 0.05 * jax.random.normal(k1, (Cr, C), jnp.float32)     # conv1 (1x1)
    b1 = 0.05 * jax.random.normal(kb1, (Cr,), jnp.float32)
    w2 = 0.05 * jax.random.normal(k2, (C, Cr), jnp.float32)     # conv2 (1x1)
    b2 = 0.05 * jax.random.normal(kb2, (C,), jnp.float32)
    w3 = 0.05 * jax.random.normal(k3, (2, 5, 5), jnp.float32)   # conv3 (5x5, 2->1)
    b3 = 0.05 * jax.random.normal(kb3, (1,), jnp.float32)

    xo, (ca, sp) = cbam_forward(x, w1, b1, w2, b2, w3, b3)
    jax.block_until_ready((xo, ca, sp))

    xo_r, (ca_r, sp_r) = cbam_ref(x, w1, b1, w2, b2, w3, b3)
    np.testing.assert_allclose(np.asarray(ca), np.asarray(ca_r), rtol=1e-4, atol=1e-5)
    np.testing.assert_allclose(np.asarray(sp), np.asarray(sp_r), rtol=1e-4, atol=1e-5)
    np.testing.assert_allclose(np.asarray(xo), np.asarray(xo_r), rtol=1e-4, atol=1e-5)
    print("KERNEL_OK")
</pallas_src>

<mosaic_0001>
module attributes {stable_mosaic.version = 11 : i64} {
  func.func @_cbam_kernel(%arg0: i32, %arg1: memref<1x32x256xf32, #tpu.memory_space<vmem>>, %arg2: memref<32x2xf32, #tpu.memory_space<vmem>>, %arg3: memref<1x2xf32, #tpu.memory_space<vmem>>, %arg4: memref<32x2xf32, #tpu.memory_space<vmem>>, %arg5: memref<32x1xf32, #tpu.memory_space<vmem>>, %arg6: memref<50xf32, #tpu.memory_space<smem>>, %arg7: memref<1xf32, #tpu.memory_space<smem>>, %arg8: memref<1x32x256xf32, #tpu.memory_space<vmem>>, %arg9: memref<1x32x1xf32, #tpu.memory_space<vmem>>, %arg10: memref<1x1x256xf32, #tpu.memory_space<vmem>>, %arg11: memref<20x128xf32, #tpu.memory_space<vmem>>, %arg12: memref<20x128xf32, #tpu.memory_space<vmem>>) attributes {dimension_semantics = [#tpu.dimension_semantics<parallel>], iteration_bounds = array<i64: 2>, scalar_prefetch = 0 : i64, scratch_operands = 2 : i64, tpu.core_type = #tpu.core_type<tc>, window_params = [{transform_indices = @transform_0, window_bounds = array<i64: 1, 32, 256>}, {pipeline_mode = #tpu.pipeline_mode<synchronous>, transform_indices = @transform_1, window_bounds = array<i64: 32, 2>}, {pipeline_mode = #tpu.pipeline_mode<synchronous>, transform_indices = @transform_2, window_bounds = array<i64: 1, 2>}, {pipeline_mode = #tpu.pipeline_mode<synchronous>, transform_indices = @transform_3, window_bounds = array<i64: 32, 2>}, {pipeline_mode = #tpu.pipeline_mode<synchronous>, transform_indices = @transform_4, window_bounds = array<i64: 32, 1>}, {transform_indices = @transform_5, window_bounds = array<i64: 50>}, {transform_indices = @transform_6, window_bounds = array<i64: 1>}, {transform_indices = @transform_7, window_bounds = array<i64: 1, 32, 256>}, {transform_indices = @transform_8, window_bounds = array<i64: 1, 32, 1>}, {transform_indices = @transform_9, window_bounds = array<i64: 1, 1, 256>}]} {
    %cst = arith.constant 0.000000e+00 : f32
    %0 = vector.broadcast %cst : f32 to vector<20x128xf32>
    %c0 = arith.constant 0 : index
    %c0_0 = arith.constant 0 : index
    %1 = vector.load %arg11[%c0, %c0_0] : memref<20x128xf32, #tpu.memory_space<vmem>>, vector<20x128xf32>
    tpu.vector_store %arg11[%c0, %c0_0], %0 {strides = array<i32>} : memref<20x128xf32, #tpu.memory_space<vmem>>, vector<20x128xf32>,
    %cst_1 = arith.constant 0.000000e+00 : f32
    %2 = vector.broadcast %cst_1 : f32 to vector<20x128xf32>
    %c0_2 = arith.constant 0 : index
    %c0_3 = arith.constant 0 : index
    %3 = vector.load %arg12[%c0_2, %c0_3] : memref<20x128xf32, #tpu.memory_space<vmem>>, vector<20x128xf32>
    tpu.vector_store %arg12[%c0_2, %c0_3], %2 {strides = array<i32>} : memref<20x128xf32, #tpu.memory_space<vmem>>, vector<20x128xf32>,
    %c0_4 = arith.constant 0 : index
    %c0_5 = arith.constant 0 : index
    %c0_6 = arith.constant 0 : index
    %4 = vector.load %arg1[%c0_4, %c0_5, %c0_6] : memref<1x32x256xf32, #tpu.memory_space<vmem>>, vector<1x32x256xf32>
    %cst_7 = arith.constant dense<0.000000e+00> : vector<1x32xf32>
    %5 = vector.multi_reduction <add>, %4, %cst_7 [2] : vector<1x32x256xf32> to vector<1x32xf32>
    %6 = vector.shape_cast %5 : vector<1x32xf32> to vector<1x32x1xf32>
    %cst_8 = arith.constant 2.560000e+02 : f32
    %7 = vector.broadcast %cst_8 : f32 to vector<1x32x1xf32>
    %8 = arith.divf %6, %7 : vector<1x32x1xf32>
    %cst_9 = arith.constant dense<0xFF800000> : vector<1x32xf32>
    %9 = vector.multi_reduction <maximumf>, %4, %cst_9 [2] : vector<1x32x256xf32> to vector<1x32xf32>
    %10 = vector.shape_cast %9 : vector<1x32xf32> to vector<1x32x1xf32>
    %c0_10 = arith.constant 0 : index
    %c0_11 = arith.constant 0 : index
    %11 = vector.load %arg2[%c0_10, %c0_11] : memref<32x2xf32, #tpu.memory_space<vmem>>, vector<32x2xf32>
    %c0_12 = arith.constant 0 : index
    %c0_13 = arith.constant 0 : index
    %12 = vector.load %arg4[%c0_12, %c0_13] : memref<32x2xf32, #tpu.memory_space<vmem>>, vector<32x2xf32>
    %c0_14 = arith.constant 0 : index
    %c0_15 = arith.constant 0 : index
    %13 = vector.load %arg3[%c0_14, %c0_15] : memref<1x2xf32, #tpu.memory_space<vmem>>, vector<1x2xf32>
    %c0_16 = arith.constant 0 : index
    %c0_17 = arith.constant 0 : index
    %14 = vector.load %arg5[%c0_16, %c0_17] : memref<32x1xf32, #tpu.memory_space<vmem>>, vector<32x1xf32>
    %15 = vector.shape_cast %11 : vector<32x2xf32> to vector<1x32x2xf32>
    %16 = vector.broadcast %8 : vector<1x32x1xf32> to vector<1x32x2xf32>
    %17 = arith.mulf %15, %16 : vector<1x32x2xf32>
    %cst_18 = arith.constant dense<0.000000e+00> : vector<1x2xf32>
    %18 = vector.multi_reduction <add>, %17, %cst_18 [1] : vector<1x32x2xf32> to vector<1x2xf32>
    %19 = vector.shape_cast %18 : vector<1x2xf32> to vector<1x1x2xf32>
    %20 = vector.shape_cast %13 : vector<1x2xf32> to vector<1x1x2xf32>
    %21 = arith.addf %19, %20 : vector<1x1x2xf32>
    %cst_19 = arith.constant 0.000000e+00 : f32
    %22 = vector.broadcast %cst_19 : f32 to vector<1x1x2xf32>
    %23 = arith.maximumf %21, %22 : vector<1x1x2xf32>
    %24 = vector.shape_cast %11 : vector<32x2xf32> to vector<1x32x2xf32>
    %25 = vector.broadcast %10 : vector<1x32x1xf32> to vector<1x32x2xf32>
    %26 = arith.mulf %24, %25 : vector<1x32x2xf32>
    %cst_20 = arith.constant dense<0.000000e+00> : vector<1x2xf32>
    %27 = vector.multi_reduction <add>, %26, %cst_20 [1] : vector<1x32x2xf32> to vector<1x2xf32>
    %28 = vector.shape_cast %27 : vector<1x2xf32> to vector<1x1x2xf32>
    %29 = vector.shape_cast %13 : vector<1x2xf32> to vector<1x1x2xf32>
    %30 = arith.addf %28, %29 : vector<1x1x2xf32>
    %cst_21 = arith.constant 0.000000e+00 : f32
    %31 = vector.broadcast %cst_21 : f32 to vector<1x1x2xf32>
    %32 = arith.maximumf %30, %31 : vector<1x1x2xf32>
    %33 = arith.addf %23, %32 : vector<1x1x2xf32>
    %34 = vector.shape_cast %12 : vector<32x2xf32> to vector<1x32x2xf32>
    %35 = vector.broadcast %33 : vector<1x1x2xf32> to vector<1x32x2xf32>
    %36 = arith.mulf %34, %35 : vector<1x32x2xf32>
    %cst_22 = arith.constant dense<0.000000e+00> : vector<1x32xf32>
    %37 = vector.multi_reduction <add>, %36, %cst_22 [2] : vector<1x32x2xf32> to vector<1x32xf32>
    %38 = vector.shape_cast %37 : vector<1x32xf32> to vector<1x32x1xf32>
    %cst_23 = arith.constant 2.000000e+00 : f32
    %39 = vector.broadcast %cst_23 : f32 to vector<32x1xf32>
    %40 = arith.mulf %39, %14 : vector<32x1xf32>
    %41 = vector.shape_cast %40 : vector<32x1xf32> to vector<1x32x1xf32>
    %42 = arith.addf %38, %41 : vector<1x32x1xf32>
    %cst_24 = arith.constant 0.000000e+00 : f32
    %43 = vector.broadcast %cst_24 : f32 to vector<1x32x1xf32>
    %44 = arith.subf %43, %42 : vector<1x32x1xf32>
    %45 = math.exp %44 : vector<1x32x1xf32>
    %cst_25 = arith.constant 1.000000e+00 : f32
    %46 = vector.broadcast %cst_25 : f32 to vector<1x32x1xf32>
    %47 = arith.addf %46, %45 : vector<1x32x1xf32>
    %cst_26 = arith.constant 1.000000e+00 : f32
    %48 = vector.broadcast %cst_26 : f32 to vector<1x32x1xf32>
    %49 = arith.divf %48, %47 : vector<1x32x1xf32>
    %c0_27 = arith.constant 0 : index
    %c0_28 = arith.constant 0 : index
    %c0_29 = arith.constant 0 : index
    %50 = vector.load %arg9[%c0_27, %c0_28, %c0_29] : memref<1x32x1xf32, #tpu.memory_space<vmem>>, vector<1x32x1xf32>
    tpu.vector_store %arg9[%c0_27, %c0_28, %c0_29], %49 {strides = array<i32>} : memref<1x32x1xf32, #tpu.memory_space<vmem>>, vector<1x32x1xf32>,
    %51 = vector.broadcast %49 : vector<1x32x1xf32> to vector<1x32x256xf32>
    %52 = arith.mulf %4, %51 : vector<1x32x256xf32>
    %cst_30 = arith.constant dense<0.000000e+00> : vector<1x256xf32>
    %53 = vector.multi_reduction <add>, %52, %cst_30 [1] : vector<1x32x256xf32> to vector<1x256xf32>
    %cst_31 = arith.constant 3.200000e+01 : f32
    %54 = vector.broadcast %cst_31 : f32 to vector<1x256xf32>
    %55 = arith.divf %53, %54 : vector<1x256xf32>
    %cst_32 = arith.constant dense<0xFF800000> : vector<1x256xf32>
    %56 = vector.multi_reduction <maximumf>, %52, %cst_32 [1] : vector<1x32x256xf32> to vector<1x256xf32>
    %57 = vector.extract_strided_slice %55 {offsets = [0, 0], sizes = [1, 16], strides = [1, 1]} : vector<1x256xf32> to vector<1x16xf32>
    %c2 = arith.constant 2 : index
    %c2_33 = arith.constant 2 : index
    %58 = vector.load %arg11[%c2, %c2_33] : memref<20x128xf32, #tpu.memory_space<vmem>>, vector<1x16xf32>
    tpu.vector_store %arg11[%c2, %c2_33], %57 {strides = array<i32>} : memref<20x128xf32, #tpu.memory_space<vmem>>, vector<1x16xf32>,
    %59 = vector.extract_strided_slice %56 {offsets = [0, 0], sizes = [1, 16], strides = [1, 1]} : vector<1x256xf32> to vector<1x16xf32>
    %c2_34 = arith.constant 2 : index
    %c2_35 = arith.constant 2 : index
    %60 = vector.load %arg12[%c2_34, %c2_35] : memref<20x128xf32, #tpu.memory_space<vmem>>, vector<1x16xf32>
    tpu.vector_store %arg12[%c2_34, %c2_35], %59 {strides = array<i32>} : memref<20x128xf32, #tpu.memory_space<vmem>>, vector<1x16xf32>,
    %61 = vector.extract_strided_slice %55 {offsets = [0, 16], sizes = [1, 16], strides = [1, 1]} : vector<1x256xf32> to vector<1x16xf32>
    %c3 = arith.constant 3 : index
    %c2_36 = arith.constant 2 : index
    %62 = vector.load %arg11[%c3, %c2_36] : memref<20x128xf32, #tpu.memory_space<vmem>>, vector<1x16xf32>
    tpu.vector_store %arg11[%c3, %c2_36], %61 {strides = array<i32>} : memref<20x128xf32, #tpu.memory_space<vmem>>, vector<1x16xf32>,
    %63 = vector.extract_strided_slice %56 {offsets = [0, 16], sizes = [1, 16], strides = [1, 1]} : vector<1x256xf32> to vector<1x16xf32>
    %c3_37 = arith.constant 3 : index
    %c2_38 = arith.constant 2 : index
    %64 = vector.load %arg12[%c3_37, %c2_38] : memref<20x128xf32, #tpu.memory_space<vmem>>, vector<1x16xf32>
    tpu.vector_store %arg12[%c3_37, %c2_38], %63 {strides = array<i32>} : memref<20x128xf32, #tpu.memory_space<vmem>>, vector<1x16xf32>,
    %65 = vector.extract_strided_slice %55 {offsets = [0, 32], sizes = [1, 16], strides = [1, 1]} : vector<1x256xf32> to vector<1x16xf32>
    %c4 = arith.constant 4 : index
    %c2_39 = arith.constant 2 : index
    %66 = vector.load %arg11[%c4, %c2_39] : memref<20x128xf32, #tpu.memory_space<vmem>>, vector<1x16xf32>
    tpu.vector_store %arg11[%c4, %c2_39], %65 {strides = array<i32>} : memref<20x128xf32, #tpu.memory_space<vmem>>, vector<1x16xf32>,
    %67 = vector.extract_strided_slice %56 {offsets = [0, 32], sizes = [1, 16], strides = [1, 1]} : vector<1x256xf32> to vector<1x16xf32>
    %c4_40 = arith.constant 4 : index
    %c2_41 = arith.constant 2 : index
    %68 = vector.load %arg12[%c4_40, %c2_41] : memref<20x128xf32, #tpu.memory_space<vmem>>, vector<1x16xf32>
    tpu.vector_store %arg12[%c4_40, %c2_41], %67 {strides = array<i32>} : memref<20x128xf32, #tpu.memory_space<vmem>>, vector<1x16xf32>,
    %69 = vector.extract_strided_slice %55 {offsets = [0, 48], sizes = [1, 16], strides = [1, 1]} : vector<1x256xf32> to vector<1x16xf32>
    %c5 = arith.constant 5 : index
    %c2_42 = arith.constant 2 : index
    %70 = vector.load %arg11[%c5, %c2_42] : memref<20x128xf32, #tpu.memory_space<vmem>>, vector<1x16xf32>
    tpu.vector_store %arg11[%c5, %c2_42], %69 {strides = array<i32>} : memref<20x128xf32, #tpu.memory_space<vmem>>, vector<1x16xf32>,
    %71 = vector.extract_strided_slice %56 {offsets = [0, 48], sizes = [1, 16], strides = [1, 1]} : vector<1x256xf32> to vector<1x16xf32>
    %c5_43 = arith.constant 5 : index
    %c2_44 = arith.constant 2 : index
    %72 = vector.load %arg12[%c5_43, %c2_44] : memref<20x128xf32, #tpu.memory_space<vmem>>, vector<1x16xf32>
    tpu.vector_store %arg12[%c5_43, %c2_44], %71 {strides = array<i32>} : memref<20x128xf32, #tpu.memory_space<vmem>>, vector<1x16xf32>,
    %73 = vector.extract_strided_slice %55 {offsets = [0, 64], sizes = [1, 16], strides = [1, 1]} : vector<1x256xf32> to vector<1x16xf32>
    %c6 = arith.constant 6 : index
    %c2_45 = arith.constant 2 : index
    %74 = vector.load %arg11[%c6, %c2_45] : memref<20x128xf32, #tpu.memory_space<vmem>>, vector<1x16xf32>
    tpu.vector_store %arg11[%c6, %c2_45], %73 {strides = array<i32>} : memref<20x128xf32, #tpu.memory_space<vmem>>, vector<1x16xf32>,
    %75 = vector.extract_strided_slice %56 {offsets = [0, 64], sizes = [1, 16], strides = [1, 1]} : vector<1x256xf32> to vector<1x16xf32>
    %c6_46 = arith.constant 6 : index
    %c2_47 = arith.constant 2 : index
    %76 = vector.load %arg12[%c6_46, %c2_47] : memref<20x128xf32, #tpu.memory_space<vmem>>, vector<1x16xf32>
    tpu.vector_store %arg12[%c6_46, %c2_47], %75 {strides = array<i32>} : memref<20x128xf32, #tpu.memory_space<vmem>>, vector<1x16xf32>,
    %77 = vector.extract_strided_slice %55 {offsets = [0, 80], sizes = [1, 16], strides = [1, 1]} : vector<1x256xf32> to vector<1x16xf32>
    %c7 = arith.constant 7 : index
    %c2_48 = arith.constant 2 : index
    %78 = vector.load %arg11[%c7, %c2_48] : memref<20x128xf32, #tpu.memory_space<vmem>>, vector<1x16xf32>
    tpu.vector_store %arg11[%c7, %c2_48], %77 {strides = array<i32>} : memref<20x128xf32, #tpu.memory_space<vmem>>, vector<1x16xf32>,
    %79 = vector.extract_strided_slice %56 {offsets = [0, 80], sizes = [1, 16], strides = [1, 1]} : vector<1x256xf32> to vector<1x16xf32>
    %c7_49 = arith.constant 7 : index
    %c2_50 = arith.constant 2 : index
    %80 = vector.load %arg12[%c7_49, %c2_50] : memref<20x128xf32, #tpu.memory_space<vmem>>, vector<1x16xf32>
    tpu.vector_store %arg12[%c7_49, %c2_50], %79 {strides = array<i32>} : memref<20x128xf32, #tpu.memory_space<vmem>>, vector<1x16xf32>,
    %81 = vector.extract_strided_slice %55 {offsets = [0, 96], sizes = [1, 16], strides = [1, 1]} : vector<1x256xf32> to vector<1x16xf32>
    %c8 = arith.constant 8 : index
    %c2_51 = arith.constant 2 : index
    %82 = vector.load %arg11[%c8, %c2_51] : memref<20x128xf32, #tpu.memory_space<vmem>>, vector<1x16xf32>
    tpu.vector_store %arg11[%c8, %c2_51], %81 {strides = array<i32>} : memref<20x128xf32, #tpu.memory_space<vmem>>, vector<1x16xf32>,
    %83 = vector.extract_strided_slice %56 {offsets = [0, 96], sizes = [1, 16], strides = [1, 1]} : vector<1x256xf32> to vector<1x16xf32>
    %c8_52 = arith.constant 8 : index
    %c2_53 = arith.constant 2 : index
    %84 = vector.load %arg12[%c8_52, %c2_53] : memref<20x128xf32, #tpu.memory_space<vmem>>, vector<1x16xf32>
    tpu.vector_store %arg12[%c8_52, %c2_53], %83 {strides = array<i32>} : memref<20x128xf32, #tpu.memory_space<vmem>>, vector<1x16xf32>,
    %85 = vector.extract_strided_slice %55 {offsets = [0, 112], sizes = [1, 16], strides = [1, 1]} : vector<1x256xf32> to vector<1x16xf32>
    %c9 = arith.constant 9 : index
    %c2_54 = arith.constant 2 : index
    %86 = vector.load %arg11[%c9, %c2_54] : memref<20x128xf32, #tpu.memory_space<vmem>>, vector<1x16xf32>
    tpu.vector_store %arg11[%c9, %c2_54], %85 {strides = array<i32>} : memref<20x128xf32, #tpu.memory_space<vmem>>, vector<1x16xf32>,
    %87 = vector.extract_strided_slice %56 {offsets = [0, 112], sizes = [1, 16], strides = [1, 1]} : vector<1x256xf32> to vector<1x16xf32>
    %c9_55 = arith.constant 9 : index
    %c2_56 = arith.constant 2 : index
    %88 = vector.load %arg12[%c9_55, %c2_56] : memref<20x128xf32, #tpu.memory_space<vmem>>, vector<1x16xf32>
    tpu.vector_store %arg12[%c9_55, %c2_56], %87 {strides = array<i32>} : memref<20x128xf32, #tpu.memory_space<vmem>>, vector<1x16xf32>,
    %89 = vector.extract_strided_slice %55 {offsets = [0, 128], sizes = [1, 16], strides = [1, 1]} : vector<1x256xf32> to vector<1x16xf32>
    %c10 = arith.constant 10 : index
    %c2_57 = arith.constant 2 : index
    %90 = vector.load %arg11[%c10, %c2_57] : memref<20x128xf32, #tpu.memory_space<vmem>>, vector<1x16xf32>
    tpu.vector_store %arg11[%c10, %c2_57], %89 {strides = array<i32>} : memref<20x128xf32, #tpu.memory_space<vmem>>, vector<1x16xf32>,
    %91 = vector.extract_strided_slice %56 {offsets = [0, 128], sizes = [1, 16], strides = [1, 1]} : vector<1x256xf32> to vector<1x16xf32>
    %c10_58 = arith.constant 10 : index
    %c2_59 = arith.constant 2 : index
    %92 = vector.load %arg12[%c10_58, %c2_59] : memref<20x128xf32, #tpu.memory_space<vmem>>, vector<1x16xf32>
    tpu.vector_store %arg12[%c10_58, %c2_59], %91 {strides = array<i32>} : memref<20x128xf32, #tpu.memory_space<vmem>>, vector<1x16xf32>,
    %93 = vector.extract_strided_slice %55 {offsets = [0, 144], sizes = [1, 16], strides = [1, 1]} : vector<1x256xf32> to vector<1x16xf32>
    %c11 = arith.constant 11 : index
    %c2_60 = arith.constant 2 : index
    %94 = vector.load %arg11[%c11, %c2_60] : memref<20x128xf32, #tpu.memory_space<vmem>>, vector<1x16xf32>
    tpu.vector_store %arg11[%c11, %c2_60], %93 {strides = array<i32>} : memref<20x128xf32, #tpu.memory_space<vmem>>, vector<1x16xf32>,
    %95 = vector.extract_strided_slice %56 {offsets = [0, 144], sizes = [1, 16], strides = [1, 1]} : vector<1x256xf32> to vector<1x16xf32>
    %c11_61 = arith.constant 11 : index
    %c2_62 = arith.constant 2 : index
    %96 = vector.load %arg12[%c11_61, %c2_62] : memref<20x128xf32, #tpu.memory_space<vmem>>, vector<1x16xf32>
    tpu.vector_store %arg12[%c11_61, %c2_62], %95 {strides = array<i32>} : memref<20x128xf32, #tpu.memory_space<vmem>>, vector<1x16xf32>,
    %97 = vector.extract_strided_slice %55 {offsets = [0, 160], sizes = [1, 16], strides = [1, 1]} : vector<1x256xf32> to vector<1x16xf32>
    %c12 = arith.constant 12 : index
    %c2_63 = arith.constant 2 : index
    %98 = vector.load %arg11[%c12, %c2_63] : memref<20x128xf32, #tpu.memory_space<vmem>>, vector<1x16xf32>
    tpu.vector_store %arg11[%c12, %c2_63], %97 {strides = array<i32>} : memref<20x128xf32, #tpu.memory_space<vmem>>, vector<1x16xf32>,
    %99 = vector.extract_strided_slice %56 {offsets = [0, 160], sizes = [1, 16], strides = [1, 1]} : vector<1x256xf32> to vector<1x16xf32>
    %c12_64 = arith.constant 12 : index
    %c2_65 = arith.constant 2 : index
    %100 = vector.load %arg12[%c12_64, %c2_65] : memref<20x128xf32, #tpu.memory_space<vmem>>, vector<1x16xf32>
    tpu.vector_store %arg12[%c12_64, %c2_65], %99 {strides = array<i32>} : memref<20x128xf32, #tpu.memory_space<vmem>>, vector<1x16xf32>,
    %101 = vector.extract_strided_slice %55 {offsets = [0, 176], sizes = [1, 16], strides = [1, 1]} : vector<1x256xf32> to vector<1x16xf32>
    %c13 = arith.constant 13 : index
    %c2_66 = arith.constant 2 : index
    %102 = vector.load %arg11[%c13, %c2_66] : memref<20x128xf32, #tpu.memory_space<vmem>>, vector<1x16xf32>
    tpu.vector_store %arg11[%c13, %c2_66], %101 {strides = array<i32>} : memref<20x128xf32, #tpu.memory_space<vmem>>, vector<1x16xf32>,
    %103 = vector.extract_strided_slice %56 {offsets = [0, 176], sizes = [1, 16], strides = [1, 1]} : vector<1x256xf32> to vector<1x16xf32>
    %c13_67 = arith.constant 13 : index
    %c2_68 = arith.constant 2 : index
    %104 = vector.load %arg12[%c13_67, %c2_68] : memref<20x128xf32, #tpu.memory_space<vmem>>, vector<1x16xf32>
    tpu.vector_store %arg12[%c13_67, %c2_68], %103 {strides = array<i32>} : memref<20x128xf32, #tpu.memory_space<vmem>>, vector<1x16xf32>,
    %105 = vector.extract_strided_slice %55 {offsets = [0, 192], sizes = [1, 16], strides = [1, 1]} : vector<1x256xf32> to vector<1x16xf32>
    %c14 = arith.constant 14 : index
    %c2_69 = arith.constant 2 : index
    %106 = vector.load %arg11[%c14, %c2_69] : memref<20x128xf32, #tpu.memory_space<vmem>>, vector<1x16xf32>
    tpu.vector_store %arg11[%c14, %c2_69], %105 {strides = array<i32>} : memref<20x128xf32, #tpu.memory_space<vmem>>, vector<1x16xf32>,
    %107 = vector.extract_strided_slice %56 {offsets = [0, 192], sizes = [1, 16], strides = [1, 1]} : vector<1x256xf32> to vector<1x16xf32>
    %c14_70 = arith.constant 14 : index
    %c2_71 = arith.constant 2 : index
    %108 = vector.load %arg12[%c14_70, %c2_71] : memref<20x128xf32, #tpu.memory_space<vmem>>, vector<1x16xf32>
    tpu.vector_store %arg12[%c14_70, %c2_71], %107 {strides = array<i32>} : memref<20x128xf32, #tpu.memory_space<vmem>>, vector<1x16xf32>,
    %109 = vector.extract_strided_slice %55 {offsets = [0, 208], sizes = [1, 16], strides = [1, 1]} : vector<1x256xf32> to vector<1x16xf32>
    %c15 = arith.constant 15 : index
    %c2_72 = arith.constant 2 : index
    %110 = vector.load %arg11[%c15, %c2_72] : memref<20x128xf32, #tpu.memory_space<vmem>>, vector<1x16xf32>
    tpu.vector_store %arg11[%c15, %c2_72], %109 {strides = array<i32>} : memref<20x128xf32, #tpu.memory_space<vmem>>, vector<1x16xf32>,
    %111 = vector.extract_strided_slice %56 {offsets = [0, 208], sizes = [1, 16], strides = [1, 1]} : vector<1x256xf32> to vector<1x16xf32>
    %c15_73 = arith.constant 15 : index
    %c2_74 = arith.constant 2 : index
    %112 = vector.load %arg12[%c15_73, %c2_74] : memref<20x128xf32, #tpu.memory_space<vmem>>, vector<1x16xf32>
    tpu.vector_store %arg12[%c15_73, %c2_74], %111 {strides = array<i32>} : memref<20x128xf32, #tpu.memory_space<vmem>>, vector<1x16xf32>,
    %113 = vector.extract_strided_slice %55 {offsets = [0, 224], sizes = [1, 16], strides = [1, 1]} : vector<1x256xf32> to vector<1x16xf32>
    %c16 = arith.constant 16 : index
    %c2_75 = arith.constant 2 : index
    %114 = vector.load %arg11[%c16, %c2_75] : memref<20x128xf32, #tpu.memory_space<vmem>>, vector<1x16xf32>
    tpu.vector_store %arg11[%c16, %c2_75], %113 {strides = array<i32>} : memref<20x128xf32, #tpu.memory_space<vmem>>, vector<1x16xf32>,
    %115 = vector.extract_strided_slice %56 {offsets = [0, 224], sizes = [1, 16], strides = [1, 1]} : vector<1x256xf32> to vector<1x16xf32>
    %c16_76 = arith.constant 16 : index
    %c2_77 = arith.constant 2 : index
    %116 = vector.load %arg12[%c16_76, %c2_77] : memref<20x128xf32, #tpu.memory_space<vmem>>, vector<1x16xf32>
    tpu.vector_store %arg12[%c16_76, %c2_77], %115 {strides = array<i32>} : memref<20x128xf32, #tpu.memory_space<vmem>>, vector<1x16xf32>,
    %117 = vector.extract_strided_slice %55 {offsets = [0, 240], sizes = [1, 16], strides = [1, 1]} : vector<1x256xf32> to vector<1x16xf32>
    %c17 = arith.constant 17 : index
    %c2_78 = arith.constant 2 : index
    %118 = vector.load %arg11[%c17, %c2_78] : memref<20x128xf32, #tpu.memory_space<vmem>>, vector<1x16xf32>
    tpu.vector_store %arg11[%c17, %c2_78], %117 {strides = array<i32>} : memref<20x128xf32, #tpu.memory_space<vmem>>, vector<1x16xf32>,
    %119 = vector.extract_strided_slice %56 {offsets = [0, 240], sizes = [1, 16], strides = [1, 1]} : vector<1x256xf32> to vector<1x16xf32>
    %c17_79 = arith.constant 17 : index
    %c2_80 = arith.constant 2 : index
    %120 = vector.load %arg12[%c17_79, %c2_80] : memref<20x128xf32, #tpu.memory_space<vmem>>, vector<1x16xf32>
    tpu.vector_store %arg12[%c17_79, %c2_80], %119 {strides = array<i32>} : memref<20x128xf32, #tpu.memory_space<vmem>>, vector<1x16xf32>,
    %c0_81 = arith.constant 0 : index
    %c0_82 = arith.constant 0 : index
    %121 = vector.load %arg11[%c0_81, %c0_82] : memref<20x128xf32, #tpu.memory_space<vmem>>, vector<20x16xf32>
    %c0_83 = arith.constant 0 : index
    %c0_84 = arith.constant 0 : index
    %122 = vector.load %arg12[%c0_83, %c0_84] : memref<20x128xf32, #tpu.memory_space<vmem>>, vector<20x16xf32>
    %cst_85 = arith.constant 0.000000e+00 : f32
    %123 = vector.broadcast %cst_85 : f32 to vector<16x16xf32>
    %c0_86 = arith.constant 0 : index
    %124 = memref.load %arg6[%c0_86] : memref<50xf32, #tpu.memory_space<smem>>
    %125 = vector.extract_strided_slice %121 {offsets = [0, 0], sizes = [16, 16], strides = [1, 1]} : vector<20x16xf32> to vector<16x16xf32>
    %126 = vector.broadcast %124 : f32 to vector<16x16xf32>
    %127 = arith.mulf %126, %125 : vector<16x16xf32>
    %128 = arith.addf %123, %127 : vector<16x16xf32>
    %c25 = arith.constant 25 : index
    %129 = memref.load %arg6[%c25] : memref<50xf32, #tpu.memory_space<smem>>
    %130 = vector.extract_strided_slice %122 {offsets = [0, 0], sizes = [16, 16], strides = [1, 1]} : vector<20x16xf32> to vector<16x16xf32>
    %131 = vector.broadcast %129 : f32 to vector<16x16xf32>
    %132 = arith.mulf %131, %130 : vector<16x16xf32>
    %133 = arith.addf %128, %132 : vector<16x16xf32>
    %c5_87 = arith.constant 5 : index
    %134 = memref.load %arg6[%c5_87] : memref<50xf32, #tpu.memory_space<smem>>
    %135 = vector.extract_strided_slice %121 {offsets = [1, 0], sizes = [16, 16], strides = [1, 1]} : vector<20x16xf32> to vector<16x16xf32>
    %136 = vector.broadcast %134 : f32 to vector<16x16xf32>
    %137 = arith.mulf %136, %135 : vector<16x16xf32>
    %138 = arith.addf %133, %137 : vector<16x16xf32>
    %c30 = arith.constant 30 : index
    %139 = memref.load %arg6[%c30] : memref<50xf32, #tpu.memory_space<smem>>
    %140 = vector.extract_strided_slice %122 {offsets = [1, 0], sizes = [16, 16], strides = [1, 1]} : vector<20x16xf32> to vector<16x16xf32>
    %141 = vector.broadcast %139 : f32 to vector<16x16xf32>
    %142 = arith.mulf %141, %140 : vector<16x16xf32>
    %143 = arith.addf %138, %142 : vector<16x16xf32>
    %c10_88 = arith.constant 10 : index
    %144 = memref.load %arg6[%c10_88] : memref<50xf32, #tpu.memory_space<smem>>
    %145 = vector.extract_strided_slice %121 {offsets = [2, 0], sizes = [16, 16], strides = [1, 1]} : vector<20x16xf32> to vector<16x16xf32>
    %146 = vector.broadcast %144 : f32 to vector<16x16xf32>
    %147 = arith.mulf %146, %145 : vector<16x16xf32>
    %148 = arith.addf %143, %147 : vector<16x16xf32>
    %c35 = arith.constant 35 : index
    %149 = memref.load %arg6[%c35] : memref<50xf32, #tpu.memory_space<smem>>
    %150 = vector.extract_strided_slice %122 {offsets = [2, 0], sizes = [16, 16], strides = [1, 1]} : vector<20x16xf32> to vector<16x16xf32>
    %151 = vector.broadcast %149 : f32 to vector<16x16xf32>
    %152 = arith.mulf %151, %150 : vector<16x16xf32>
    %153 = arith.addf %148, %152 : vector<16x16xf32>
    %c15_89 = arith.constant 15 : index
    %154 = memref.load %arg6[%c15_89] : memref<50xf32, #tpu.memory_space<smem>>
    %155 = vector.extract_strided_slice %121 {offsets = [3, 0], sizes = [16, 16], strides = [1, 1]} : vector<20x16xf32> to vector<16x16xf32>
    %156 = vector.broadcast %154 : f32 to vector<16x16xf32>
    %157 = arith.mulf %156, %155 : vector<16x16xf32>
    %158 = arith.addf %153, %157 : vector<16x16xf32>
    %c40 = arith.constant 40 : index
    %159 = memref.load %arg6[%c40] : memref<50xf32, #tpu.memory_space<smem>>
    %160 = vector.extract_strided_slice %122 {offsets = [3, 0], sizes = [16, 16], strides = [1, 1]} : vector<20x16xf32> to vector<16x16xf32>
    %161 = vector.broadcast %159 : f32 to vector<16x16xf32>
    %162 = arith.mulf %161, %160 : vector<16x16xf32>
    %163 = arith.addf %158, %162 : vector<16x16xf32>
    %c20 = arith.constant 20 : index
    %164 = memref.load %arg6[%c20] : memref<50xf32, #tpu.memory_space<smem>>
    %165 = vector.extract_strided_slice %121 {offsets = [4, 0], sizes = [16, 16], strides = [1, 1]} : vector<20x16xf32> to vector<16x16xf32>
    %166 = vector.broadcast %164 : f32 to vector<16x16xf32>
    %167 = arith.mulf %166, %165 : vector<16x16xf32>
    %168 = arith.addf %163, %167 : vector<16x16xf32>
    %c45 = arith.constant 45 : index
    %169 = memref.load %arg6[%c45] : memref<50xf32, #tpu.memory_space<smem>>
    %170 = vector.extract_strided_slice %122 {offsets = [4, 0], sizes = [16, 16], strides = [1, 1]} : vector<20x16xf32> to vector<16x16xf32>
    %171 = vector.broadcast %169 : f32 to vector<16x16xf32>
    %172 = arith.mulf %171, %170 : vector<16x16xf32>
    %173 = arith.addf %168, %172 : vector<16x16xf32>
    %c0_90 = arith.constant 0 : index
    %c1 = arith.constant 1 : index
    %174 = vector.load %arg11[%c0_90, %c1] : memref<20x128xf32, #tpu.memory_space<vmem>>, vector<20x16xf32>
    %c0_91 = arith.constant 0 : index
    %c1_92 = arith.constant 1 : index
    %175 = vector.load %arg12[%c0_91, %c1_92] : memref<20x128xf32, #tpu.memory_space<vmem>>, vector<20x16xf32>
    %cst_93 = arith.constant 0.000000e+00 : f32
    %176 = vector.broadcast %cst_93 : f32 to vector<16x16xf32>
    %c1_94 = arith.constant 1 : index
    %177 = memref.load %arg6[%c1_94] : memref<50xf32, #tpu.memory_space<smem>>
    %178 = vector.extract_strided_slice %174 {offsets = [0, 0], sizes = [16, 16], strides = [1, 1]} : vector<20x16xf32> to vector<16x16xf32>
    %179 = vector.broadcast %177 : f32 to vector<16x16xf32>
    %180 = arith.mulf %179, %178 : vector<16x16xf32>
    %181 = arith.addf %176, %180 : vector<16x16xf32>
    %c26 = arith.constant 26 : index
    %182 = memref.load %arg6[%c26] : memref<50xf32, #tpu.memory_space<smem>>
    %183 = vector.extract_strided_slice %175 {offsets = [0, 0], sizes = [16, 16], strides = [1, 1]} : vector<20x16xf32> to vector<16x16xf32>
    %184 = vector.broadcast %182 : f32 to vector<16x16xf32>
    %185 = arith.mulf %184, %183 : vector<16x16xf32>
    %186 = arith.addf %181, %185 : vector<16x16xf32>
    %c6_95 = arith.constant 6 : index
    %187 = memref.load %arg6[%c6_95] : memref<50xf32, #tpu.memory_space<smem>>
    %188 = vector.extract_strided_slice %174 {offsets = [1, 0], sizes = [16, 16], strides = [1, 1]} : vector<20x16xf32> to vector<16x16xf32>
    %189 = vector.broadcast %187 : f32 to vector<16x16xf32>
    %190 = arith.mulf %189, %188 : vector<16x16xf32>
    %191 = arith.addf %186, %190 : vector<16x16xf32>
    %c31 = arith.constant 31 : index
    %192 = memref.load %arg6[%c31] : memref<50xf32, #tpu.memory_space<smem>>
    %193 = vector.extract_strided_slice %175 {offsets = [1, 0], sizes = [16, 16], strides = [1, 1]} : vector<20x16xf32> to vector<16x16xf32>
    %194 = vector.broadcast %192 : f32 to vector<16x16xf32>
    %195 = arith.mulf %194, %193 : vector<16x16xf32>
    %196 = arith.addf %191, %195 : vector<16x16xf32>
    %c11_96 = arith.constant 11 : index
    %197 = memref.load %arg6[%c11_96] : memref<50xf32, #tpu.memory_space<smem>>
    %198 = vector.extract_strided_slice %174 {offsets = [2, 0], sizes = [16, 16], strides = [1, 1]} : vector<20x16xf32> to vector<16x16xf32>
    %199 = vector.broadcast %197 : f32 to vector<16x16xf32>
    %200 = arith.mulf %199, %198 : vector<16x16xf32>
    %201 = arith.addf %196, %200 : vector<16x16xf32>
    %c36 = arith.constant 36 : index
    %202 = memref.load %arg6[%c36] : memref<50xf32, #tpu.memory_space<smem>>
    %203 = vector.extract_strided_slice %175 {offsets = [2, 0], sizes = [16, 16], strides = [1, 1]} : vector<20x16xf32> to vector<16x16xf32>
    %204 = vector.broadcast %202 : f32 to vector<16x16xf32>
    %205 = arith.mulf %204, %203 : vector<16x16xf32>
    %206 = arith.addf %201, %205 : vector<16x16xf32>
    %c16_97 = arith.constant 16 : index
    %207 = memref.load %arg6[%c16_97] : memref<50xf32, #tpu.memory_space<smem>>
    %208 = vector.extract_strided_slice %174 {offsets = [3, 0], sizes = [16, 16], strides = [1, 1]} : vector<20x16xf32> to vector<16x16xf32>
    %209 = vector.broadcast %207 : f32 to vector<16x16xf32>
    %210 = arith.mulf %209, %208 : vector<16x16xf32>
    %211 = arith.addf %206, %210 : vector<16x16xf32>
    %c41 = arith.constant 41 : index
    %212 = memref.load %arg6[%c41] : memref<50xf32, #tpu.memory_space<smem>>
    %213 = vector.extract_strided_slice %175 {offsets = [3, 0], sizes = [16, 16], strides = [1, 1]} : vector<20x16xf32> to vector<16x16xf32>
    %214 = vector.broadcast %212 : f32 to vector<16x16xf32>
    %215 = arith.mulf %214, %213 : vector<16x16xf32>
    %216 = arith.addf %211, %215 : vector<16x16xf32>
    %c21 = arith.constant 21 : index
    %217 = memref.load %arg6[%c21] : memref<50xf32, #tpu.memory_space<smem>>
    %218 = vector.extract_strided_slice %174 {offsets = [4, 0], sizes = [16, 16], strides = [1, 1]} : vector<20x16xf32> to vector<16x16xf32>
    %219 = vector.broadcast %217 : f32 to vector<16x16xf32>
    %220 = arith.mulf %219, %218 : vector<16x16xf32>
    %221 = arith.addf %216, %220 : vector<16x16xf32>
    %c46 = arith.constant 46 : index
    %222 = memref.load %arg6[%c46] : memref<50xf32, #tpu.memory_space<smem>>
    %223 = vector.extract_strided_slice %175 {offsets = [4, 0], sizes = [16, 16], strides = [1, 1]} : vector<20x16xf32> to vector<16x16xf32>
    %224 = vector.broadcast %222 : f32 to vector<16x16xf32>
    %225 = arith.mulf %224, %223 : vector<16x16xf32>
    %226 = arith.addf %221, %225 : vector<16x16xf32>
    %c0_98 = arith.constant 0 : index
    %c2_99 = arith.constant 2 : index
    %227 = vector.load %arg11[%c0_98, %c2_99] : memref<20x128xf32, #tpu.memory_space<vmem>>, vector<20x16xf32>
    %c0_100 = arith.constant 0 : index
    %c2_101 = arith.constant 2 : index
    %228 = vector.load %arg12[%c0_100, %c2_101] : memref<20x128xf32, #tpu.memory_space<vmem>>, vector<20x16xf32>
    %cst_102 = arith.constant 0.000000e+00 : f32
    %229 = vector.broadcast %cst_102 : f32 to vector<16x16xf32>
    %c2_103 = arith.constant 2 : index
    %230 = memref.load %arg6[%c2_103] : memref<50xf32, #tpu.memory_space<smem>>
    %231 = vector.extract_strided_slice %227 {offsets = [0, 0], sizes = [16, 16], strides = [1, 1]} : vector<20x16xf32> to vector<16x16xf32>
    %232 = vector.broadcast %230 : f32 to vector<16x16xf32>
    %233 = arith.mulf %232, %231 : vector<16x16xf32>
    %234 = arith.addf %229, %233 : vector<16x16xf32>
    %c27 = arith.constant 27 : index
    %235 = memref.load %arg6[%c27] : memref<50xf32, #tpu.memory_space<smem>>
    %236 = vector.extract_strided_slice %228 {offsets = [0, 0], sizes = [16, 16], strides = [1, 1]} : vector<20x16xf32> to vector<16x16xf32>
    %237 = vector.broadcast %235 : f32 to vector<16x16xf32>
    %238 = arith.mulf %237, %236 : vector<16x16xf32>
    %239 = arith.addf %234, %238 : vector<16x16xf32>
    %c7_104 = arith.constant 7 : index
    %240 = memref.load %arg6[%c7_104] : memref<50xf32, #tpu.memory_space<smem>>
    %241 = vector.extract_strided_slice %227 {offsets = [1, 0], sizes = [16, 16], strides = [1, 1]} : vector<20x16xf32> to vector<16x16xf32>
    %242 = vector.broadcast %240 : f32 to vector<16x16xf32>
    %243 = arith.mulf %242, %241 : vector<16x16xf32>
    %244 = arith.addf %239, %243 : vector<16x16xf32>
    %c32 = arith.constant 32 : index
    %245 = memref.load %arg6[%c32] : memref<50xf32, #tpu.memory_space<smem>>
    %246 = vector.extract_strided_slice %228 {offsets = [1, 0], sizes = [16, 16], strides = [1, 1]} : vector<20x16xf32> to vector<16x16xf32>
    %247 = vector.broadcast %245 : f32 to vector<16x16xf32>
    %248 = arith.mulf %247, %246 : vector<16x16xf32>
    %249 = arith.addf %244, %248 : vector<16x16xf32>
    %c12_105 = arith.constant 12 : index
    %250 = memref.load %arg6[%c12_105] : memref<50xf32, #tpu.memory_space<smem>>
    %251 = vector.extract_strided_slice %227 {offsets = [2, 0], sizes = [16, 16], strides = [1, 1]} : vector<20x16xf32> to vector<16x16xf32>
    %252 = vector.broadcast %250 : f32 to vector<16x16xf32>
    %253 = arith.mulf %252, %251 : vector<16x16xf32>
    %254 = arith.addf %249, %253 : vector<16x16xf32>
    %c37 = arith.constant 37 : index
    %255 = memref.load %arg6[%c37] : memref<50xf32, #tpu.memory_space<smem>>
    %256 = vector.extract_strided_slice %228 {offsets = [2, 0], sizes = [16, 16], strides = [1, 1]} : vector<20x16xf32> to vector<16x16xf32>
    %257 = vector.broadcast %255 : f32 to vector<16x16xf32>
    %258 = arith.mulf %257, %256 : vector<16x16xf32>
    %259 = arith.addf %254, %258 : vector<16x16xf32>
    %c17_106 = arith.constant 17 : index
    %260 = memref.load %arg6[%c17_106] : memref<50xf32, #tpu.memory_space<smem>>
    %261 = vector.extract_strided_slice %227 {offsets = [3, 0], sizes = [16, 16], strides = [1, 1]} : vector<20x16xf32> to vector<16x16xf32>
    %262 = vector.broadcast %260 : f32 to vector<16x16xf32>
    %263 = arith.mulf %262, %261 : vector<16x16xf32>
    %264 = arith.addf %259, %263 : vector<16x16xf32>
    %c42 = arith.constant 42 : index
    %265 = memref.load %arg6[%c42] : memref<50xf32, #tpu.memory_space<smem>>
    %266 = vector.extract_strided_slice %228 {offsets = [3, 0], sizes = [16, 16], strides = [1, 1]} : vector<20x16xf32> to vector<16x16xf32>
    %267 = vector.broadcast %265 : f32 to vector<16x16xf32>
    %268 = arith.mulf %267, %266 : vector<16x16xf32>
    %269 = arith.addf %264, %268 : vector<16x16xf32>
    %c22 = arith.constant 22 : index
    %270 = memref.load %arg6[%c22] : memref<50xf32, #tpu.memory_space<smem>>
    %271 = vector.extract_strided_slice %227 {offsets = [4, 0], sizes = [16, 16], strides = [1, 1]} : vector<20x16xf32> to vector<16x16xf32>
    %272 = vector.broadcast %270 : f32 to vector<16x16xf32>
    %273 = arith.mulf %272, %271 : vector<16x16xf32>
    %274 = arith.addf %269, %273 : vector<16x16xf32>
    %c47 = arith.constant 47 : index
    %275 = memref.load %arg6[%c47] : memref<50xf32, #tpu.memory_space<smem>>
    %276 = vector.extract_strided_slice %228 {offsets = [4, 0], sizes = [16, 16], strides = [1, 1]} : vector<20x16xf32> to vector<16x16xf32>
    %277 = vector.broadcast %275 : f32 to vector<16x16xf32>
    %278 = arith.mulf %277, %276 : vector<16x16xf32>
    %279 = arith.addf %274, %278 : vector<16x16xf32>
    %c0_107 = arith.constant 0 : index
    %c3_108 = arith.constant 3 : index
    %280 = vector.load %arg11[%c0_107, %c3_108] : memref<20x128xf32, #tpu.memory_space<vmem>>, vector<20x16xf32>
    %c0_109 = arith.constant 0 : index
    %c3_110 = arith.constant 3 : index
    %281 = vector.load %arg12[%c0_109, %c3_110] : memref<20x128xf32, #tpu.memory_space<vmem>>, vector<20x16xf32>
    %cst_111 = arith.constant 0.000000e+00 : f32
    %282 = vector.broadcast %cst_111 : f32 to vector<16x16xf32>
    %c3_112 = arith.constant 3 : index
    %283 = memref.load %arg6[%c3_112] : memref<50xf32, #tpu.memory_space<smem>>
    %284 = vector.extract_strided_slice %280 {offsets = [0, 0], sizes = [16, 16], strides = [1, 1]} : vector<20x16xf32> to vector<16x16xf32>
    %285 = vector.broadcast %283 : f32 to vector<16x16xf32>
    %286 = arith.mulf %285, %284 : vector<16x16xf32>
    %287 = arith.addf %282, %286 : vector<16x16xf32>
    %c28 = arith.constant 28 : index
    %288 = memref.load %arg6[%c28] : memref<50xf32, #tpu.memory_space<smem>>
    %289 = vector.extract_strided_slice %281 {offsets = [0, 0], sizes = [16, 16], strides = [1, 1]} : vector<20x16xf32> to vector<16x16xf32>
    %290 = vector.broadcast %288 : f32 to vector<16x16xf32>
    %291 = arith.mulf %290, %289 : vector<16x16xf32>
    %292 = arith.addf %287, %291 : vector<16x16xf32>
    %c8_113 = arith.constant 8 : index
    %293 = memref.load %arg6[%c8_113] : memref<50xf32, #tpu.memory_space<smem>>
    %294 = vector.extract_strided_slice %280 {offsets = [1, 0], sizes = [16, 16], strides = [1, 1]} : vector<20x16xf32> to vector<16x16xf32>
    %295 = vector.broadcast %293 : f32 to vector<16x16xf32>
    %296 = arith.mulf %295, %294 : vector<16x16xf32>
    %297 = arith.addf %292, %296 : vector<16x16xf32>
    %c33 = arith.constant 33 : index
    %298 = memref.load %arg6[%c33] : memref<50xf32, #tpu.memory_space<smem>>
    %299 = vector.extract_strided_slice %281 {offsets = [1, 0], sizes = [16, 16], strides = [1, 1]} : vector<20x16xf32> to vector<16x16xf32>
    %300 = vector.broadcast %298 : f32 to vector<16x16xf32>
    %301 = arith.mulf %300, %299 : vector<16x16xf32>
    %302 = arith.addf %297, %301 : vector<16x16xf32>
    %c13_114 = arith.constant 13 : index
    %303 = memref.load %arg6[%c13_114] : memref<50xf32, #tpu.memory_space<smem>>
    %304 = vector.extract_strided_slice %280 {offsets = [2, 0], sizes = [16, 16], strides = [1, 1]} : vector<20x16xf32> to vector<16x16xf32>
    %305 = vector.broadcast %303 : f32 to vector<16x16xf32>
    %306 = arith.mulf %305, %304 : vector<16x16xf32>
    %307 = arith.addf %302, %306 : vector<16x16xf32>
    %c38 = arith.constant 38 : index
    %308 = memref.load %arg6[%c38] : memref<50xf32, #tpu.memory_space<smem>>
    %309 = vector.extract_strided_slice %281 {offsets = [2, 0], sizes = [16, 16], strides = [1, 1]} : vector<20x16xf32> to vector<16x16xf32>
    %310 = vector.broadcast %308 : f32 to vector<16x16xf32>
    %311 = arith.mulf %310, %309 : vector<16x16xf32>
    %312 = arith.addf %307, %311 : vector<16x16xf32>
    %c18 = arith.constant 18 : index
    %313 = memref.load %arg6[%c18] : memref<50xf32, #tpu.memory_space<smem>>
    %314 = vector.extract_strided_slice %280 {offsets = [3, 0], sizes = [16, 16], strides = [1, 1]} : vector<20x16xf32> to vector<16x16xf32>
    %315 = vector.broadcast %313 : f32 to vector<16x16xf32>
    %316 = arith.mulf %315, %314 : vector<16x16xf32>
    %317 = arith.addf %312, %316 : vector<16x16xf32>
    %c43 = arith.constant 43 : index
    %318 = memref.load %arg6[%c43] : memref<50xf32, #tpu.memory_space<smem>>
    %319 = vector.extract_strided_slice %281 {offsets = [3, 0], sizes = [16, 16], strides = [1, 1]} : vector<20x16xf32> to vector<16x16xf32>
    %320 = vector.broadcast %318 : f32 to vector<16x16xf32>
    %321 = arith.mulf %320, %319 : vector<16x16xf32>
    %322 = arith.addf %317, %321 : vector<16x16xf32>
    %c23 = arith.constant 23 : index
    %323 = memref.load %arg6[%c23] : memref<50xf32, #tpu.memory_space<smem>>
    %324 = vector.extract_strided_slice %280 {offsets = [4, 0], sizes = [16, 16], strides = [1, 1]} : vector<20x16xf32> to vector<16x16xf32>
    %325 = vector.broadcast %323 : f32 to vector<16x16xf32>
    %326 = arith.mulf %325, %324 : vector<16x16xf32>
    %327 = arith.addf %322, %326 : vector<16x16xf32>
    %c48 = arith.constant 48 : index
    %328 = memref.load %arg6[%c48] : memref<50xf32, #tpu.memory_space<smem>>
    %329 = vector.extract_strided_slice %281 {offsets = [4, 0], sizes = [16, 16], strides = [1, 1]} : vector<20x16xf32> to vector<16x16xf32>
    %330 = vector.broadcast %328 : f32 to vector<16x16xf32>
    %331 = arith.mulf %330, %329 : vector<16x16xf32>
    %332 = arith.addf %327, %331 : vector<16x16xf32>
    %c0_115 = arith.constant 0 : index
    %c4_116 = arith.constant 4 : index
    %333 = vector.load %arg11[%c0_115, %c4_116] : memref<20x128xf32, #tpu.memory_space<vmem>>, vector<20x16xf32>
    %c0_117 = arith.constant 0 : index
    %c4_118 = arith.constant 4 : index
    %334 = vector.load %arg12[%c0_117, %c4_118] : memref<20x128xf32, #tpu.memory_space<vmem>>, vector<20x16xf32>
    %cst_119 = arith.constant 0.000000e+00 : f32
    %335 = vector.broadcast %cst_119 : f32 to vector<16x16xf32>
    %c4_120 = arith.constant 4 : index
    %336 = memref.load %arg6[%c4_120] : memref<50xf32, #tpu.memory_space<smem>>
    %337 = vector.extract_strided_slice %333 {offsets = [0, 0], sizes = [16, 16], strides = [1, 1]} : vector<20x16xf32> to vector<16x16xf32>
    %338 = vector.broadcast %336 : f32 to vector<16x16xf32>
    %339 = arith.mulf %338, %337 : vector<16x16xf32>
    %340 = arith.addf %335, %339 : vector<16x16xf32>
    %c29 = arith.constant 29 : index
    %341 = memref.load %arg6[%c29] : memref<50xf32, #tpu.memory_space<smem>>
    %342 = vector.extract_strided_slice %334 {offsets = [0, 0], sizes = [16, 16], strides = [1, 1]} : vector<20x16xf32> to vector<16x16xf32>
    %343 = vector.broadcast %341 : f32 to vector<16x16xf32>
    %344 = arith.mulf %343, %342 : vector<16x16xf32>
    %345 = arith.addf %340, %344 : vector<16x16xf32>
    %c9_121 = arith.constant 9 : index
    %346 = memref.load %arg6[%c9_121] : memref<50xf32, #tpu.memory_space<smem>>
    %347 = vector.extract_strided_slice %333 {offsets = [1, 0], sizes = [16, 16], strides = [1, 1]} : vector<20x16xf32> to vector<16x16xf32>
    %348 = vector.broadcast %346 : f32 to vector<16x16xf32>
    %349 = arith.mulf %348, %347 : vector<16x16xf32>
    %350 = arith.addf %345, %349 : vector<16x16xf32>
    %c34 = arith.constant 34 : index
    %351 = memref.load %arg6[%c34] : memref<50xf32, #tpu.memory_space<smem>>
    %352 = vector.extract_strided_slice %334 {offsets = [1, 0], sizes = [16, 16], strides = [1, 1]} : vector<20x16xf32> to vector<16x16xf32>
    %353 = vector.broadcast %351 : f32 to vector<16x16xf32>
    %354 = arith.mulf %353, %352 : vector<16x16xf32>
    %355 = arith.addf %350, %354 : vector<16x16xf32>
    %c14_122 = arith.constant 14 : index
    %356 = memref.load %arg6[%c14_122] : memref<50xf32, #tpu.memory_space<smem>>
    %357 = vector.extract_strided_slice %333 {offsets = [2, 0], sizes = [16, 16], strides = [1, 1]} : vector<20x16xf32> to vector<16x16xf32>
    %358 = vector.broadcast %356 : f32 to vector<16x16xf32>
    %359 = arith.mulf %358, %357 : vector<16x16xf32>
    %360 = arith.addf %355, %359 : vector<16x16xf32>
    %c39 = arith.constant 39 : index
    %361 = memref.load %arg6[%c39] : memref<50xf32, #tpu.memory_space<smem>>
    %362 = vector.extract_strided_slice %334 {offsets = [2, 0], sizes = [16, 16], strides = [1, 1]} : vector<20x16xf32> to vector<16x16xf32>
    %363 = vector.broadcast %361 : f32 to vector<16x16xf32>
    %364 = arith.mulf %363, %362 : vector<16x16xf32>
    %365 = arith.addf %360, %364 : vector<16x16xf32>
    %c19 = arith.constant 19 : index
    %366 = memref.load %arg6[%c19] : memref<50xf32, #tpu.memory_space<smem>>
    %367 = vector.extract_strided_slice %333 {offsets = [3, 0], sizes = [16, 16], strides = [1, 1]} : vector<20x16xf32> to vector<16x16xf32>
    %368 = vector.broadcast %366 : f32 to vector<16x16xf32>
    %369 = arith.mulf %368, %367 : vector<16x16xf32>
    %370 = arith.addf %365, %369 : vector<16x16xf32>
    %c44 = arith.constant 44 : index
    %371 = memref.load %arg6[%c44] : memref<50xf32, #tpu.memory_space<smem>>
    %372 = vector.extract_strided_slice %334 {offsets = [3, 0], sizes = [16, 16], strides = [1, 1]} : vector<20x16xf32> to vector<16x16xf32>
    %373 = vector.broadcast %371 : f32 to vector<16x16xf32>
    %374 = arith.mulf %373, %372 : vector<16x16xf32>
    %375 = arith.addf %370, %374 : vector<16x16xf32>
    %c24 = arith.constant 24 : index
    %376 = memref.load %arg6[%c24] : memref<50xf32, #tpu.memory_space<smem>>
    %377 = vector.extract_strided_slice %333 {offsets = [4, 0], sizes = [16, 16], strides = [1, 1]} : vector<20x16xf32> to vector<16x16xf32>
    %378 = vector.broadcast %376 : f32 to vector<16x16xf32>
    %379 = arith.mulf %378, %377 : vector<16x16xf32>
    %380 = arith.addf %375, %379 : vector<16x16xf32>
    %c49 = arith.constant 49 : index
    %381 = memref.load %arg6[%c49] : memref<50xf32, #tpu.memory_space<smem>>
    %382 = vector.extract_strided_slice %334 {offsets = [4, 0], sizes = [16, 16], strides = [1, 1]} : vector<20x16xf32> to vector<16x16xf32>
    %383 = vector.broadcast %381 : f32 to vector<16x16xf32>
    %384 = arith.mulf %383, %382 : vector<16x16xf32>
    %385 = arith.addf %380, %384 : vector<16x16xf32>
    %386 = arith.addf %173, %226 : vector<16x16xf32>
    %387 = arith.addf %279, %332 : vector<16x16xf32>
    %388 = arith.addf %386, %387 : vector<16x16xf32>
    %389 = arith.addf %388, %385 : vector<16x16xf32>
    %c0_123 = arith.constant 0 : index
    %390 = memref.load %arg7[%c0_123] : memref<1xf32, #tpu.memory_space<smem>>
    %391 = vector.broadcast %390 : f32 to vector<16x16xf32>
    %392 = arith.addf %389, %391 : vector<16x16xf32>
    %cst_124 = arith.constant 0.000000e+00 : f32
    %393 = vector.broadcast %cst_124 : f32 to vector<16x16xf32>
    %394 = arith.subf %393, %392 : vector<16x16xf32>
    %395 = math.exp %394 : vector<16x16xf32>
    %cst_125 = arith.constant 1.000000e+00 : f32
    %396 = vector.broadcast %cst_125 : f32 to vector<16x16xf32>
    %397 = arith.addf %396, %395 : vector<16x16xf32>
    %cst_126 = arith.constant 1.000000e+00 : f32
    %398 = vector.broadcast %cst_126 : f32 to vector<16x16xf32>
    %399 = arith.divf %398, %397 : vector<16x16xf32>
    %400 = vector.extract_strided_slice %399 {offsets = [0, 0], sizes = [1, 16], strides = [1, 1]} : vector<16x16xf32> to vector<1x16xf32>
    %c0_127 = arith.constant 0 : index
    %c0_128 = arith.constant 0 : index
    %c0_129 = arith.constant 0 : index
    %401 = vector.load %arg10[%c0_127, %c0_128, %c0_129] : memref<1x1x256xf32, #tpu.memory_space<vmem>>, vector<1x1x16xf32>
    %402 = vector.shape_cast %401 : vector<1x1x16xf32> to vector<1x16xf32>
    %403 = vector.shape_cast %400 : vector<1x16xf32> to vector<1x1x16xf32>
    tpu.vector_store %arg10[%c0_127, %c0_128, %c0_129], %403 {strides = array<i32>} : memref<1x1x256xf32, #tpu.memory_space<vmem>>, vector<1x1x16xf32>,
    %404 = vector.extract_strided_slice %399 {offsets = [1, 0], sizes = [1, 16], strides = [1, 1]} : vector<16x16xf32> to vector<1x16xf32>
    %c0_130 = arith.constant 0 : index
    %c0_131 = arith.constant 0 : index
    %c16_132 = arith.constant 16 : index
    %405 = vector.load %arg10[%c0_130, %c0_131, %c16_132] : memref<1x1x256xf32, #tpu.memory_space<vmem>>, vector<1x1x16xf32>
    %406 = vector.shape_cast %405 : vector<1x1x16xf32> to vector<1x16xf32>
    %407 = vector.shape_cast %404 : vector<1x16xf32> to vector<1x1x16xf32>
    tpu.vector_store %arg10[%c0_130, %c0_131, %c16_132], %407 {strides = array<i32>} : memref<1x1x256xf32, #tpu.memory_space<vmem>>, vector<1x1x16xf32>,
    %408 = vector.extract_strided_slice %399 {offsets = [2, 0], sizes = [1, 16], strides = [1, 1]} : vector<16x16xf32> to vector<1x16xf32>
    %c0_133 = arith.constant 0 : index
    %c0_134 = arith.constant 0 : index
    %c32_135 = arith.constant 32 : index
    %409 = vector.load %arg10[%c0_133, %c0_134, %c32_135] : memref<1x1x256xf32, #tpu.memory_space<vmem>>, vector<1x1x16xf32>
    %410 = vector.shape_cast %409 : vector<1x1x16xf32> to vector<1x16xf32>
    %411 = vector.shape_cast %408 : vector<1x16xf32> to vector<1x1x16xf32>
    tpu.vector_store %arg10[%c0_133, %c0_134, %c32_135], %411 {strides = array<i32>} : memref<1x1x256xf32, #tpu.memory_space<vmem>>, vector<1x1x16xf32>,
    %412 = vector.extract_strided_slice %399 {offsets = [3, 0], sizes = [1, 16], strides = [1, 1]} : vector<16x16xf32> to vector<1x16xf32>
    %c0_136 = arith.constant 0 : index
    %c0_137 = arith.constant 0 : index
    %c48_138 = arith.constant 48 : index
    %413 = vector.load %arg10[%c0_136, %c0_137, %c48_138] : memref<1x1x256xf32, #tpu.memory_space<vmem>>, vector<1x1x16xf32>
    %414 = vector.shape_cast %413 : vector<1x1x16xf32> to vector<1x16xf32>
    %415 = vector.shape_cast %412 : vector<1x16xf32> to vector<1x1x16xf32>
    tpu.vector_store %arg10[%c0_136, %c0_137, %c48_138], %415 {strides = array<i32>} : memref<1x1x256xf32, #tpu.memory_space<vmem>>, vector<1x1x16xf32>,
    %416 = vector.extract_strided_slice %399 {offsets = [4, 0], sizes = [1, 16], strides = [1, 1]} : vector<16x16xf32> to vector<1x16xf32>
    %c0_139 = arith.constant 0 : index
    %c0_140 = arith.constant 0 : index
    %c64 = arith.constant 64 : index
    %417 = vector.load %arg10[%c0_139, %c0_140, %c64] : memref<1x1x256xf32, #tpu.memory_space<vmem>>, vector<1x1x16xf32>
    %418 = vector.shape_cast %417 : vector<1x1x16xf32> to vector<1x16xf32>
    %419 = vector.shape_cast %416 : vector<1x16xf32> to vector<1x1x16xf32>
    tpu.vector_store %arg10[%c0_139, %c0_140, %c64], %419 {strides = array<i32>} : memref<1x1x256xf32, #tpu.memory_space<vmem>>, vector<1x1x16xf32>,
    %420 = vector.extract_strided_slice %399 {offsets = [5, 0], sizes = [1, 16], strides = [1, 1]} : vector<16x16xf32> to vector<1x16xf32>
    %c0_141 = arith.constant 0 : index
    %c0_142 = arith.constant 0 : index
    %c80 = arith.constant 80 : index
    %421 = vector.load %arg10[%c0_141, %c0_142, %c80] : memref<1x1x256xf32, #tpu.memory_space<vmem>>, vector<1x1x16xf32>
    %422 = vector.shape_cast %421 : vector<1x1x16xf32> to vector<1x16xf32>
    %423 = vector.shape_cast %420 : vector<1x16xf32> to vector<1x1x16xf32>
    tpu.vector_store %arg10[%c0_141, %c0_142, %c80], %423 {strides = array<i32>} : memref<1x1x256xf32, #tpu.memory_space<vmem>>, vector<1x1x16xf32>,
    %424 = vector.extract_strided_slice %399 {offsets = [6, 0], sizes = [1, 16], strides = [1, 1]} : vector<16x16xf32> to vector<1x16xf32>
    %c0_143 = arith.constant 0 : index
    %c0_144 = arith.constant 0 : index
    %c96 = arith.constant 96 : index
    %425 = vector.load %arg10[%c0_143, %c0_144, %c96] : memref<1x1x256xf32, #tpu.memory_space<vmem>>, vector<1x1x16xf32>
    %426 = vector.shape_cast %425 : vector<1x1x16xf32> to vector<1x16xf32>
    %427 = vector.shape_cast %424 : vector<1x16xf32> to vector<1x1x16xf32>
    tpu.vector_store %arg10[%c0_143, %c0_144, %c96], %427 {strides = array<i32>} : memref<1x1x256xf32, #tpu.memory_space<vmem>>, vector<1x1x16xf32>,
    %428 = vector.extract_strided_slice %399 {offsets = [7, 0], sizes = [1, 16], strides = [1, 1]} : vector<16x16xf32> to vector<1x16xf32>
    %c0_145 = arith.constant 0 : index
    %c0_146 = arith.constant 0 : index
    %c112 = arith.constant 112 : index
    %429 = vector.load %arg10[%c0_145, %c0_146, %c112] : memref<1x1x256xf32, #tpu.memory_space<vmem>>, vector<1x1x16xf32>
    %430 = vector.shape_cast %429 : vector<1x1x16xf32> to vector<1x16xf32>
    %431 = vector.shape_cast %428 : vector<1x16xf32> to vector<1x1x16xf32>
    tpu.vector_store %arg10[%c0_145, %c0_146, %c112], %431 {strides = array<i32>} : memref<1x1x256xf32, #tpu.memory_space<vmem>>, vector<1x1x16xf32>,
    %432 = vector.extract_strided_slice %399 {offsets = [8, 0], sizes = [1, 16], strides = [1, 1]} : vector<16x16xf32> to vector<1x16xf32>
    %c0_147 = arith.constant 0 : index
    %c0_148 = arith.constant 0 : index
    %c128 = arith.constant 128 : index
    %433 = vector.load %arg10[%c0_147, %c0_148, %c128] : memref<1x1x256xf32, #tpu.memory_space<vmem>>, vector<1x1x16xf32>
    %434 = vector.shape_cast %433 : vector<1x1x16xf32> to vector<1x16xf32>
    %435 = vector.shape_cast %432 : vector<1x16xf32> to vector<1x1x16xf32>
    tpu.vector_store %arg10[%c0_147, %c0_148, %c128], %435 {strides = array<i32>} : memref<1x1x256xf32, #tpu.memory_space<vmem>>, vector<1x1x16xf32>,
    %436 = vector.extract_strided_slice %399 {offsets = [9, 0], sizes = [1, 16], strides = [1, 1]} : vector<16x16xf32> to vector<1x16xf32>
    %c0_149 = arith.constant 0 : index
    %c0_150 = arith.constant 0 : index
    %c144 = arith.constant 144 : index
    %437 = vector.load %arg10[%c0_149, %c0_150, %c144] : memref<1x1x256xf32, #tpu.memory_space<vmem>>, vector<1x1x16xf32>
    %438 = vector.shape_cast %437 : vector<1x1x16xf32> to vector<1x16xf32>
    %439 = vector.shape_cast %436 : vector<1x16xf32> to vector<1x1x16xf32>
    tpu.vector_store %arg10[%c0_149, %c0_150, %c144], %439 {strides = array<i32>} : memref<1x1x256xf32, #tpu.memory_space<vmem>>, vector<1x1x16xf32>,
    %440 = vector.extract_strided_slice %399 {offsets = [10, 0], sizes = [1, 16], strides = [1, 1]} : vector<16x16xf32> to vector<1x16xf32>
    %c0_151 = arith.constant 0 : index
    %c0_152 = arith.constant 0 : index
    %c160 = arith.constant 160 : index
    %441 = vector.load %arg10[%c0_151, %c0_152, %c160] : memref<1x1x256xf32, #tpu.memory_space<vmem>>, vector<1x1x16xf32>
    %442 = vector.shape_cast %441 : vector<1x1x16xf32> to vector<1x16xf32>
    %443 = vector.shape_cast %440 : vector<1x16xf32> to vector<1x1x16xf32>
    tpu.vector_store %arg10[%c0_151, %c0_152, %c160], %443 {strides = array<i32>} : memref<1x1x256xf32, #tpu.memory_space<vmem>>, vector<1x1x16xf32>,
    %444 = vector.extract_strided_slice %399 {offsets = [11, 0], sizes = [1, 16], strides = [1, 1]} : vector<16x16xf32> to vector<1x16xf32>
    %c0_153 = arith.constant 0 : index
    %c0_154 = arith.constant 0 : index
    %c176 = arith.constant 176 : index
    %445 = vector.load %arg10[%c0_153, %c0_154, %c176] : memref<1x1x256xf32, #tpu.memory_space<vmem>>, vector<1x1x16xf32>
    %446 = vector.shape_cast %445 : vector<1x1x16xf32> to vector<1x16xf32>
    %447 = vector.shape_cast %444 : vector<1x16xf32> to vector<1x1x16xf32>
    tpu.vector_store %arg10[%c0_153, %c0_154, %c176], %447 {strides = array<i32>} : memref<1x1x256xf32, #tpu.memory_space<vmem>>, vector<1x1x16xf32>,
    %448 = vector.extract_strided_slice %399 {offsets = [12, 0], sizes = [1, 16], strides = [1, 1]} : vector<16x16xf32> to vector<1x16xf32>
    %c0_155 = arith.constant 0 : index
    %c0_156 = arith.constant 0 : index
    %c192 = arith.constant 192 : index
    %449 = vector.load %arg10[%c0_155, %c0_156, %c192] : memref<1x1x256xf32, #tpu.memory_space<vmem>>, vector<1x1x16xf32>
    %450 = vector.shape_cast %449 : vector<1x1x16xf32> to vector<1x16xf32>
    %451 = vector.shape_cast %448 : vector<1x16xf32> to vector<1x1x16xf32>
    tpu.vector_store %arg10[%c0_155, %c0_156, %c192], %451 {strides = array<i32>} : memref<1x1x256xf32, #tpu.memory_space<vmem>>, vector<1x1x16xf32>,
    %452 = vector.extract_strided_slice %399 {offsets = [13, 0], sizes = [1, 16], strides = [1, 1]} : vector<16x16xf32> to vector<1x16xf32>
    %c0_157 = arith.constant 0 : index
    %c0_158 = arith.constant 0 : index
    %c208 = arith.constant 208 : index
    %453 = vector.load %arg10[%c0_157, %c0_158, %c208] : memref<1x1x256xf32, #tpu.memory_space<vmem>>, vector<1x1x16xf32>
    %454 = vector.shape_cast %453 : vector<1x1x16xf32> to vector<1x16xf32>
    %455 = vector.shape_cast %452 : vector<1x16xf32> to vector<1x1x16xf32>
    tpu.vector_store %arg10[%c0_157, %c0_158, %c208], %455 {strides = array<i32>} : memref<1x1x256xf32, #tpu.memory_space<vmem>>, vector<1x1x16xf32>,
    %456 = vector.extract_strided_slice %399 {offsets = [14, 0], sizes = [1, 16], strides = [1, 1]} : vector<16x16xf32> to vector<1x16xf32>
    %c0_159 = arith.constant 0 : index
    %c0_160 = arith.constant 0 : index
    %c224 = arith.constant 224 : index
    %457 = vector.load %arg10[%c0_159, %c0_160, %c224] : memref<1x1x256xf32, #tpu.memory_space<vmem>>, vector<1x1x16xf32>
    %458 = vector.shape_cast %457 : vector<1x1x16xf32> to vector<1x16xf32>
    %459 = vector.shape_cast %456 : vector<1x16xf32> to vector<1x1x16xf32>
    tpu.vector_store %arg10[%c0_159, %c0_160, %c224], %459 {strides = array<i32>} : memref<1x1x256xf32, #tpu.memory_space<vmem>>, vector<1x1x16xf32>,
    %460 = vector.extract_strided_slice %399 {offsets = [15, 0], sizes = [1, 16], strides = [1, 1]} : vector<16x16xf32> to vector<1x16xf32>
    %c0_161 = arith.constant 0 : index
    %c0_162 = arith.constant 0 : index
    %c240 = arith.constant 240 : index
    %461 = vector.load %arg10[%c0_161, %c0_162, %c240] : memref<1x1x256xf32, #tpu.memory_space<vmem>>, vector<1x1x16xf32>
    %462 = vector.shape_cast %461 : vector<1x1x16xf32> to vector<1x16xf32>
    %463 = vector.shape_cast %460 : vector<1x16xf32> to vector<1x1x16xf32>
    tpu.vector_store %arg10[%c0_161, %c0_162, %c240], %463 {strides = array<i32>} : memref<1x1x256xf32, #tpu.memory_space<vmem>>, vector<1x1x16xf32>,
    %464 = vector.shape_cast %52 : vector<1x32x256xf32> to vector<32x256xf32>
    %c0_163 = arith.constant 0 : index
    %c0_164 = arith.constant 0 : index
    %c0_165 = arith.constant 0 : index
    %465 = vector.load %arg10[%c0_163, %c0_164, %c0_165] : memref<1x1x256xf32, #tpu.memory_space<vmem>>, vector<1x1x256xf32>
    %466 = vector.shape_cast %465 : vector<1x1x256xf32> to vector<1x256xf32>
    %467 = vector.broadcast %466 : vector<1x256xf32> to vector<32x256xf32>
    %468 = arith.mulf %464, %467 : vector<32x256xf32>
    %c0_166 = arith.constant 0 : index
    %c0_167 = arith.constant 0 : index
    %c0_168 = arith.constant 0 : index
    %469 = vector.load %arg8[%c0_166, %c0_167, %c0_168] : memref<1x32x256xf32, #tpu.memory_space<vmem>>, vector<1x32x256xf32>
    %470 = vector.shape_cast %469 : vector<1x32x256xf32> to vector<32x256xf32>
    %471 = vector.shape_cast %468 : vector<32x256xf32> to vector<1x32x256xf32>
    tpu.vector_store %arg8[%c0_166, %c0_167, %c0_168], %471 {strides = array<i32>} : memref<1x32x256xf32, #tpu.memory_space<vmem>>, vector<1x32x256xf32>,
    return
  }
  func.func @transform_0(%arg0: i32) -> (i32, i32, i32) {
    %c0_i32 = arith.constant 0 : i32
    %c0_i32_0 = arith.constant 0 : i32
    %c0_i32_1 = arith.constant 0 : i32
    return %arg0, %c0_i32, %c0_i32_0 : i32, i32, i32
  }
  func.func @transform_1(%arg0: i32) -> (i32, i32) {
    %c0_i32 = arith.constant 0 : i32
    %c0_i32_0 = arith.constant 0 : i32
    %c0_i32_1 = arith.constant 0 : i32
    return %c0_i32, %c0_i32_0 : i32, i32
  }
  func.func @transform_2(%arg0: i32) -> (i32, i32) {
    %c0_i32 = arith.constant 0 : i32
    %c0_i32_0 = arith.constant 0 : i32
    %c0_i32_1 = arith.constant 0 : i32
    return %c0_i32, %c0_i32_0 : i32, i32
  }
  func.func @transform_3(%arg0: i32) -> (i32, i32) {
    %c0_i32 = arith.constant 0 : i32
    %c0_i32_0 = arith.constant 0 : i32
    %c0_i32_1 = arith.constant 0 : i32
    return %c0_i32, %c0_i32_0 : i32, i32
  }
  func.func @transform_4(%arg0: i32) -> (i32, i32) {
    %c0_i32 = arith.constant 0 : i32
    %c0_i32_0 = arith.constant 0 : i32
    %c0_i32_1 = arith.constant 0 : i32
    return %c0_i32, %c0_i32_0 : i32, i32
  }
  func.func @transform_5(%arg0: i32) -> i32 {
    %c0_i32 = arith.constant 0 : i32
    %c0_i32_0 = arith.constant 0 : i32
    return %c0_i32 : i32
  }
  func.func @transform_6(%arg0: i32) -> i32 {
    %c0_i32 = arith.constant 0 : i32
    %c0_i32_0 = arith.constant 0 : i32
    return %c0_i32 : i32
  }
  func.func @transform_7(%arg0: i32) -> (i32, i32, i32) {
    %c0_i32 = arith.constant 0 : i32
    %c0_i32_0 = arith.constant 0 : i32
    %c0_i32_1 = arith.constant 0 : i32
    return %arg0, %c0_i32, %c0_i32_0 : i32, i32, i32
  }
  func.func @transform_8(%arg0: i32) -> (i32, i32, i32) {
    %c0_i32 = arith.constant 0 : i32
    %c0_i32_0 = arith.constant 0 : i32
    %c0_i32_1 = arith.constant 0 : i32
    return %arg0, %c0_i32, %c0_i32_0 : i32, i32, i32
  }
  func.func @transform_9(%arg0: i32) -> (i32, i32, i32) {
    %c0_i32 = arith.constant 0 : i32
    %c0_i32_0 = arith.constant 0 : i32
    %c0_i32_1 = arith.constant 0 : i32
    return %arg0, %c0_i32, %c0_i32_0 : i32, i32, i32
  }
}

</mosaic_0001>

<bundles_post_ra>
// kernel: tpu_custom_call.1
= control target key start
LH: loop header
LB: loop body
LE: loop exit
PB: predicated region body
PF: predicated region fallthrough
CT: control target
= control target key end

     0   :  { %s4045_s0 = inlined_call_operand.hbm [shape: f32[2,32,256], index: 0, kind: input, shape index: {}]   ;;  %s4046_s1 = inlined_call_operand.vmem [shape: f32[32,2], index: 1, kind: input, shape index: {}]   ;;  %s4047_s2 = inlined_call_operand.vmem [shape: f32[1,2], index: 2, kind: input, shape index: {}]   ;;  %s4048_s3 = inlined_call_operand.vmem [shape: f32[32,2], index: 3, kind: input, shape index: {}]   ;;  %s4049_s4 = inlined_call_operand.vmem [shape: f32[32,1], index: 4, kind: input, shape index: {}]   ;;  %s4050_s5 = inlined_call_operand.vmem [shape: f32[50], index: 5, kind: input, shape index: {}]   ;;  %s4051_s6 = inlined_call_operand.<no memory space> [shape: f32[1], index: 6, kind: input, shape index: {}]   ;;  %s4052_s7 = inlined_call_operand.hbm [shape: f32[2,32,256], index: 7, kind: output, shape index: {0}]   ;;  %s4053_s8 = inlined_call_operand.vmem [shape: f32[2,32,1], index: 8, kind: output, shape index: {1}]   ;;  %s4054_s9 = inlined_call_operand.hbm [shape: f32[2,1,256], index: 9, kind: output, shape index: {2}]  }
   0x1   :  { %4150 = sst [smem:[#allocation121_spill]] %s4045_s0 }
   0x2   :  { %4151 = sst [smem:[#allocation122_spill]] %s4046_s1 }
   0x3   :  { %4152 = sst [smem:[#allocation123_spill]] %s4047_s2 }
   0x4   :  { %4153 = sst [smem:[#allocation124_spill]] %s4048_s3 }
   0x5   :  { %4154 = sst [smem:[#allocation125_spill]] %s4049_s4 }
   0x6   :  { %4155 = sst [smem:[#allocation126_spill]] %s4050_s5 }
   0x7   :  { %4156 = sst [smem:[#allocation127_spill]] %s4052_s7 }
   0x8   :  { %4157 = sst [smem:[#allocation128_spill]] %s4053_s8 }
   0x9   :  { %4158 = sst [smem:[#allocation129_spill]] %s4054_s9 }
   0xa   :  { %15 = sst [smem:[#allocation4]] %s4051_s6 }
   0xb   :  { %16 = vsyncpa [#allocation6], 0 }
   0xc   :  { %18 = vsyncpa [#allocation6 + $0x1], 0 }
   0xd   :  { %19 = vsyncpa [#allocation8], 0 }
   0xe   :  { %20 = vsyncpa [#allocation7], 0 }
   0xf   :  { %22 = vsyncpa [#allocation7 + $0x1], 0 }
  0x10   :  { %23 = vsyncpa [#allocation12], 0 }
  0x11   :  { %25 = vsyncpa [#allocation12 + $0x1], 0  ;;  %s2353_s11 = smov 0   ;;  %s2355_s12 = smov 0  }
  0x12   :  { %s2357_s13 = smov 0   ;;  %s2359_s14 = smov 0  }
  0x13 LB: > { %4159 = sst [smem:[#allocation17_spill]] %s2258_s11  ;;  %s2374_s6 = sadd.s32 4294967295, %s2270_s14   ;;  %s2270_s14 = sphi %s2359_s14, %s4508_s14   ;;  %s2266_s13 = sphi %s2357_s13, %s4511_s13   ;;  %s2262_s12 = sphi %s2355_s12, %s4510_s12   ;;  %s2258_s11 = sphi %s2353_s11, %s4509_s11  }
  0x14   : > { %4160 = sst [smem:[#allocation18_spill]] %s2262_s12  ;;  %s1942_s15 = sadd.s32 4294967294, %s2270_s14  }
  0x15   : > { %4161 = sst [smem:[#allocation19_spill]] %s2266_s13  ;;  %s2378_s16 = sadd.s32 1, %s2270_s14  }
  0x16   : > { %4162 = sst [smem:[#allocation20_spill]] %s2270_s14  ;;  %s38_s17 = sadd.s32 1, %s2266_s13 }
  0x17   : > { %4163 = sst [smem:[#allocation21_spill]] %s2374_s6  ;;  %s35_s18 = ssub.s32 %s2270_s14, %s2378_s16 }
  0x18   : > { %4164 = sst [smem:[#allocation22_spill]] %s2378_s16  ;;  %p45_p0 = scmp.ne.s32.totalorder %s2266_s13, %s2262_s12 }
  0x19   : > { %p36_p1 = scmp.eq.s32.totalorder %s35_s18, 0  ;;  %p46_p2 = scmp.eq.s32.totalorder %s2270_s14, 0 }
  0x1a   : > { %p51_p3 = scmp.ne.s32.totalorder %s2262_s12, %s2258_s11  ;;  %p4056_p4 = scmp.eq.s32.totalorder %s2374_s6, 0 }
  0x1b   : > { %s2390_s19 = scalar_select %p36_p1, %s2266_s13, %s38_s17  }
  0x1c   : > { %p2392_p5 = por %p46_p2, %p45_p0  ;;  %p2398_p6 = por %p4056_p4, %p51_p3 }
  0x1d   : > { %4165 = sst [smem:[#allocation23_spill]] %s2390_s19  ;;  %p201_p7 = scmp.eq.s32.totalorder %s2374_s6, 1 }
  0x1e   : > { %s4167_s21 = scalar_select %p2398_p6, 1, 0 }
  0x1f   : > { %p207_p8 = scmp.eq.s32.totalorder %s1942_s15, 1  ;;  %p1943_p9 = scmp.ge.s32.totalorder %s2270_s14, 1 }
  0x20   : > { %p266_p10 = scmp.lt.s32.totalorder %s2270_s14, 3  ;;  %p2405_p11 = por %p201_p7, %p45_p0 }
  0x21   : > { %p2409_p12 = por %p207_p8, %p51_p3  ;;  %s4173_s5 = sld [smem:[#allocation126_spill]] }
  0x22   : > { %s4168_s22 = scalar_select %p2405_p11, 1, 0 }
  0x23   : > { %s4170_s23 = scalar_select %p2409_p12, 1, 0 }
  0x24   : > { %4169 = sst [smem:[#allocation24_spill]] %s4168_s22  ;;  %p2413_p13 = pnand %p1943_p9, %p266_p10 }
  0x25   : > { %4171 = sst [smem:[#allocation25_spill]] %s4170_s23  ;;  %p2043_p2 = scmp.lt.s32.totalorder %s2270_s14, 2 }
  0x26   : > { %s4172_s24 = scalar_select %p2413_p13, 1, 0 }
  0x27   : > { %s291_s27 = sshll.u32 %s4173_s5, 4  ;;  %p2027_p1 = pneg %p2413_p13  ;;  %s292_s27 = int_to_ptr.vmem [resolvable:$true] %s291_s27 }
  0x28   : > { %s305_s29 = sand.u32 1, %s2266_s13   ;;  %p2433_p3 = pnand %p2043_p2, %p2392_p5 }
  0x29   : > { %p2426_p7 = pnand %p2027_p1, %p4056_p4  ;;  %s1946_s10 = sshll.u32 %s305_s29, 6 }
  0x2a   : > { %s2129_s15 = scalar_lea.vmem %s292_s27, 16  ;;  %p2137_p12 = scmp.lt.s32.totalorder %s292_s27, %s292_s27 }
  0x2b   : > { %p2130_p8 = scmp.ne.s32.totalorder %s292_s27, %s2129_s15  ;;  %p2131_p9 = pneg %p2426_p7 }
  0x2c   : > { %p2138_p11 = scmp.lt.s32.totalorder %s2129_s15, %s2129_s15 }
  0x2d   : > { %p2132_p10 = pnand %p2131_p9, %p2130_p8 }
  0x2e   : > { %p2139_p1 = por %p2138_p11, %p2137_p12 }
  0x2f   : > { %p2133_p0 = pneg %p2132_p10 }
  0x31   : > { %p2140_p4 = pnand %p2139_p1, %p2133_p0 }
  0x33   : > { %2143 = shalt.err (!%p2140_p4)
}
  0x34   : > { %s2272_s17 = smov [#allocation9]   ;;  %s2013_s18 = sshll.u32 %s2270_s14, 10 }
  0x35   : > { %2030 = dma.vmem_to_smem (!%p2426_p7), %s292_s27, 16, %s2272_s17, [#allocation8]  }
  0x36   : > { %s309_s20 = scalar_lea.vmem [#allocation5], %s1946_s10  ;;  %s4176_s0 = sld [smem:[#allocation121_spill]] }
  0x37   : > { %s316_s25 = sshll.u32 %s309_s20, 4  ;;  %s2449_s15 = scalar_lea.sflag [#allocation6], %s305_s29  ;;  %s2447_s25 = int_to_ptr.vmem [resolvable:$true] %s316_s25 }
  0x38   : > { %p2146_p5 = pneg %p2433_p3 }
  0x3c   : > { %s2445_s19 = scalar_lea.hbm %s4176_s0, %s2013_s18  ;;  %s2149_s10 = scalar_lea.hbm %s4176_s0, 2048 }
  0x3d   : > { %s2144_s13 = scalar_lea.hbm %s2445_s19, 1024  ;;  %p2150_p0 = scmp.lt.s32.totalorder %s2445_s19, %s4176_s0 }
  0x3e   : > { %p2145_p4 = scmp.ne.s32.totalorder %s2445_s19, %s2144_s13  ;;  %p2151_p2 = scmp.lt.s32.totalorder %s2149_s10, %s2144_s13 }
  0x40   : > { %p2147_p11 = pnand %p2146_p5, %p2145_p4  ;;  %p2152_p7 = por %p2151_p2, %p2150_p0 }
  0x42   : > { %p2148_p12 = pneg %p2147_p11 }
  0x44   : > { %p2153_p8 = pnand %p2152_p7, %p2148_p12 }
  0x46   : > { %2156 = shalt.err (!%p2153_p8)
}
  0x47   : > { %s2157_s29 = scalar_lea.vmem %s2447_s25, 1024  ;;  %s2273_s18 = smov [#allocation5]  }
  0x48   : > { %p2158_p9 = scmp.ne.s32.totalorder %s2447_s25, %s2157_s29  ;;  %s2162_s20 = sshll.u32 %s2273_s18, 4  ;;  %s2163_s20 = int_to_ptr.vmem [resolvable:$false] %s2162_s20 }
  0x49   : > { %s2164_s26 = scalar_lea.vmem %s2163_s20, 2048  ;;  %p2165_p4 = scmp.lt.s32.totalorder %s2447_s25, %s2163_s20 }
  0x4a   : > { %p2160_p10 = pnand %p2158_p9, %p2146_p5  ;;  %p2166_p11 = scmp.lt.s32.totalorder %s2164_s26, %s2157_s29 }
  0x4c   : > { %p2161_p1 = pneg %p2160_p10  ;;  %p2167_p6 = por %p2166_p11, %p2165_p4 }
  0x4e   : > { %p2168_p13 = pnand %p2167_p6, %p2161_p1 }
  0x50   : > { %2171 = shalt.err (!%p2168_p13)
}
  0x51   : > { %s2274_s13 = smov 256   ;;  %s2275_s27 = smov 16  }
  0x52   : > { %2034 = dma.hbm_to_vmem [thread:$0]  (!%p2433_p3), %s2445_s19, 1024, %s2447_s25, %s2449_s15, %s2274_s13, %s2274_s13, %s2275_s27  }
  0x53   : > { %p4177_p5 = scmp.ne.s32.totalorder %s4172_s24, 0 }
  0x55   : > { %328 = sbr.rel (%p4177_p5) target bundleno = 1280 (0x500), region = 48 }
  0x5a   : > { %s2473_s28 = sand.u32 1, %s2262_s12   ;;  %p4179_p6 = scmp.ne.s32.totalorder %s4167_s21, 0 }
  0x5b   : > { %4178 = sst [smem:[#allocation26_spill]] %s2473_s28  ;;  %s4060_s10 = sshll.u32 %s2473_s28, 6 }
  0x5c   : > { %s331_s5 = scalar_lea.sflag [#allocation6], %s2473_s28  ;;  %s334_s17 = scalar_lea.vmem [#allocation5], %s4060_s10 }
  0x5d   : > { %2241 = dma.done.wait (%p4179_p6), %s331_s5, 1024  }
  0x5e   : > { %2243 = vsyncadd (%p4179_p6), %s331_s5, 4294966272  ;;  %p4180_p13 = scmp.eq.s32.totalorder %s2374_s6, 0 }
  0x60   : > { %2245 = dma.done.wait (%p4180_p13), [#allocation8], 16   ;;  %p4181_p3 = pmov %p4180_p13 }
  0x62   : > { %2247 = vsyncadd (%p4181_p3), [#allocation8], 4294967280 }
  0x63   : > { %343 = sfence }
  0x64   : > { %v2487_v0 = vld [vmem:[%s334_s17 + $0x20] sm:$0xff]  ;;  %v2489_v1 = vld [vmem:[%s334_s17 + $0x28] sm:$0xff]  ;;  %v2497_v5 = vld [vmem:[%s334_s17 + $0x10] sm:$0xff]  ;;  %s4182_s1 = sld [smem:[#allocation122_spill]]  ;;  %vm449_vm0 = vcmask 15360   ;;  %p384_p12 = scmp.lt.s32.totalorder %s2374_s6, 1 }
  0x65   : > { %v2491_v2 = vld [vmem:[%s334_s17] sm:$0xff]  ;;  %v409_v3 = vadd.f32 %v2489_v1, %v2487_v0  ;;  %v2495_v4 = vld [vmem:[%s334_s17 + $0x8] sm:$0xff]  ;;  %v2499_v6 = vld [vmem:[%s334_s17 + $0x18] sm:$0xff]  ;;  %v426_v15 = vmax.f32 %v2487_v0, %v2489_v1  ;;  %s4183_s2 = sld [smem:[#allocation123_spill]]  ;;  %vm537_vm1 = vcmask 7168   ;;  %s2278_s30 = smov 114  }
  0x66   : > { %v403_v7 = vadd.f32 %v2495_v4, %v2491_v2  ;;  %v420_v8 = vmax.f32 %v2491_v2, %v2495_v4  ;;  %v406_v9 = vadd.f32 %v2499_v6, %v2497_v5  ;;  %v2507_v10 = vld [vmem:[%s334_s17 + $0x30] sm:$0xff]  ;;  %v2509_v11 = vld [vmem:[%s334_s17 + $0x38] sm:$0xff]  ;;  %v423_v13 = vmax.f32 %v2497_v5, %v2499_v6  ;;  %s4185_s3 = sld [smem:[#allocation124_spill]]  ;;  %s2279_s25 = smov 2  }
  0x67   : > { %410 = vadd.xlane.f32.xlu1 %v409_v3  ;;  %v412_v12 = vadd.f32 %v2509_v11, %v2507_v10  ;;  %v429_v14 = vmax.f32 %v2507_v10, %v2509_v11  ;;  %v4081_v3 = vlaneseq  ;;  %s4186_s4 = sld [smem:[#allocation125_spill]]  ;;  %s2280_s15 = smov 82   ;;  %vm613_vm2 = vcmask 139280  }
  0x68   : > { %404 = vadd.xlane.f32.xlu0 %v403_v7  ;;  %s385_s5 = scalar_select %p384_p12, %s2374_s6, 1  ;;  %vm768_vm3 = vcmask 1046528   ;;  %vm803_vm4 = vcmask 1045504   ;;  %vm838_vm5 = vcmask 1044480   ;;  %vm873_vm6 = vcmask 1043456  }
  0x69   : > { %s4187_s8 = sld [smem:[#allocation128_spill]]  ;;  %s2281_s29 = smov 98  }
  0x6a   : > { %v432_v19 = vld [vmem:[%s4182_s1] sm:$0xff]  ;;  %v433_v23 = vld [vmem:[%s4182_s1 + $0x8] sm:$0xff]  ;;  %v434_v24 = vld [vmem:[%s4182_s1 + $0x10] sm:$0xff]  ;;  %s2014_s17 = sshll.u32 %s385_s5, 5  ;;  %s2282_s18 = smov 50  }
  0x6b   : > { %421 = vmax.xlane.f32.xlu1 %v420_v8  ;;  %v435_v30 = vld [vmem:[%s4182_s1 + $0x18] sm:$0xff]  ;;  %v440_v7 = vld [vmem:[%s4183_s2] sm:$0x1]  ;;  %s2283_s20 = smov 66   ;;  %s2284_s26 = smov 18  }
  0x6c   : > { %407 = vadd.xlane.f32.xlu0 %v406_v9  ;;  %s2285_s13 = smov 34   ;;  %s2653_s27 = sld [smem:[#allocation9 + $0x1c]] }
  0x6d   : > { %s2655_s5 = sld [smem:[#allocation9 + $0x21]] }
  0x6e   : > { %s2659_s19 = sld [smem:[#allocation9 + $0x2b]] }
  0x6f   : > { %413 = vadd.xlane.f32.xlu1 %v412_v12  ;;  %s388_s24 = scalar_lea.vmem %s4187_s8, %s2014_s17  ;;  %s2657_s17 = sld [smem:[#allocation9 + $0x26]] }
  0x70   : > { %424 = vmax.xlane.f32.xlu0 %v423_v13  ;;  %v2543_v13 = vshrl.u32 %v4081_v3, 7  ;;  %s2661_s21 = sld [smem:[#allocation9 + $0x30]] }
  0x71   : > { %s2681_s10 = sld [smem:[#allocation9 + $0x2f]] }
  0x72   : > { %4184 = vst [vmem:[#allocation27_spill] sm:$0xff] %v2543_v13  ;;  %s2683_s0 = sld [smem:[#allocation9 + $0x19]] }
  0x73   : > { %430 = vmax.xlane.f32.xlu1 %v429_v14  ;;  %s2685_s1 = sld [smem:[#allocation9 + $0x1e]] }
  0x74   : > { %427 = vmax.xlane.f32.xlu0 %v426_v15  ;;  %s2687_s2 = sld [smem:[#allocation9 + $0x23]] }
  0x75   : > { %s2693_s8 = sld [smem:[#allocation9 + $0x3]] }
  0x76   : > { %s2695_s12 = sld [smem:[#allocation9 + $0x8]] }
  0x77   : > { %s2697_s16 = sld [smem:[#allocation9 + $0xd]] }
  0x78   : > { %4196 = sst [smem:[#allocation36_spill]] %s2683_s0 }
  0x79   : > { %s2699_s14 = sld [smem:[#allocation9 + $0x12]] }
  0x7a   : > { %s2701_s23 = sld [smem:[#allocation9 + $0x17]] }
  0x7b   : > { %s2703_s11 = sld [smem:[#allocation9 + $0x1]] }
  0x7c   : > { %s2705_s7 = sld [smem:[#allocation9 + $0x6]] }
  0x7d   : > { %s2707_s9 = sld [smem:[#allocation9 + $0xb]] }
  0x7e   : > { %s2709_s22 = sld [smem:[#allocation9 + $0x10]] }
  0x7f   : > { %s2713_s6 = sld [smem:[#allocation9 + $0x15]] }
  0x80   : > { %4197 = sst [smem:[#allocation37_spill]] %s2701_s23 }
  0x81   : > { %4198 = sst [smem:[#allocation38_spill]] %s2703_s11 }
  0x82   : > { %4199 = sst [smem:[#allocation39_spill]] %s2705_s7 }
  0x83   : > { %4200 = sst [smem:[#allocation40_spill]] %s2707_s9 }
  0x84   : > { %4201 = sst [smem:[#allocation41_spill]] %s2709_s22 }
  0x85   : > { %4202 = sst [smem:[#allocation42_spill]] %s2713_s6 }
  0x86   : > { %s2715_s28 = sld [smem:[#allocation9 + $0x1d]] }
  0x87   : > { %s2717_s23 = sld [smem:[#allocation9 + $0x22]] }
  0x88   : > { %s2719_s11 = sld [smem:[#allocation9 + $0x27]] }
  0x89   : > { %s2723_s9 = sld [smem:[#allocation9 + $0x2c]] }
  0x8a   : > { %s2725_s22 = sld [smem:[#allocation9 + $0x31]] }
  0x8b   : > { %s2727_s7 = sld [smem:[#allocation9 + $0x2]] }
  0x8c   : > { %4203 = sst [smem:[#allocation43_spill]] %s2715_s28 }
  0x8d   : > { %4204 = sst [smem:[#allocation44_spill]] %s2717_s23 }
  0x8e   : > { %4205 = sst [smem:[#allocation45_spill]] %s2719_s11 }
  0x8f   : > { %s2729_s6 = sld [smem:[#allocation9 + $0x7]] }
  0x90   : > { %4206 = sst [smem:[#allocation46_spill]] %s2725_s22 }
  0x91   : > { %s2733_s11 = sld [smem:[#allocation9 + $0xc]] }
  0x92   : > { %s2735_s23 = sld [smem:[#allocation9 + $0x11]] }
  0x93   : > { %s2737_s28 = sld [smem:[#allocation9 + $0x16]] }
  0x94   : > { %s2739_s22 = sld [smem:[#allocation9]] }
  0x95   : > { %4207 = sst [smem:[#allocation47_spill]] %s2729_s6 }
  0x96   : > { %s2743_s6 = sld [smem:[#allocation9 + $0x5]] }
  0x97   : > { %4208 = sst [smem:[#allocation48_spill]] %s2733_s11 }
  0x98   : > { %s2745_s11 = sld [smem:[#allocation9 + $0xa]] }
  0x99   : > { %4209 = sst [smem:[#allocation49_spill]] %s2737_s28 }
  0x9a   : > { %4210 = sst [smem:[#allocation50_spill]] %s2739_s22 }
  0x9b   : > { %s2747_s28 = sld [smem:[#allocation9 + $0xf]] }
  0x9c   : > { %s2753_s22 = sld [smem:[#allocation9 + $0x14]] }
  0x9d   : > { %s4231_s0 = sld [smem:[#allocation45_spill]] }
  0xf0   : > { %v411_v16 = vpop.xlane.xlu1 %410 }
  0xf1   : > { %v405_v17 = vpop.xlane.xlu0 %404  ;;  %v418_v20 = vmul.f32 0.00390625, %v411_v16 }
  0xf2   : > { %v416_v18 = vmul.f32 0.00390625, %v405_v17  ;;  %v4080_v17 = vsub.s32 0, %v2543_v13 }
  0xf3   : > { %v447_v29 = vmul.f32 %v434_v24, %v418_v20  ;;  %v436_v20 = vld [vmem:[%s4185_s3] sm:$0xff] }
  0xf4   : > { %v422_v21 = vpop.xlane.xlu1 %421  ;;  %v445_v25 = vmul.f32 %v432_v19, %v416_v18 }
  0xf5   : > { %v408_v22 = vpop.xlane.xlu0 %407  ;;  %v465_v34 = vmul.f32 %v432_v19, %v422_v21  ;;  %v453_v40 = vsel %vm449_vm0, %v447_v29, 0.0  ;;  %v437_v19 = vld [vmem:[%s4185_s3 + $0x8] sm:$0xff] }
  0xf6   : > { %v417_v26 = vmul.f32 0.00390625, %v408_v22  ;;  %v450_v33 = vsel %vm449_vm0, %v445_v25, 0.0  ;;  %v439_v22 = vld [vmem:[%s4185_s3 + $0x18] sm:$0xff] }
  0xf7   : > { %v469_v46 = vsel %vm449_vm0, %v465_v34, 0.0  ;;  %v441_v34 = vld [vmem:[%s4186_s4] sm:$0xff] }
  0xf8   : > { %v414_v27 = vpop.xlane.xlu1 %413  ;;  %v446_v28 = vmul.f32 %v433_v23, %v417_v26 }
  0xf9   : > { %v419_v31 = vmul.f32 0.00390625, %v414_v27  ;;  %v425_v32 = vpop.xlane.xlu0 %424 }
  0xfa   : > { %v451_v35 = vsel %vm449_vm0, %v446_v28, 0.0  ;;  %v466_v36 = vmul.f32 %v433_v23, %v425_v32  ;;  %v438_v23 = vld [vmem:[%s4185_s3 + $0x10] sm:$0xff]  ;;  %v2276_v32 = vmov 0   ;;  %s2689_s3 = sld [smem:[#allocation9 + $0x28]] }
  0xfb   : > { %v452_v37 = vadd.f32 %v451_v35, %v450_v33  ;;  %v448_v38 = vmul.f32 %v435_v30, %v419_v31  ;;  %2104 = vset.pattern.permute.xlu1 %v2276_v32  ;;  %2103 = vset.pattern.permute.xlu0 %v2276_v32  ;;  %v442_v33 = vld [vmem:[%s4186_s4 + $0x8] sm:$0xff] }
  0xfc   : > { %v470_v39 = vsel %vm449_vm0, %v466_v36, 0.0  ;;  %v431_v41 = vpop.xlane.xlu1 %430  ;;  %v506_v35 = vmul.f32 2.0, %v442_v33  ;;  %v505_v36 = vmul.f32 2.0, %v441_v34 }
  0xfd   : > { %v454_v42 = vadd.f32 %v453_v40, %v452_v37  ;;  %v428_v43 = vpop.xlane.xlu0 %427  ;;  %v455_v44 = vsel %vm449_vm0, %v448_v38, 0.0  ;;  %v468_v45 = vmul.f32 %v435_v30, %v431_v41  ;;  %v471_v48 = vadd.f32 %v470_v39, %v469_v46  ;;  %v444_v37 = vld [vmem:[%s4186_s4 + $0x18] sm:$0xff]  ;;  %v443_v38 = vld [vmem:[%s4186_s4 + $0x10] sm:$0xff]  ;;  %s2691_s4 = sld [smem:[#allocation9 + $0x2d]] }
  0xfe   : > { %v467_v47 = vmul.f32 %v434_v24, %v428_v43  ;;  %v508_v43 = vmul.f32 2.0, %v444_v37 }
  0xff   : > { %v456_v49 = vadd.f32 %v455_v44, %v454_v42  ;;  %v474_v51 = vsel %vm449_vm0, %v468_v45, 0.0  ;;  %v507_v44 = vmul.f32 2.0, %v443_v38 }
 0x100   : > { %v472_v50 = vsel %vm449_vm0, %v467_v47, 0.0 }
 0x101   : > { %v473_v52 = vadd.f32 %v472_v50, %v471_v48  ;;  %v457_v53 = vrot.slane %v456_v49, 4 }
 0x103   : > { %v458_v54 = vadd.f32 %v457_v53, %v456_v49  ;;  %v475_v55 = vadd.f32 %v474_v51, %v473_v52 }
 0x105   : > { %v459_v56 = vrot.slane %v458_v54, 2  ;;  %v476_v57 = vrot.slane %v475_v55, 4 }
 0x107   : > { %v460_v58 = vadd.f32 %v459_v56, %v458_v54  ;;  %v477_v59 = vadd.f32 %v476_v57, %v475_v55 }
 0x109   : > { %v461_v60 = vrot.slane %v460_v58, 1  ;;  %v478_v61 = vrot.slane %v477_v59, 2 }
 0x10b   : > { %v462_v62 = vadd.f32 %v461_v60, %v460_v58  ;;  %v479_v63 = vadd.f32 %v478_v61, %v477_v59 }
 0x10d   : > { %v480_v8 = vrot.slane %v479_v63, 1  ;;  %v463_v9 = vadd.f32 %v462_v62, %v440_v7 }
 0x10f   : > { %v481_v12 = vadd.f32 %v480_v8, %v479_v63  ;;  %v464_v15 = vmax.f32 %v463_v9, 0.0 }
 0x111   : > { %v482_v14 = vadd.f32 %v481_v12, %v440_v7 }
 0x113   : > { %v483_v16 = vmax.f32 %v482_v14, 0.0 }
 0x115   : > { %v484_v18 = vadd.f32 %v483_v16, %v464_v15 }
 0x117   : > { %v488_v21 = vrot.slane %v484_v18, %v4080_v17 }
 0x119   : > { %v490_v24 = vmul.f32 %v488_v21, %v437_v19  ;;  %v489_v25 = vmul.f32 %v488_v21, %v436_v20  ;;  %v492_v28 = vmul.f32 %v488_v21, %v439_v22  ;;  %v491_v29 = vmul.f32 %v488_v21, %v438_v23 }
 0x11b   : > { %v496_v26 = vsel %vm449_vm0, %v490_v24, 0.0  ;;  %v493_v27 = vsel %vm449_vm0, %v489_v25, 0.0  ;;  %v502_v30 = vsel %vm449_vm0, %v492_v28, 0.0  ;;  %v499_v31 = vsel %vm449_vm0, %v491_v29, 0.0 }
 0x11c   : > { %497 = vadd.xlane.f32.xlu1 %v496_v26  ;;  %494 = vadd.xlane.f32.xlu0 %v493_v27  ;;  %v2277_v27 = vmov 0.0  }
 0x11d   : > { %392 = vst [vmem:[#allocation3] sm:$0xff] %v2277_v27  ;;  %389 = vst [vmem:[#allocation2] sm:$0xff] %v2277_v27 }
 0x11e   : > { %390 = vst [vmem:[#allocation2 + $0x8] sm:$0xff] %v2277_v27  ;;  %391 = vst [vmem:[#allocation2 + $0x10] sm:$0xf] %v2277_v27 }
 0x11f   : > { %393 = vst [vmem:[#allocation3 + $0x8] sm:$0xff] %v2277_v27  ;;  %394 = vst [vmem:[#allocation3 + $0x10] sm:$0xf] %v2277_v27 }
 0x120   : > { %503 = vadd.xlane.f32.xlu1 %v502_v30  ;;  %500 = vadd.xlane.f32.xlu0 %v499_v31 }
 0x1a5   : > { %v498_v39 = vpop.xlane.xlu1 %497  ;;  %v495_v40 = vpop.xlane.xlu0 %494 }
 0x1a6   : > { %v510_v41 = vadd.f32 %v506_v35, %v498_v39  ;;  %v509_v42 = vadd.f32 %v505_v36, %v495_v40 }
 0x1a8   : > { %v514_v45 = vsub.f32 0.0, %v510_v41  ;;  %v513_v46 = vsub.f32 0.0, %v509_v42 }
 0x1a9   : > { %v504_v47 = vpop.xlane.xlu1 %503  ;;  %v501_v48 = vpop.xlane.xlu0 %500 }
 0x1aa   : > { %v519_v49 = vmul.f32 1.442695, %v514_v45  ;;  %v517_v50 = vmul.f32 1.442695, %v513_v46  ;;  %v512_v51 = vadd.f32 %v508_v43, %v504_v47  ;;  %v511_v52 = vadd.f32 %v507_v44, %v501_v48 }
 0x1ac   : > { %2105 = vpow2.f32 %v519_v49  ;;  %v516_v53 = vsub.f32 0.0, %v512_v51  ;;  %v515_v54 = vsub.f32 0.0, %v511_v52 }
 0x1ad   : > { %2107 = vpow2.f32 %v517_v50 }
 0x1ae   : > { %v523_v55 = vmul.f32 1.442695, %v516_v53  ;;  %v521_v56 = vmul.f32 1.442695, %v515_v54 }
 0x1b0   : > { %2109 = vpow2.f32 %v523_v55 }
 0x1b1   : > { %2111 = vpow2.f32 %v521_v56 }
 0x1b9   : > { %v2106_v57 = vpop.eup %2105 }
 0x1ba   : > { %v2108_v58 = vpop.eup %2107  ;;  %v526_v59 = vadd.f32 1.0, %v2106_v57 }
 0x1bb   : > { %v525_v60 = vadd.f32 1.0, %v2108_v58 }
 0x1bc   : > { %2113 = vrcp.f32 %v526_v59 }
 0x1bd   : > { %v2110_v61 = vpop.eup %2109  ;;  %2115 = vrcp.f32 %v525_v60 }
 0x1be   : > { %v2112_v62 = vpop.eup %2111  ;;  %v528_v63 = vadd.f32 1.0, %v2110_v61 }
 0x1bf   : > { %v527_v7 = vadd.f32 1.0, %v2112_v62 }
 0x1c0   : > { %2117 = vrcp.f32 %v528_v63 }
 0x1c1   : > { %2119 = vrcp.f32 %v527_v7 }
 0x1c9   : > { %v2114_v8 = vpop.eup %2113 }
 0x1ca   : > { %v2116_v9 = vpop.eup %2115  ;;  %539 = vst.msk [vmem:[%s388_s24 + $0x8] sm:$0xff] %vm537_vm1, %v2114_v8  ;;  %549 = vperm.xlu1 %2104, %v2114_v8  }
 0x1cb   : > { %538 = vst.msk [vmem:[%s388_s24] sm:$0xff] %vm537_vm1, %v2116_v9  ;;  %544 = vperm.xlu0 %2103, %v2116_v9  }
 0x1cd   : > { %v2118_v12 = vpop.eup %2117 }
 0x1ce   : > { %v2120_v14 = vpop.eup %2119  ;;  %541 = vst.msk [vmem:[%s388_s24 + $0x18] sm:$0xff] %vm537_vm1, %v2118_v12 }
 0x1cf   : > { %540 = vst.msk [vmem:[%s388_s24 + $0x10] sm:$0xff] %vm537_vm1, %v2120_v14  ;;  %554 = vperm.xlu1 %2104, %v2120_v14   ;;  %s2663_s24 = sld [smem:[#allocation9 + $0x1a]] }
 0x1d3   : > { %559 = vperm.xlu1 %2104, %v2118_v12  }
 0x245   : > { %v550_v15 = vpop.permute.xlu1 %549 }
 0x246   : > { %v545_v18 = vpop.permute.xlu0 %544  ;;  %v2585_v21 = vmul.f32 %v550_v15, %v2497_v5  ;;  %v2597_v25 = vmul.f32 %v550_v15, %v2499_v6  ;;  %v4083_v15 = vstv %s2653_s27 }
 0x247   : > { %v2588_v22 = vmul.f32 %v545_v18, %v2491_v2  ;;  %v2607_v2 = vmul.f32 %v545_v18, %v2495_v4  ;;  %v2758_v18 = vstv %s2657_s17  ;;  %s2781_s17 = sld [smem:[#allocation9 + $0x9]] }
 0x248   : > { %4189 = vst [vmem:[#allocation29_spill] sm:$0xff] %v2585_v21  ;;  %4193 = vst [vmem:[#allocation33_spill] sm:$0xff] %v2597_v25 }
 0x249   : > { %4190 = vst [vmem:[#allocation30_spill] sm:$0xff] %v2588_v22  ;;  %4195 = vst [vmem:[#allocation35_spill] sm:$0xff] %v2607_v2  ;;  %v570_v4 = vadd.f32 %v2585_v21, %v2588_v22  ;;  %v579_v38 = vadd.f32 %v2597_v25, %v2607_v2 }
 0x24a   : > { %v555_v16 = vpop.permute.xlu1 %554  ;;  %4212 = vst [vmem:[#allocation52_spill] sm:$0xff] %v2758_v18 }
 0x24b   : > { %v2582_v19 = vmul.f32 %v555_v16, %v2487_v0  ;;  %v2600_v26 = vmul.f32 %v555_v16, %v2489_v1  ;;  %v2751_v16 = vstv %s2655_s5  ;;  %s2767_s5 = sld [smem:[#allocation9 + $0x4]] }
 0x24c   : > { %4211 = vst [vmem:[#allocation51_spill] sm:$0xff] %v2751_v16 }
 0x24d   : > { %4188 = vst [vmem:[#allocation28_spill] sm:$0xff] %v2582_v19  ;;  %4194 = vst [vmem:[#allocation34_spill] sm:$0xff] %v2600_v26  ;;  %v591_v0 = vmax.f32 %v2588_v22, %v2582_v19  ;;  %v600_v1 = vmax.f32 %v2607_v2, %v2600_v26  ;;  %v571_v33 = vadd.f32 %v570_v4, %v2582_v19 }
 0x24e   : > { %v560_v20 = vpop.permute.xlu1 %559  ;;  %v580_v41 = vadd.f32 %v579_v38, %v2600_v26  ;;  %v2814_v38 = vstv %s2689_s3  ;;  %s4235_s3 = sld [smem:[#allocation46_spill]] }
 0x24f   : > { %v2591_v23 = vmul.f32 %v560_v20, %v2507_v10  ;;  %v2594_v24 = vmul.f32 %v560_v20, %v2509_v11  ;;  %v2761_v20 = vstv %s2659_s19  ;;  %s2793_s19 = sld [smem:[#allocation9 + $0xe]]  ;;  %4230 = vst [vmem:[#allocation62_spill] sm:$0xff] %v2814_v38 }
 0x250   : > { %4213 = vst [vmem:[#allocation53_spill] sm:$0xff] %v2761_v20 }
 0x251   : > { %4191 = vst [vmem:[#allocation31_spill] sm:$0xff] %v2591_v23  ;;  %4192 = vst [vmem:[#allocation32_spill] sm:$0xff] %v2594_v24  ;;  %v592_v5 = vmax.f32 %v2585_v21, %v2591_v23  ;;  %v601_v11 = vmax.f32 %v2597_v25, %v2594_v24  ;;  %v572_v35 = vadd.f32 %v571_v33, %v2591_v23 }
 0x252   : > { %v581_v43 = vadd.f32 %v580_v41, %v2594_v24  ;;  %v2825_v41 = vstv %s2699_s14  ;;  %s4459_s14 = sld [smem:[#allocation26_spill]] }
 0x253   : > { %v593_v10 = vmax.f32 %v591_v0, %v592_v5  ;;  %v602_v29 = vmax.f32 %v600_v1, %v601_v11  ;;  %v573_v39 = vrot.slane %v572_v35, 4  ;;  %v2764_v0 = vstv %s2661_s21  ;;  %s4219_s21 = sld [smem:[#allocation37_spill]] }
 0x254   : > { %v582_v46 = vrot.slane %v581_v43, 4  ;;  %4214 = vst [vmem:[#allocation54_spill] sm:$0xff] %v2764_v0  ;;  %v4084_v5 = vstv %s2663_s24 }
 0x255   : > { %v594_v6 = vrot.slane %v593_v10, 4  ;;  %v603_v32 = vrot.slane %v602_v29, 4  ;;  %v574_v42 = vadd.f32 %v573_v39, %v572_v35  ;;  %v2803_v35 = vstv %s2687_s2  ;;  %s4233_s2 = sld [smem:[#allocation47_spill]] }
 0x256   : > { %v583_v49 = vadd.f32 %v582_v46, %v581_v43  ;;  %4226 = vst [vmem:[#allocation61_spill] sm:$0xff] %v2803_v35  ;;  %v2817_v39 = vstv %s2691_s4  ;;  %s4236_s4 = sld [smem:[#allocation49_spill]] }
 0x257   : > { %v595_v28 = vmax.f32 %v593_v10, %v594_v6  ;;  %v604_v37 = vmax.f32 %v602_v29, %v603_v32  ;;  %v575_v45 = vrot.slane %v574_v42, 2  ;;  %v2796_v32 = vstv %s2681_s10  ;;  %s4229_s10 = sld [smem:[#allocation44_spill]]  ;;  %4232 = vst [vmem:[#allocation63_spill] sm:$0xff] %v2817_v39 }
 0x258   : > { %v584_v52 = vrot.slane %v583_v49, 2  ;;  %4221 = vst [vmem:[#allocation59_spill] sm:$0xff] %v2796_v32 }
 0x259   : > { %v596_v30 = vrot.slane %v595_v28, 2  ;;  %v605_v40 = vrot.slane %v604_v37, 2  ;;  %v576_v48 = vadd.f32 %v575_v45, %v574_v42  ;;  %v2828_v42 = vstv %s4219_s21  ;;  %s4489_s21 = sld [smem:[#allocation24_spill]] }
 0x25a   : > { %v585_v54 = vadd.f32 %v584_v52, %v583_v49 }
 0x25b   : > { %v597_v31 = vmax.f32 %v595_v28, %v596_v30  ;;  %v606_v44 = vmax.f32 %v604_v37, %v605_v40  ;;  %v577_v51 = vrot.slane %v576_v48, 1  ;;  %v2811_v37 = vstv %s2695_s12  ;;  %s4234_s12 = sld [smem:[#allocation48_spill]] }
 0x25c   : > { %v586_v55 = vrot.slane %v585_v54, 1  ;;  %v2822_v40 = vstv %s2697_s16  ;;  %s4237_s16 = sld [smem:[#allocation50_spill]] }
 0x25d   : > { %v598_v34 = vrot.slane %v597_v31, 1  ;;  %v607_v47 = vrot.slane %v606_v44, 1  ;;  %v578_v53 = vadd.f32 %v577_v51, %v576_v48  ;;  %v2847_v52 = vstv %s4229_s10 }
 0x25e   : > { %v587_v57 = vadd.f32 %v586_v55, %v585_v54  ;;  %4238 = vst [vmem:[#allocation64_spill] sm:$0xff] %v2847_v52  ;;  %v2853_v54 = vstv %s2723_s9  ;;  %s2288_s9 = smov 124  }
 0x25f   : > { %v599_v36 = vmax.f32 %v597_v31, %v598_v34  ;;  %v608_v50 = vmax.f32 %v606_v44, %v607_v47  ;;  %v589_v56 = vmul.f32 0.03125, %v578_v53  ;;  %v2800_v34 = vstv %s2685_s1  ;;  %s2819_s1 = sld [smem:[#allocation9 + $0x18]]  ;;  %4240 = vst [vmem:[#allocation66_spill] sm:$0xff] %v2853_v54  ;;  %p4491_p2 = scmp.ne.s32.totalorder %s4489_s21, 0 }
 0x260   : > { %v590_v58 = vmul.f32 0.03125, %v587_v57  ;;  %4224 = vst [vmem:[#allocation60_spill] sm:$0xff] %v2800_v34  ;;  %v2850_v53 = vstv %s4231_s0  ;;  %s4281_s0 = sld [smem:[#allocation36_spill]] }
 0x261   : > { %624 = vrot.lane.b32.xlu0 %v599_v36, %s2278_s30  ;;  %616 = vrot.lane.b32.xlu1 %v599_v36, %s2279_s25  ;;  %4239 = vst [vmem:[#allocation65_spill] sm:$0xff] %v2850_v53  ;;  %v2862_v57 = vstv %s4234_s12 }
 0x265   : > { %640 = vrot.lane.b32.xlu0 %v599_v36, %s2280_s15  ;;  %632 = vrot.lane.b32.xlu1 %v599_v36, %s2281_s29 }
 0x269   : > { %656 = vrot.lane.b32.xlu0 %v599_v36, %s2282_s18  ;;  %648 = vrot.lane.b32.xlu1 %v599_v36, %s2283_s20 }
 0x26d   : > { %672 = vrot.lane.b32.xlu0 %v599_v36, %s2284_s26  ;;  %664 = vrot.lane.b32.xlu1 %v599_v36, %s2285_s13 }
 0x271   : > { %690 = vrot.lane.b32.xlu0 %v608_v50, %s2278_s30  ;;  %682 = vrot.lane.b32.xlu1 %v608_v50, %s2279_s25 }
 0x275   : > { %706 = vrot.lane.b32.xlu0 %v608_v50, %s2280_s15  ;;  %698 = vrot.lane.b32.xlu1 %v608_v50, %s2281_s29 }
 0x279   : > { %722 = vrot.lane.b32.xlu0 %v608_v50, %s2282_s18  ;;  %714 = vrot.lane.b32.xlu1 %v608_v50, %s2283_s20 }
 0x27d   : > { %652 = vrot.lane.b32.xlu0 %v589_v56, %s2282_s18  ;;  %610 = vrot.lane.b32.xlu1 %v589_v56, %s2279_s25 }
 0x281   : > { %668 = vrot.lane.b32.xlu0 %v589_v56, %s2284_s26  ;;  %620 = vrot.lane.b32.xlu1 %v589_v56, %s2278_s30 }
 0x285   : > { %686 = vrot.lane.b32.xlu0 %v590_v58, %s2278_s30  ;;  %628 = vrot.lane.b32.xlu1 %v589_v56, %s2281_s29  ;;  %s2665_s30 = sld [smem:[#allocation9 + $0x1f]] }
 0x289   : > { %702 = vrot.lane.b32.xlu0 %v590_v58, %s2280_s15  ;;  %636 = vrot.lane.b32.xlu1 %v589_v56, %s2280_s15  ;;  %s2669_s15 = sld [smem:[#allocation9 + $0x29]] }
 0x28b   : > { %v2770_v10 = vstv %s2665_s30  ;;  %s4220_s30 = sld [smem:[#allocation38_spill]] }
 0x28c   : > { %4215 = vst [vmem:[#allocation55_spill] sm:$0xff] %v2770_v10 }
 0x28d   : > { %718 = vrot.lane.b32.xlu0 %v590_v58, %s2282_s18  ;;  %644 = vrot.lane.b32.xlu1 %v589_v56, %s2283_s20  ;;  %s2673_s18 = sld [smem:[#allocation9 + $0x1b]] }
 0x28f   : > { %v2776_v27 = vstv %s2669_s15  ;;  %s4223_s15 = sld [smem:[#allocation40_spill]] }
 0x291   : > { %734 = vrot.lane.b32.xlu0 %v590_v58, %s2284_s26  ;;  %660 = vrot.lane.b32.xlu1 %v589_v56, %s2285_s13  ;;  %v2859_v56 = vstv %s4233_s2 }
 0x295   : > { %738 = vrot.lane.b32.xlu0 %v608_v50, %s2284_s26  ;;  %677 = vrot.lane.b32.xlu1 %v590_v58, %s2279_s25  ;;  %s2667_s25 = sld [smem:[#allocation9 + $0x24]]  ;;  %v2835_v45 = vstv %s4223_s15 }
 0x296   : > { %s2677_s26 = sld [smem:[#allocation9 + $0x25]] }
 0x299   : > { %694 = vrot.lane.b32.xlu1 %v590_v58, %s2281_s29  ;;  %s2671_s29 = sld [smem:[#allocation9 + $0x2e]] }
 0x29b   : > { %v2773_v11 = vstv %s2667_s25  ;;  %s4222_s25 = sld [smem:[#allocation39_spill]] }
 0x29c   : > { %v2788_v29 = vstv %s2677_s26  ;;  %s2805_s26 = sld [smem:[#allocation9 + $0x13]] }
 0x29d   : > { %710 = vrot.lane.b32.xlu1 %v590_v58, %s2283_s20  ;;  %s2675_s20 = sld [smem:[#allocation9 + $0x20]]  ;;  %4217 = vst [vmem:[#allocation57_spill] sm:$0xff] %v2788_v29 }
 0x29f   : > { %v2779_v1 = vstv %s2671_s29  ;;  %s4225_s29 = sld [smem:[#allocation41_spill]] }
 0x2a1   : > { %726 = vrot.lane.b32.xlu1 %v590_v58, %s2285_s13  ;;  %v2832_v44 = vstv %s4222_s25  ;;  %v2865_v58 = vstv %s4235_s3 }
 0x2a2   : > { %4241 = vst [vmem:[#allocation67_spill] sm:$0xff] %v2865_v58 }
 0x2a3   : > { %v2785_v28 = vstv %s2675_s20  ;;  %s4227_s20 = sld [smem:[#allocation42_spill]] }
 0x2a4   : > { %4216 = vst [vmem:[#allocation56_spill] sm:$0xff] %v2785_v28 }
 0x2a5   : > { %730 = vrot.lane.b32.xlu1 %v608_v50, %s2285_s13  ;;  %s2679_s13 = sld [smem:[#allocation9 + $0x2a]]  ;;  %v2838_v46 = vstv %s4225_s29 }
 0x2a9   : > { %v2841_v47 = vstv %s4227_s20  ;;  %s4490_s20 = sld [smem:[#allocation129_spill]] }
 0x2ab   : > { %v2791_v30 = vstv %s2679_s13  ;;  %s4228_s13 = sld [smem:[#allocation43_spill]] }
 0x2ac   : > { %4218 = vst [vmem:[#allocation58_spill] sm:$0xff] %v2791_v30 }
 0x2d3   : > { %v625_v59 = vpop.permute.xlu0 %624  ;;  %v617_v60 = vpop.permute.xlu1 %616 }
 0x2d4   : > { %627 = vst.msk [vmem:[#allocation3 + $0x3] sm:$0x1] %vm613_vm2, %v625_v59  ;;  %619 = vst.msk [vmem:[#allocation3 + $0x2] sm:$0x1] %vm613_vm2, %v617_v60  ;;  %v2868_v59 = vstv %s2735_s23  ;;  %v2871_v60 = vstv %s4236_s4  ;;  %s2290_s23 = smov 16  }
 0x2d5   : > { %4242 = vst [vmem:[#allocation68_spill] sm:$0xff] %v2868_v59  ;;  %4243 = vst [vmem:[#allocation69_spill] sm:$0xff] %v2871_v60 }
 0x2d7   : > { %v641_v61 = vpop.permute.xlu0 %640  ;;  %v633_v62 = vpop.permute.xlu1 %632 }
 0x2d8   : > { %643 = vst.msk [vmem:[#allocation3 + $0x5] sm:$0x1] %vm613_vm2, %v641_v61  ;;  %635 = vst.msk [vmem:[#allocation3 + $0x4] sm:$0x1] %vm613_vm2, %v633_v62  ;;  %v2875_v62 = vstv %s2743_s6  ;;  %v2916_v61 = vstv %s2819_s1  ;;  %s1953_s6 = sshll.u32 %s4459_s14, 1  ;;  %s2297_s1 = smov [#allocation11]  }
 0x2d9   : > { %4244 = vst [vmem:[#allocation70_spill] sm:$0xff] %v2875_v62  ;;  %4251 = vst [vmem:[#allocation77_spill] sm:$0xff] %v2916_v61  ;;  %s2176_s2 = sshll.u32 %s2297_s1, 4  ;;  %s2177_s2 = int_to_ptr.vmem [resolvable:$false] %s2176_s2 }
 0x2da   : > { %s2178_s12 = scalar_lea.vmem %s2177_s2, 64 }
 0x2db   : > { %v657_v63 = vpop.permute.xlu0 %656  ;;  %v649_v7 = vpop.permute.xlu1 %648 }
 0x2dc   : > { %659 = vst.msk [vmem:[#allocation3 + $0x7] sm:$0x1] %vm613_vm2, %v657_v63  ;;  %651 = vst.msk [vmem:[#allocation3 + $0x6] sm:$0x1] %vm613_vm2, %v649_v7  ;;  %v2882_v7 = vstv %s2745_s11  ;;  %s1532_s11 = sld [smem:[#allocation4]] }
 0x2dd   : > { %4245 = vst [vmem:[#allocation71_spill] sm:$0xff] %v2882_v7 }
 0x2df   : > { %v673_v8 = vpop.permute.xlu0 %672  ;;  %v665_v9 = vpop.permute.xlu1 %664 }
 0x2e0   : > { %675 = vst.msk [vmem:[#allocation3 + $0x9] sm:$0x1] %vm613_vm2, %v673_v8  ;;  %667 = vst.msk [vmem:[#allocation3 + $0x8] sm:$0x1] %vm613_vm2, %v665_v9  ;;  %v2885_v8 = vstv %s2747_s28  ;;  %v2888_v9 = vstv %s2753_s22  ;;  %s3817_s22 = scalar_lea.vmem [#allocation11], %s1953_s6  ;;  %s2291_s28 = smov 32  }
 0x2e1   : > { %4246 = vst [vmem:[#allocation72_spill] sm:$0xff] %v2885_v8  ;;  %4247 = vst [vmem:[#allocation73_spill] sm:$0xff] %v2888_v9  ;;  %s1803_s25 = sshll.u32 %s3817_s22, 4  ;;  %s1804_s25 = int_to_ptr.vmem [resolvable:$true] %s1803_s25 }
 0x2e2   : > { %s2172_s10 = scalar_lea.vmem %s1804_s25, 32  ;;  %p2179_p9 = scmp.lt.s32.totalorder %s1804_s25, %s2177_s2 }
 0x2e3   : > { %v691_v12 = vpop.permute.xlu0 %690  ;;  %v683_v14 = vpop.permute.xlu1 %682  ;;  %v2843_v48 = vld [vmem:[#allocation3] sm:$0xff]  ;;  %p2173_p0 = scmp.ne.s32.totalorder %s1804_s25, %s2172_s10  ;;  %p2180_p10 = scmp.lt.s32.totalorder %s2178_s12, %s2172_s10 }
 0x2e4   : > { %693 = vst.msk [vmem:[#allocation3 + $0xb] sm:$0x1] %vm613_vm2, %v691_v12  ;;  %685 = vst.msk [vmem:[#allocation3 + $0xa] sm:$0x1] %vm613_vm2, %v683_v14  ;;  %v2879_v63 = vmul.f32 %v2751_v16, %v2843_v48  ;;  %v2905_v17 = vmul.f32 %v4083_v15, %v2843_v48  ;;  %v2909_v3 = vmul.f32 %v2758_v18, %v2843_v48 }
 0x2e5   : > { %v2920_v55 = vmul.f32 %v2764_v0, %v2843_v48  ;;  %v2933_v15 = vmul.f32 %v2773_v11, %v2843_v48  ;;  %v2938_v36 = vmul.f32 %v2785_v28, %v2843_v48  ;;  %v2942_v51 = vmul.f32 %v2788_v29, %v2843_v48  ;;  %p2174_p7 = pnand %p2173_p0, %p4491_p2  ;;  %p2181_p1 = por %p2180_p10, %p2179_p9 }
 0x2e6   : > { %v2950_v24 = vmul.f32 %v2796_v32, %v2843_v48  ;;  %v2954_v43 = vmul.f32 %v2800_v34, %v2843_v48  ;;  %v2958_v23 = vmul.f32 %v2803_v35, %v2843_v48  ;;  %v2962_v26 = vmul.f32 %v2814_v38, %v2843_v48 }
 0x2e7   : > { %v707_v4 = vpop.permute.xlu0 %706  ;;  %v699_v31 = vpop.permute.xlu1 %698  ;;  %v2968_v19 = vmul.f32 %v2817_v39, %v2843_v48  ;;  %v2972_v25 = vmul.f32 %v2847_v52, %v2843_v48  ;;  %v2976_v21 = vmul.f32 %v2850_v53, %v2843_v48  ;;  %v2980_v2 = vmul.f32 %v2853_v54, %v2843_v48  ;;  %p2175_p8 = pneg %p2174_p7 }
 0x2e8   : > { %709 = vst.msk [vmem:[#allocation3 + $0xd] sm:$0x1] %vm613_vm2, %v707_v4  ;;  %701 = vst.msk [vmem:[#allocation3 + $0xc] sm:$0x1] %vm613_vm2, %v699_v31  ;;  %v2892_v31 = vstv %s2781_s17  ;;  %v2913_v4 = vmul.f32 %v2761_v20, %v2843_v48  ;;  %v2986_v22 = vmul.f32 %v2776_v27, %v2843_v48  ;;  %v2990_v13 = vmul.f32 %v2865_v58, %v2843_v48  ;;  %s2296_s17 = smov 112  }
 0x2e9   : > { %4248 = vst [vmem:[#allocation74_spill] sm:$0xff] %v2892_v31  ;;  %v1187_v8 = vrot.slane %v2950_v24, 4  ;;  %v786_v7 = vrot.slane %v2954_v43, 1  ;;  %v821_v62 = vrot.slane %v2958_v23, 2  ;;  %v856_v60 = vrot.slane %v2962_v26, 3  ;;  %p2182_p4 = pnand %p2181_p1, %p2175_p8 }
 0x2eb   : > { %v723_v49 = vpop.permute.xlu0 %722  ;;  %v715_v50 = vpop.permute.xlu1 %714 }
 0x2ec   : > { %725 = vst.msk [vmem:[#allocation3 + $0xf] sm:$0x1] %vm613_vm2, %v723_v49  ;;  %717 = vst.msk [vmem:[#allocation3 + $0xe] sm:$0x1] %vm613_vm2, %v715_v50  ;;  %v2895_v49 = vstv %s2793_s19  ;;  %v2898_v50 = vstv %s2805_s26  ;;  %s4484_s19 = sld [smem:[#allocation21_spill]] }
 0x2ed   : > { %4249 = vst [vmem:[#allocation75_spill] sm:$0xff] %v2895_v49  ;;  %4250 = vst [vmem:[#allocation76_spill] sm:$0xff] %v2898_v50  ;;  %v2996_v50 = vmul.f32 %v2779_v1, %v2843_v48  ;;  %v1085_v49 = vrot.slane %v2938_v36, 1  ;;  %v891_v36 = vrot.slane %v2968_v19, 4  ;;  %v1483_v19 = vrot.slane %v2990_v13, 4 }
 0x2ef   : > { %v653_v12 = vpop.permute.xlu0 %652  ;;  %v611_v14 = vpop.permute.xlu1 %610 }
 0x2f0   : > { %655 = vst.msk [vmem:[#allocation2 + $0x7] sm:$0x1] %vm613_vm2, %v653_v12  ;;  %614 = vst.msk [vmem:[#allocation2 + $0x2] sm:$0x1] %vm613_vm2, %v611_v14  ;;  %v2925_v12 = vmul.f32 %v4084_v5, %v2843_v48  ;;  %v2929_v14 = vmul.f32 %v2770_v10, %v2843_v48  ;;  %v2946_v5 = vmul.f32 %v2791_v30, %v2843_v48 }
 0x2f3   : > { %v669_v33 = vpop.permute.xlu0 %668  ;;  %v621_v6 = vpop.permute.xlu1 %620  ;;  %v2992_v61 = vld [vmem:[#allocation3 + $0x8] sm:$0xff] }
 0x2f4   : > { %671 = vst.msk [vmem:[#allocation2 + $0x9] sm:$0x1] %vm613_vm2, %v669_v33  ;;  %623 = vst.msk [vmem:[#allocation2 + $0x3] sm:$0x1] %vm613_vm2, %v621_v6  ;;  %v1119_v6 = vrot.slane %v2942_v51, 2  ;;  %v1153_v33 = vrot.slane %v2946_v5, 3  ;;  %v3013_v24 = vmul.f32 %v2751_v16, %v2992_v61  ;;  %v3017_v23 = vmul.f32 %v2758_v18, %v2992_v61 }
 0x2f5   : > { %v3021_v26 = vmul.f32 %v2761_v20, %v2992_v61  ;;  %v3026_v43 = vmul.f32 %v2764_v0, %v2992_v61  ;;  %v3038_v59 = vmul.f32 %v2788_v29, %v2992_v61  ;;  %v3042_v13 = vmul.f32 %v2791_v30, %v2992_v61 }
 0x2f6   : > { %v3046_v0 = vmul.f32 %v2796_v32, %v2992_v61  ;;  %v3062_v32 = vmul.f32 %v2814_v38, %v2992_v61 }
 0x2f7   : > { %v687_v31 = vpop.permute.xlu0 %686  ;;  %v629_v9 = vpop.permute.xlu1 %628  ;;  %4253 = vst [vmem:[#allocation79_spill] sm:$0xff] %v3038_v59  ;;  %4254 = vst [vmem:[#allocation80_spill] sm:$0xff] %v3042_v13  ;;  %v4261_v38 = vrot.slane %v3038_v59, 2 }
 0x2f8   : > { %689 = vst.msk [vmem:[#allocation2 + $0xb] sm:$0x1] %vm613_vm2, %v687_v31  ;;  %631 = vst.msk [vmem:[#allocation2 + $0x4] sm:$0x1] %vm613_vm2, %v629_v9  ;;  %v3030_v9 = vmul.f32 %v2770_v10, %v2992_v61  ;;  %v3034_v31 = vmul.f32 %v2785_v28, %v2992_v61  ;;  %v3050_v10 = vmul.f32 %v2800_v34, %v2992_v61 }
 0x2f9   : > { %4255 = vst [vmem:[#allocation81_spill] sm:$0xff] %v3046_v0  ;;  %v3054_v28 = vmul.f32 %v2803_v35, %v2992_v61  ;;  %4258 = vst [vmem:[#allocation84_spill] sm:$0xff] %v3062_v32  ;;  %v3066_v34 = vmul.f32 %v2817_v39, %v2992_v61  ;;  %v3080_v18 = vsel %vm803_vm4, %v1119_v6, %v4261_v38  ;;  %v4120_v39 = vrot.slane %v3062_v32, 3 }
 0x2fa   : > { %4252 = vst [vmem:[#allocation78_spill] sm:$0xff] %v3034_v31  ;;  %4256 = vst [vmem:[#allocation82_spill] sm:$0xff] %v3050_v10  ;;  %v4119_v29 = vrot.slane %v3034_v31, 1  ;;  %v4265_v31 = vrot.slane %v3046_v0, 4 }
 0x2fb   : > { %v703_v5 = vpop.permute.xlu0 %702  ;;  %v637_v51 = vpop.permute.xlu1 %636  ;;  %4257 = vst [vmem:[#allocation83_spill] sm:$0xff] %v3054_v28  ;;  %4259 = vst [vmem:[#allocation85_spill] sm:$0xff] %v3066_v34  ;;  %v4269_v6 = vrot.slane %v3054_v28, 2 }
 0x2fc   : > { %705 = vst.msk [vmem:[#allocation2 + $0xd] sm:$0x1] %vm613_vm2, %v703_v5  ;;  %639 = vst.msk [vmem:[#allocation2 + $0x5] sm:$0x1] %vm613_vm2, %v637_v51  ;;  %v3075_v30 = vsel %vm768_vm3, %v1085_v49, %v4119_v29  ;;  %v4263_v5 = vrot.slane %v3042_v13, 3  ;;  %v3092_v49 = vsel %vm873_vm6, %v1187_v8, %v4265_v31  ;;  %v4267_v29 = vrot.slane %v3050_v10, 1 }
 0x2fd   : > { %4260 = vst [vmem:[#allocation86_spill] sm:$0xff] %v3075_v30  ;;  %4262 = vst [vmem:[#allocation87_spill] sm:$0xff] %v3080_v18  ;;  %v3102_v20 = vsel %vm803_vm4, %v821_v62, %v4269_v6  ;;  %v3113_v8 = vsel %vm838_vm5, %v856_v60, %v4120_v39  ;;  %v3122_v62 = vmul.f32 %v2847_v52, %v2992_v61  ;;  %v4280_v52 = vrot.slane %v2972_v25, 1  ;;  %v4336_v30 = vld [vmem:[#allocation75_spill] sm:$0xff] }
 0x2fe   : > { %v3087_v51 = vsel %vm838_vm5, %v1153_v33, %v4263_v5  ;;  %4266 = vst [vmem:[#allocation89_spill] sm:$0xff] %v3092_v49  ;;  %v3097_v38 = vsel %vm768_vm3, %v786_v7, %v4267_v29  ;;  %4270 = vst [vmem:[#allocation91_spill] sm:$0xff] %v3102_v20  ;;  %v3108_v33 = vmul.f32 %v2773_v11, %v2992_v61  ;;  %v4272_v29 = vrot.slane %v3066_v34, 4  ;;  %v4327_v49 = vld [vmem:[#allocation71_spill] sm:$0xff]  ;;  %v4331_v20 = vld [vmem:[#allocation73_spill] sm:$0xff] }
 0x2ff   : > { %v719_v16 = vpop.permute.xlu0 %718  ;;  %v645_v35 = vpop.permute.xlu1 %644  ;;  %4264 = vst [vmem:[#allocation88_spill] sm:$0xff] %v3087_v51  ;;  %4268 = vst [vmem:[#allocation90_spill] sm:$0xff] %v3097_v38  ;;  %v3134_v60 = vmul.f32 %v2853_v54, %v2992_v61  ;;  %v3144_v6 = vmul.f32 %v2779_v1, %v2992_v61  ;;  %v4279_v32 = vrot.slane %v3122_v62, 1  ;;  %v4309_v10 = vstv %s2673_s18 }
 0x300   : > { %721 = vst.msk [vmem:[#allocation2 + $0xf] sm:$0x1] %vm613_vm2, %v719_v16  ;;  %647 = vst.msk [vmem:[#allocation2 + $0x6] sm:$0x1] %vm613_vm2, %v645_v35  ;;  %v3118_v7 = vsel %vm873_vm6, %v891_v36, %v4272_v29  ;;  %v3126_v16 = vmul.f32 %v2776_v27, %v2992_v61  ;;  %v3130_v35 = vmul.f32 %v2850_v53, %v2992_v61  ;;  %v4286_v29 = vrot.slane %v2980_v2, 3 }
 0x301   : > { %4271 = vst [vmem:[#allocation92_spill] sm:$0xff] %v3113_v8  ;;  %4273 = vst [vmem:[#allocation93_spill] sm:$0xff] %v3118_v7  ;;  %v3138_v36 = vmul.f32 %v2865_v58, %v2992_v61  ;;  %v3161_v34 = vsel %vm768_vm3, %v4280_v52, %v4279_v32  ;;  %v4285_v31 = vrot.slane %v3134_v60, 3  ;;  %v1335_v52 = vrot.slane %v2920_v55, 4 }
 0x302   : > { %4274 = vst [vmem:[#allocation94_spill] sm:$0xff] %v3122_v62  ;;  %4275 = vst [vmem:[#allocation95_spill] sm:$0xff] %v3130_v35  ;;  %v4127_v54 = vrot.slane %v3130_v35, 2  ;;  %v4291_v55 = vstv %s4281_s0  ;;  %v4312_v7 = vstv %s4281_s0 }
 0x303   : > { %4276 = vst [vmem:[#allocation96_spill] sm:$0xff] %v3134_v60  ;;  %4277 = vst [vmem:[#allocation97_spill] sm:$0xff] %v3138_v36  ;;  %v735_v39 = vpop.permute.xlu0 %734  ;;  %v661_v53 = vpop.permute.xlu1 %660  ;;  %v3176_v5 = vsel %vm838_vm5, %v4286_v29, %v4285_v31  ;;  %v4288_v25 = vrot.slane %v3138_v36, 4  ;;  %v1005_v29 = vrot.slane %v2986_v22, 3  ;;  %v1039_v36 = vrot.slane %v2996_v50, 4 }
 0x304   : > { %4278 = vst [vmem:[#allocation98_spill] sm:$0xff] %v3144_v6  ;;  %737 = vst.msk [vmem:[#allocation2 + $0x11] sm:$0x1] %vm613_vm2, %v735_v39  ;;  %v4283_v39 = vrot.slane %v2976_v21, 2  ;;  %v937_v21 = vrot.slane %v2929_v14, 1  ;;  %v756_v60 = vmul.f32 %v4291_v55, %v2843_v48  ;;  %v4293_v14 = vrot.slane %v2879_v63, 1 }
 0x305   : > { %663 = vst.msk [vmem:[#allocation2 + $0x8] sm:$0x1] %vm613_vm2, %v661_v53  ;;  %4282 = vst [vmem:[#allocation99_spill] sm:$0xff] %v3161_v34  ;;  %v3181_v32 = vsel %vm873_vm6, %v1483_v19, %v4288_v25  ;;  %v4290_v19 = vstv %s2673_s18  ;;  %v4294_v22 = vrot.slane %v3017_v23, 2  ;;  %v4295_v50 = vrot.slane %v2909_v3, 2  ;;  %s2294_s18 = smov 80  }
 0x306   : > { %v3169_v53 = vsel %vm803_vm4, %v4283_v39, %v4127_v54  ;;  %4287 = vst [vmem:[#allocation101_spill] sm:$0xff] %v3176_v5  ;;  %4289 = vst [vmem:[#allocation102_spill] sm:$0xff] %v3181_v32  ;;  %v971_v39 = vrot.slane %v2933_v15, 2  ;;  %v1056_v25 = vmul.f32 %v4290_v19, %v2843_v48  ;;  %v4292_v15 = vrot.slane %v3013_v24, 1 }
 0x307   : > { %4284 = vst [vmem:[#allocation100_spill] sm:$0xff] %v3169_v53  ;;  %v3187_v58 = vld [vmem:[#allocation2] sm:$0xff]  ;;  %v739_v2 = vpop.permute.xlu0 %738  ;;  %v678_v31 = vpop.permute.xlu1 %677  ;;  %v3211_v19 = vsel %vm803_vm4, %v4295_v50, %v4294_v22  ;;  %v4298_v63 = vstv %s4228_s13  ;;  %v4300_v3 = vrot.slane %v3030_v9, 1  ;;  %v4306_v32 = vstv %s2653_s27  ;;  %s2292_s27 = smov 64  }
 0x308   : > { %741 = vst.msk [vmem:[#allocation3 + $0x11] sm:$0x1] %vm613_vm2, %v739_v2  ;;  %680 = vst.msk [vmem:[#allocation2 + $0xa] sm:$0x1] %vm613_vm2, %v678_v31  ;;  %v3204_v54 = vsel %vm768_vm3, %v4293_v14, %v4292_v15  ;;  %v4296_v2 = vrot.slane %v3021_v26, 3  ;;  %v4297_v31 = vrot.slane %v2913_v4, 3  ;;  %v1352_v35 = vmul.f32 %v4298_v63, %v2843_v48 }
 0x309   : > { %v4299_v15 = vrot.slane %v3026_v43, 4  ;;  %v3231_v22 = vsel %vm768_vm3, %v937_v21, %v4300_v3  ;;  %v4301_v4 = vrot.slane %v3108_v33, 2  ;;  %v4302_v48 = vrot.slane %v3126_v16, 3 }
 0x30a   : > { %v3218_v55 = vsel %vm838_vm5, %v4297_v31, %v4296_v2  ;;  %v3248_v21 = vmul.f32 %v2811_v37, %v3187_v58  ;;  %v3252_v63 = vmul.f32 %v2822_v40, %v3187_v58  ;;  %v3261_v3 = vmul.f32 %v2825_v41, %v3187_v58 }
 0x30b   : > { %v3226_v14 = vsel %vm873_vm6, %v1335_v52, %v4299_v15  ;;  %v3236_v50 = vsel %vm803_vm4, %v971_v39, %v4301_v4  ;;  %v3241_v2 = vsel %vm838_vm5, %v1005_v29, %v4302_v48  ;;  %v4303_v52 = vstv %s2693_s8  ;;  %v695_v29 = vpop.permute.xlu1 %694 }
 0x30c   : > { %v1198_v31 = vmul.f32 %v4303_v52, %v3187_v58  ;;  %v4304_v39 = vrot.slane %v3144_v6, 4  ;;  %v3265_v4 = vmul.f32 %v2828_v42, %v3187_v58  ;;  %v4305_v48 = vstv %s4220_s30  ;;  %697 = vst.msk [vmem:[#allocation2 + $0xc] sm:$0x1] %vm613_vm2, %v695_v29 }
 0x30d   : > { %v902_v52 = vmul.f32 %v4305_v48, %v3187_v58  ;;  %v3273_v62 = vmul.f32 %v4306_v32, %v2992_v61  ;;  %v4308_v53 = vstv %s2727_s7  ;;  %v3291_v48 = vmul.f32 %v4309_v10, %v2992_v61 }
 0x30e   : > { %v3257_v15 = vsel %vm873_vm6, %v1039_v36, %v4304_v39  ;;  %v3278_v36 = vmul.f32 %v2832_v44, %v3187_v58  ;;  %v4307_v39 = vstv %s2663_s24  ;;  %v1050_v28 = vmul.f32 %v4308_v53, %v3187_v58  ;;  %s2293_s24 = smov 48  }
 0x30f   : > { %v3283_v5 = vmul.f32 %v4307_v39, %v2992_v61  ;;  %4310 = vst [vmem:[#allocation103_spill] sm:$0xff] %v3291_v48  ;;  %v3295_v32 = vmul.f32 %v2835_v45, %v3187_v58  ;;  %v4311_v29 = vstv %s4237_s16  ;;  %v3303_v0 = vmul.f32 %v4312_v7, %v2992_v61  ;;  %v711_v13 = vpop.permute.xlu1 %710 }
 0x310   : > { %v750_v34 = vmul.f32 %v4311_v29, %v3187_v58  ;;  %v4314_v39 = vstv %s4228_s13  ;;  %v3311_v53 = vadd.f32 %v2905_v17, %v1198_v31  ;;  %v3315_v48 = vadd.f32 %v1056_v25, %v1050_v28  ;;  %713 = vst.msk [vmem:[#allocation2 + $0xe] sm:$0x1] %vm613_vm2, %v711_v13  ;;  %s1770_s13 = scalar_lea.sflag [#allocation12], %s4459_s14 }
 0x311   : > { %4313 = vst [vmem:[#allocation104_spill] sm:$0xff] %v3303_v0  ;;  %v3308_v8 = vmul.f32 %v4314_v39, %v2992_v61  ;;  %v1284_v29 = vrot.slane %v3261_v3, 3  ;;  %v1318_v7 = vrot.slane %v3265_v4, 4  ;;  %v3320_v0 = vadd.f32 %v2925_v12, %v902_v52 }
 0x312   : > { %4316 = vst [vmem:[#allocation106_spill] sm:$0xff] %v3315_v48  ;;  %v3322_v61 = vadd.f32 %v756_v60, %v750_v34  ;;  %v920_v17 = vrot.slane %v3278_v36, 1  ;;  %v982_v31 = vmul.f32 %v2838_v46, %v3187_v58  ;;  %v3330_v28 = vmul.f32 %v2841_v47, %v3187_v58  ;;  %v4320_v34 = vld [vmem:[#allocation68_spill] sm:$0xff]  ;;  %v4322_v60 = vld [vmem:[#allocation69_spill] sm:$0xff]  ;;  %v4325_v36 = vld [vmem:[#allocation70_spill] sm:$0xff] }
 0x313   : > { %4315 = vst [vmem:[#allocation105_spill] sm:$0xff] %v3308_v8  ;;  %v3334_v25 = vmul.f32 %v2859_v56, %v3187_v58  ;;  %v3338_v12 = vmul.f32 %v2862_v57, %v3187_v58  ;;  %v3342_v13 = vmul.f32 %v4320_v34, %v3187_v58  ;;  %v3346_v3 = vmul.f32 %v4322_v60, %v3187_v58  ;;  %v4329_v8 = vld [vmem:[#allocation72_spill] sm:$0xff]  ;;  %v727_v38 = vpop.permute.xlu1 %726 }
 0x314   : > { %4317 = vst [vmem:[#allocation107_spill] sm:$0xff] %v3322_v61  ;;  %v4324_v4 = vstv %s2767_s5  ;;  %v3353_v39 = vmul.f32 %v4325_v36, %v3187_v58  ;;  %v3357_v10 = vmul.f32 %v4327_v49, %v3187_v58  ;;  %v3361_v59 = vmul.f32 %v4329_v8, %v3187_v58  ;;  %v4338_v49 = vld [vmem:[#allocation76_spill] sm:$0xff]  ;;  %729 = vst.msk [vmem:[#allocation2 + $0x10] sm:$0x1] %vm613_vm2, %v727_v38 }
 0x315   : > { %4318 = vst [vmem:[#allocation108_spill] sm:$0xff] %v3334_v25  ;;  %4319 = vst [vmem:[#allocation109_spill] sm:$0xff] %v3338_v12  ;;  %v1346_v52 = vmul.f32 %v4324_v4, %v3187_v58  ;;  %v3365_v51 = vmul.f32 %v4331_v20, %v3187_v58  ;;  %v4334_v4 = vld [vmem:[#allocation74_spill] sm:$0xff]  ;;  %v3375_v48 = vmul.f32 %v4336_v30, %v3187_v58  ;;  %v954_v20 = vrot.slane %v3295_v32, 2 }
 0x316   : > { %4321 = vst [vmem:[#allocation110_spill] sm:$0xff] %v3342_v13  ;;  %4323 = vst [vmem:[#allocation111_spill] sm:$0xff] %v3346_v3  ;;  %v3371_v61 = vmul.f32 %v4334_v4, %v3187_v58  ;;  %v3379_v36 = vmul.f32 %v4338_v49, %v3187_v58  ;;  %v988_v8 = vrot.slane %v982_v31, 3 }
 0x317   : > { %4326 = vst [vmem:[#allocation112_spill] sm:$0xff] %v3353_v39  ;;  %4328 = vst [vmem:[#allocation113_spill] sm:$0xff] %v3357_v10  ;;  %v3367_v18 = vadd.f32 %v1352_v35, %v1346_v52  ;;  %v1022_v35 = vrot.slane %v3330_v28, 4  ;;  %v4340_v52 = vld [vmem:[#allocation77_spill] sm:$0xff]  ;;  %v4342_v39 = vrot.slane %v3248_v21, 1 }
 0x318   : > { %4330 = vst [vmem:[#allocation114_spill] sm:$0xff] %v3361_v59  ;;  %4332 = vst [vmem:[#allocation115_spill] sm:$0xff] %v3365_v51  ;;  %v3396_v28 = vld [vmem:[#allocation2 + $0x8] sm:$0xff] }
 0x319   : > { %4333 = vst [vmem:[#allocation116_spill] sm:$0xff] %v3367_v18  ;;  %4335 = vst [vmem:[#allocation117_spill] sm:$0xff] %v3371_v61  ;;  %v3386_v18 = vmul.f32 %v4340_v52, %v3187_v58  ;;  %v731_v58 = vpop.permute.xlu1 %730  ;;  %v1211_v38 = vmul.f32 %v2811_v37, %v3396_v28  ;;  %v1245_v32 = vmul.f32 %v2822_v40, %v3396_v28 }
 0x31a   : > { %4337 = vst [vmem:[#allocation118_spill] sm:$0xff] %v3375_v48  ;;  %4339 = vst [vmem:[#allocation119_spill] sm:$0xff] %v3379_v36  ;;  %v1279_v31 = vmul.f32 %v2825_v41, %v3396_v28  ;;  %v3411_v52 = vmul.f32 %v2828_v42, %v3396_v28  ;;  %v3415_v30 = vmul.f32 %v2832_v44, %v3396_v28 }
 0x31b   : > { %4341 = vst [vmem:[#allocation120_spill] sm:$0xff] %v3386_v18  ;;  %733 = vst.msk [vmem:[#allocation3 + $0x10] sm:$0x1] %vm613_vm2, %v731_v58  ;;  %v3419_v58 = vmul.f32 %v2835_v45, %v3396_v28  ;;  %v3423_v60 = vmul.f32 %v2838_v46, %v3396_v28  ;;  %v3427_v4 = vmul.f32 %v2841_v47, %v3396_v28  ;;  %v1217_v34 = vrot.slane %v1211_v38, 1  ;;  %v3430_v48 = vld [vmem:[#allocation2 + $0x10] sm:$0xf] }
 0x31c   : > { %v1251_v49 = vrot.slane %v1245_v32, 2  ;;  %v1285_v18 = vrot.slane %v1279_v31, 3  ;;  %v1319_v36 = vrot.slane %v3411_v52, 4  ;;  %v4343_v38 = vrot.slane %v3252_v63, 2 }
 0x31d   : > { %v1218_v3 = vsel %vm768_vm3, %v4342_v39, %v1217_v34  ;;  %v4344_v51 = vrot.slane %v3415_v30, 1  ;;  %v4345_v10 = vrot.slane %v3419_v58, 2  ;;  %v4346_v39 = vrot.slane %v3423_v60, 3 }
 0x31e   : > { %v1252_v32 = vsel %vm803_vm4, %v4343_v38, %v1251_v49  ;;  %v1286_v52 = vsel %vm838_vm5, %v1284_v29, %v1285_v18  ;;  %v1320_v31 = vsel %vm873_vm6, %v1318_v7, %v1319_v36  ;;  %v1223_v61 = vadd.f32 %v1218_v3, %v3311_v53 }
 0x31f   : > { %v922_v59 = vsel %vm768_vm3, %v920_v17, %v4344_v51  ;;  %v956_v21 = vsel %vm803_vm4, %v954_v20, %v4345_v10  ;;  %v990_v63 = vsel %vm838_vm5, %v988_v8, %v4346_v39  ;;  %v4347_v29 = vrot.slane %v3427_v4, 4 }
 0x320   : > { %v927_v38 = vadd.f32 %v922_v59, %v3320_v0  ;;  %v4348_v53 = vstv %s2693_s8  ;;  %v1212_v51 = vmul.f32 %v2811_v37, %v3430_v48  ;;  %v1240_v20 = vadd.f32 %v3204_v54, %v1223_v61  ;;  %v4349_v37 = vld [vmem:[#allocation51_spill] sm:$0xff]  ;;  %v4350_v54 = vld [vmem:[#allocation52_spill] sm:$0xff]  ;;  %s2286_s8 = smov 127  }
 0x321   : > { %v1024_v7 = vsel %vm873_vm6, %v1022_v35, %v4347_v29  ;;  %v1199_v3 = vmul.f32 %v4348_v53, %v3396_v28  ;;  %v1246_v10 = vmul.f32 %v2822_v40, %v3430_v48  ;;  %v1280_v0 = vmul.f32 %v2825_v41, %v3430_v48 }
 0x322   : > { %v3463_v17 = vld [vmem:[#allocation3 + $0x10] sm:$0xf]  ;;  %v1314_v59 = vmul.f32 %v2828_v42, %v3430_v48  ;;  %v944_v8 = vadd.f32 %v3231_v22, %v927_v38  ;;  %v1219_v39 = vrot.slane %v1212_v51, 1  ;;  %v1257_v53 = vadd.f32 %v1252_v32, %v1240_v20  ;;  %v4351_v42 = vld [vmem:[#allocation53_spill] sm:$0xff] }
 0x323   : > { %v1207_v35 = vadd.f32 %v3273_v62, %v1199_v3  ;;  %v1229_v29 = vmul.f32 %v4349_v37, %v3463_v17  ;;  %v1253_v13 = vrot.slane %v1246_v10, 2  ;;  %v1263_v61 = vmul.f32 %v4350_v54, %v3463_v17  ;;  %v4357_v37 = vld [vmem:[#allocation55_spill] sm:$0xff] }
 0x324   : > { %v1287_v40 = vrot.slane %v1280_v0, 3  ;;  %v961_v12 = vadd.f32 %v956_v21, %v944_v8  ;;  %v1220_v41 = vsel %vm768_vm3, %v1217_v34, %v1219_v39  ;;  %v1297_v6 = vmul.f32 %v4351_v42, %v3463_v17 }
 0x325   : > { %v1236_v25 = vrot.slane %v1229_v29, 1  ;;  %v1274_v62 = vadd.f32 %v3211_v19, %v1257_v53  ;;  %v1224_v22 = vadd.f32 %v1220_v41, %v1207_v35  ;;  %v1254_v38 = vsel %vm803_vm4, %v1251_v49, %v1253_v13 }
 0x326   : > { %v1270_v3 = vrot.slane %v1263_v61, 2  ;;  %v978_v32 = vadd.f32 %v3236_v50, %v961_v12  ;;  %v4352_v51 = vrot.slane %v3013_v24, 1  ;;  %v1288_v21 = vsel %vm838_vm5, %v1285_v18, %v1287_v40  ;;  %v4355_v50 = vld [vmem:[#allocation54_spill] sm:$0xff] }
 0x327   : > { %v1304_v34 = vrot.slane %v1297_v6, 3  ;;  %v1291_v10 = vadd.f32 %v1286_v52, %v1274_v62  ;;  %v4353_v8 = vrot.slane %v3017_v23, 2  ;;  %v1321_v19 = vrot.slane %v1314_v59, 4 }
 0x328   : > { %v1237_v20 = vsel %vm768_vm3, %v4352_v51, %v1236_v25  ;;  %v995_v35 = vadd.f32 %v990_v63, %v978_v32  ;;  %v4354_v49 = vrot.slane %v3021_v26, 3  ;;  %v1331_v24 = vmul.f32 %v4355_v50, %v3463_v17 }
 0x329   : > { %v1241_v0 = vadd.f32 %v1237_v20, %v1224_v22  ;;  %v1271_v39 = vsel %vm803_vm4, %v4353_v8, %v1270_v3  ;;  %v4356_v25 = vstv %s4220_s30  ;;  %v1308_v18 = vadd.f32 %v3218_v55, %v1291_v10  ;;  %s2016_s30 = sshll.u32 %s4484_s19, 5 }
 0x32a   : > { %v1305_v13 = vsel %vm838_vm5, %v4354_v49, %v1304_v34  ;;  %v903_v12 = vmul.f32 %v4356_v25, %v3396_v28  ;;  %v1322_v52 = vsel %vm873_vm6, %v1319_v36, %v1321_v19  ;;  %v916_v23 = vmul.f32 %v2832_v44, %v3430_v48  ;;  %s3961_s26 = scalar_lea.hbm %s4490_s20, %s2016_s30 }
 0x32b   : > { %v1258_v6 = vadd.f32 %v1254_v38, %v1241_v0  ;;  %v1012_v63 = vadd.f32 %v3241_v2, %v995_v35  ;;  %v1338_v59 = vrot.slane %v1331_v24, 4  ;;  %v933_v29 = vmul.f32 %v4357_v37, %v3463_v17  ;;  %v4372_v37 = vld [vmem:[#allocation70_spill] sm:$0xff] }
 0x32c   : > { %v911_v26 = vadd.f32 %v3283_v5, %v903_v12  ;;  %v1325_v53 = vadd.f32 %v1320_v31, %v1308_v18  ;;  %v923_v61 = vrot.slane %v916_v23, 1  ;;  %v950_v55 = vmul.f32 %v2835_v45, %v3430_v48  ;;  %v4366_v12 = vld [vmem:[#allocation98_spill] sm:$0xff]  ;;  %v4369_v23 = vld [vmem:[#allocation69_spill] sm:$0xff] }
 0x32d   : > { %v1275_v54 = vadd.f32 %v1271_v39, %v1258_v6  ;;  %v1029_v40 = vadd.f32 %v1024_v7, %v1012_v63  ;;  %v4358_v36 = vrot.slane %v3026_v43, 4  ;;  %v940_v44 = vrot.slane %v933_v29, 1 }
 0x32e   : > { %v967_v2 = vmul.f32 %v2773_v11, %v3463_v17  ;;  %v1342_v5 = vadd.f32 %v3226_v14, %v1325_v53  ;;  %v4359_v62 = vrot.slane %v3415_v30, 1  ;;  %v957_v22 = vrot.slane %v950_v55, 2  ;;  %v4374_v55 = vld [vmem:[#allocation109_spill] sm:$0xff] }
 0x32f   : > { %v1339_v41 = vsel %vm873_vm6, %v4358_v36, %v1338_v59  ;;  %v1292_v42 = vadd.f32 %v1288_v21, %v1275_v54  ;;  %v1046_v38 = vadd.f32 %v3257_v15, %v1029_v40  ;;  %v4360_v7 = vrot.slane %v3030_v9, 1  ;;  %v4373_v54 = vld [vmem:[#allocation106_spill] sm:$0xff] }
 0x330   : > { %v924_v31 = vsel %vm768_vm3, %v4359_v62, %v923_v61  ;;  %v974_v3 = vrot.slane %v967_v2, 2  ;;  %1504 = vrot.lane.b32.xlu1 %v1342_v5, %s2286_s8  ;;  %v4361_v14 = vrot.slane %v3419_v58, 2  ;;  %v984_v30 = vmul.f32 %v2838_v46, %v3430_v48  ;;  %v4377_v62 = vld [vmem:[#allocation72_spill] sm:$0xff] }
 0x331   : > { %v928_v45 = vadd.f32 %v924_v31, %v911_v26  ;;  %v941_v43 = vsel %vm768_vm3, %v4360_v7, %v940_v44  ;;  %v1309_v11 = vadd.f32 %v1305_v13, %v1292_v42  ;;  %v1001_v15 = vmul.f32 %v2776_v27, %v3463_v17 }
 0x332   : > { %v958_v32 = vsel %vm803_vm4, %v4361_v14, %v957_v22  ;;  %v4362_v9 = vrot.slane %v3108_v33, 2  ;;  %v1018_v21 = vmul.f32 %v2841_v47, %v3430_v48  ;;  %v1035_v34 = vmul.f32 %v2779_v1, %v3463_v17 }
 0x333   : > { %v945_v51 = vadd.f32 %v941_v43, %v928_v45  ;;  %v1326_v58 = vadd.f32 %v1322_v52, %v1309_v11  ;;  %v991_v10 = vrot.slane %v984_v30, 3  ;;  %v1008_v0 = vrot.slane %v1001_v15, 3  ;;  %v4379_v43 = vld [vmem:[#allocation73_spill] sm:$0xff]  ;;  %v4380_v11 = vld [vmem:[#allocation110_spill] sm:$0xff]  ;;  %v4382_v30 = vld [vmem:[#allocation111_spill] sm:$0xff] }
 0x334   : > { %v975_v20 = vsel %vm803_vm4, %v4362_v9, %v974_v3  ;;  %v3539_v46 = vmul.f32 %v2859_v56, %v3396_v28  ;;  %v1025_v27 = vrot.slane %v1018_v21, 4  ;;  %v1042_v39 = vrot.slane %v1035_v34, 4  ;;  %1494 = vrot.lane.b32.xlu1 %v1046_v38, %s2286_s8  ;;  %v4378_v38 = vld [vmem:[#allocation86_spill] sm:$0xff] }
 0x335   : > { %v962_v8 = vadd.f32 %v958_v32, %v945_v51  ;;  %v3543_v33 = vmul.f32 %v2862_v57, %v3396_v28  ;;  %v1343_v47 = vadd.f32 %v1339_v41, %v1326_v58  ;;  %v4363_v19 = vrot.slane %v3423_v60, 3  ;;  %v4368_v60 = vld [vmem:[#allocation68_spill] sm:$0xff]  ;;  %v4376_v41 = vld [vmem:[#allocation71_spill] sm:$0xff] }
 0x336   : > { %v4364_v35 = vrot.slane %v3126_v16, 3  ;;  %v1069_v13 = vrot.slane %v3539_v46, 1  ;;  %v4365_v24 = vrot.slane %v3427_v4, 4  ;;  %v4367_v18 = vrot.slane %v4366_v12, 4  ;;  %v4370_v4 = vld [vmem:[#allocation108_spill] sm:$0xff]  ;;  %v4392_v12 = vld [vmem:[#allocation87_spill] sm:$0xff] }
 0x337   : > { %v992_v1 = vsel %vm838_vm5, %v4363_v19, %v991_v10  ;;  %v979_v50 = vadd.f32 %v975_v20, %v962_v8  ;;  %v1103_v52 = vrot.slane %v3543_v33, 2  ;;  %1506 = vrot.lane.b32.xlu0 %v1343_v47, %s2286_s8  ;;  %v1131_v16 = vmul.f32 %v4368_v60, %v3396_v28  ;;  %v4384_v20 = vld [vmem:[#allocation112_spill] sm:$0xff]  ;;  %v4386_v8 = vld [vmem:[#allocation107_spill] sm:$0xff]  ;;  %v4389_v19 = vld [vmem:[#allocation114_spill] sm:$0xff] }
 0x338   : > { %v1009_v49 = vsel %vm838_vm5, %v4364_v35, %v1008_v0  ;;  %v1026_v25 = vsel %vm873_vm6, %v4365_v24, %v1025_v27  ;;  %v1043_v6 = vsel %vm873_vm6, %v4367_v18, %v1042_v39  ;;  %v3565_v63 = vmul.f32 %v4369_v23, %v3396_v28  ;;  %v4387_v39 = vld [vmem:[#allocation113_spill] sm:$0xff] }
 0x339   : > { %v4371_v59 = vrot.slane %v4370_v4, 1  ;;  %v3574_v29 = vmul.f32 %v4372_v37, %v3396_v28  ;;  %v996_v53 = vadd.f32 %v992_v1, %v979_v50  ;;  %v4375_v40 = vrot.slane %v4374_v55, 2  ;;  %v4391_v50 = vld [vmem:[#allocation56_spill] sm:$0xff]  ;;  %v4394_v4 = vld [vmem:[#allocation115_spill] sm:$0xff]  ;;  %v4412_v46 = vld [vmem:[#allocation81_spill] sm:$0xff] }
 0x33a   : > { %v3582_v44 = vmul.f32 %v4376_v41, %v3396_v28  ;;  %v1137_v2 = vrot.slane %v1131_v16, 3  ;;  %v1171_v5 = vrot.slane %v3565_v63, 4  ;;  %v3588_v31 = vmul.f32 %v4377_v62, %v3396_v28  ;;  %v4393_v16 = vld [vmem:[#allocation90_spill] sm:$0xff] }
 0x33b   : > { %v1070_v26 = vsel %vm768_vm3, %v4371_v59, %v1069_v13  ;;  %v1104_v36 = vsel %vm803_vm4, %v4375_v40, %v1103_v52  ;;  %v770_v42 = vrot.slane %v3574_v29, 1  ;;  %v1013_v22 = vadd.f32 %v1009_v49, %v996_v53 }
 0x33c   : > { %v1075_v61 = vadd.f32 %v1070_v26, %v4373_v54  ;;  %v805_v7 = vrot.slane %v3582_v44, 2  ;;  %v3594_v3 = vmul.f32 %v4379_v43, %v3396_v28  ;;  %v4381_v14 = vrot.slane %v4380_v11, 3 }
 0x33d   : > { %v4383_v15 = vrot.slane %v4382_v30, 4  ;;  %v840_v9 = vrot.slane %v3588_v31, 3  ;;  %v4385_v21 = vrot.slane %v4384_v20, 1  ;;  %v1030_v58 = vadd.f32 %v1026_v25, %v1013_v22  ;;  %v4397_v22 = vld [vmem:[#allocation58_spill] sm:$0xff]  ;;  %v4400_v20 = vld [vmem:[#allocation88_spill] sm:$0xff] }
 0x33e   : > { %v1092_v45 = vadd.f32 %v4378_v38, %v1075_v61  ;;  %v1138_v32 = vsel %vm838_vm5, %v4381_v14, %v1137_v2  ;;  %v875_v0 = vrot.slane %v3594_v3, 4  ;;  %v4388_v33 = vrot.slane %v4387_v39, 2  ;;  %v4444_v31 = vld [vmem:[#allocation64_spill] sm:$0xff]  ;;  %v4446_v3 = vld [vmem:[#allocation105_spill] sm:$0xff] }
 0x33f   : > { %v1172_v51 = vsel %vm873_vm6, %v4383_v15, %v1171_v5  ;;  %v771_v34 = vsel %vm768_vm3, %v4385_v21, %v770_v42  ;;  %v4390_v1 = vrot.slane %v4389_v19, 3  ;;  %v1064_v49 = vmul.f32 %v2859_v56, %v3430_v48  ;;  %v4396_v56 = vld [vmem:[#allocation57_spill] sm:$0xff] }
 0x340   : > { %v1109_v10 = vadd.f32 %v1104_v36, %v1092_v45  ;;  %v776_v27 = vadd.f32 %v771_v34, %v4386_v8  ;;  %v806_v47 = vsel %vm803_vm4, %v4388_v33, %v805_v7  ;;  %v1081_v24 = vmul.f32 %v4391_v50, %v3463_v17  ;;  %v4398_v45 = vld [vmem:[#allocation78_spill] sm:$0xff]  ;;  %v4401_v34 = vld [vmem:[#allocation91_spill] sm:$0xff] }
 0x341   : > { %v841_v35 = vsel %vm838_vm5, %v4390_v1, %v840_v9  ;;  %v1047_v25 = vadd.f32 %v1043_v6, %v1030_v58  ;;  %v4395_v59 = vrot.slane %v4394_v4, 4  ;;  %v1071_v53 = vrot.slane %v1064_v49, 1  ;;  %v4402_v8 = vld [vmem:[#allocation79_spill] sm:$0xff] }
 0x342   : > { %v1126_v18 = vadd.f32 %v4392_v12, %v1109_v10  ;;  %v793_v63 = vadd.f32 %v4393_v16, %v776_v27  ;;  %v1088_v54 = vrot.slane %v1081_v24, 1  ;;  %v1098_v61 = vmul.f32 %v2862_v57, %v3430_v48  ;;  %v4404_v33 = vld [vmem:[#allocation59_spill] sm:$0xff] }
 0x343   : > { %v876_v26 = vsel %vm873_vm6, %v4395_v59, %v875_v0  ;;  %v1115_v55 = vmul.f32 %v4396_v56, %v3463_v17  ;;  %1496 = vrot.lane.b32.xlu0 %v1047_v25, %s2286_s8  ;;  %v1132_v36 = vmul.f32 %v4368_v60, %v3430_v48  ;;  %v1149_v38 = vmul.f32 %v4397_v22, %v3463_v17  ;;  %v4408_v16 = vld [vmem:[#allocation103_spill] sm:$0xff] }
 0x344   : > { %v1143_v6 = vadd.f32 %v1138_v32, %v1126_v18  ;;  %v811_v40 = vadd.f32 %v806_v47, %v793_v63  ;;  %v4399_v11 = vrot.slane %v4398_v45, 1  ;;  %v1105_v30 = vrot.slane %v1098_v61, 2  ;;  %v4416_v45 = vld [vmem:[#allocation77_spill] sm:$0xff] }
 0x345   : > { %v1122_v57 = vrot.slane %v1115_v55, 2  ;;  %v1166_v15 = vmul.f32 %v4369_v23, %v3430_v48  ;;  %v1139_v58 = vrot.slane %v1132_v36, 3  ;;  %v1156_v10 = vrot.slane %v1149_v38, 3  ;;  %v4406_v23 = vld [vmem:[#allocation80_spill] sm:$0xff]  ;;  %v4411_v55 = vld [vmem:[#allocation74_spill] sm:$0xff] }
 0x346   : > { %v1089_v14 = vsel %vm768_vm3, %v4399_v11, %v1088_v54  ;;  %v1160_v21 = vadd.f32 %v4400_v20, %v1143_v6  ;;  %v828_v32 = vadd.f32 %v4401_v34, %v811_v40  ;;  %v4403_v60 = vrot.slane %v4402_v8, 2  ;;  %v4409_v54 = vld [vmem:[#allocation89_spill] sm:$0xff] }
 0x347   : > { %v1173_v39 = vrot.slane %v1166_v15, 4  ;;  %v1183_v47 = vmul.f32 %v4404_v33, %v3463_v17  ;;  %v4405_v19 = vstv %s2727_s7  ;;  %v4407_v24 = vrot.slane %v4406_v23, 3  ;;  %s2287_s7 = smov 126  }
 0x348   : > { %v1123_v27 = vsel %vm803_vm4, %v4403_v60, %v1122_v57  ;;  %v1051_v1 = vmul.f32 %v4405_v19, %v3396_v28  ;;  %v1177_v49 = vadd.f32 %v1172_v51, %v1160_v21  ;;  %v846_v50 = vadd.f32 %v841_v35, %v828_v32  ;;  %v4410_v51 = vld [vmem:[#allocation92_spill] sm:$0xff]  ;;  %v4418_v32 = vld [vmem:[#allocation93_spill] sm:$0xff] }
 0x349   : > { %v1157_v25 = vsel %vm838_vm5, %v4407_v24, %v1156_v10  ;;  %v1072_v12 = vsel %vm768_vm3, %v1069_v13, %v1071_v53  ;;  %v1190_v18 = vrot.slane %v1183_v47, 4  ;;  %v1106_v4 = vsel %vm803_vm4, %v1103_v52, %v1105_v30  ;;  %v4414_v52 = vld [vmem:[#allocation75_spill] sm:$0xff]  ;;  %v4417_v21 = vld [vmem:[#allocation60_spill] sm:$0xff]  ;;  %v4422_v47 = vld [vmem:[#allocation118_spill] sm:$0xff] }
 0x34a   : > { %v1059_v63 = vadd.f32 %v4408_v16, %v1051_v1  ;;  %v1140_v59 = vsel %vm838_vm5, %v1137_v2, %v1139_v58  ;;  %v3665_v61 = vadd.f32 %v4409_v54, %v1177_v49  ;;  %v863_v35 = vadd.f32 %v4410_v51, %v846_v50  ;;  %v4415_v2 = vld [vmem:[#allocation76_spill] sm:$0xff]  ;;  %v4424_v49 = vld [vmem:[#allocation119_spill] sm:$0xff] }
 0x34b   : > { %v1174_v56 = vsel %vm873_vm6, %v1171_v5, %v1173_v39  ;;  %v3671_v6 = vmul.f32 %v4411_v55, %v3396_v28  ;;  %v4413_v13 = vrot.slane %v4412_v46, 4  ;;  %v3678_v36 = vmul.f32 %v4414_v52, %v3396_v28  ;;  %v4421_v39 = vld [vmem:[#allocation116_spill] sm:$0xff] }
 0x34c   : > { %v1076_v40 = vadd.f32 %v1072_v12, %v1059_v63  ;;  %v3682_v22 = vmul.f32 %v4415_v2, %v3396_v28  ;;  %v881_v38 = vadd.f32 %v876_v26, %v863_v35  ;;  %v3687_v11 = vmul.f32 %v4416_v45, %v3396_v28  ;;  %v4419_v26 = vld [vmem:[#allocation117_spill] sm:$0xff]  ;;  %v4426_v24 = vld [vmem:[#allocation120_spill] sm:$0xff]  ;;  %v4429_v35 = vld [vmem:[#allocation99_spill] sm:$0xff] }
 0x34d   : > { %v1191_v53 = vsel %vm873_vm6, %v4413_v13, %v1190_v18  ;;  %v1365_v5 = vrot.slane %v3671_v6, 1  ;;  %v764_v30 = vmul.f32 %v4372_v37, %v3430_v48  ;;  %v1399_v15 = vrot.slane %v3678_v36, 2 }
 0x34e   : > { %v1093_v57 = vadd.f32 %v1089_v14, %v1076_v40  ;;  %v1433_v20 = vrot.slane %v3682_v22, 3  ;;  %v782_v34 = vmul.f32 %v4417_v21, %v3463_v17  ;;  %v3696_v58 = vadd.f32 %v4418_v32, %v881_v38  ;;  %v4430_v40 = vld [vmem:[#allocation62_spill] sm:$0xff]  ;;  %v4457_v22 = vld [vmem:[#allocation97_spill] sm:$0xff] }
 0x34f   : > { %v4420_v10 = vrot.slane %v4419_v26, 1  ;;  %v1467_v60 = vrot.slane %v3687_v11, 4  ;;  %v772_v37 = vrot.slane %v764_v30, 1  ;;  %v4423_v19 = vrot.slane %v4422_v47, 2  ;;  %v4431_v30 = vld [vmem:[#allocation82_spill] sm:$0xff]  ;;  %v4435_v47 = vld [vmem:[#allocation63_spill] sm:$0xff] }
 0x350   : > { %v1110_v14 = vadd.f32 %v1106_v4, %v1093_v57  ;;  %v4425_v50 = vrot.slane %v4424_v49, 3  ;;  %v4427_v12 = vrot.slane %v4426_v24, 4  ;;  %v789_v16 = vrot.slane %v782_v34, 1  ;;  %v4428_v4 = vld [vmem:[#allocation61_spill] sm:$0xff] }
 0x351   : > { %v1366_v8 = vsel %vm768_vm3, %v4420_v10, %v1365_v5  ;;  %v1400_v1 = vsel %vm803_vm4, %v4423_v19, %v1399_v15  ;;  %v799_v63 = vmul.f32 %v4376_v41, %v3430_v48  ;;  %v817_v54 = vmul.f32 %v4428_v4, %v3463_v17 }
 0x352   : > { %v1371_v33 = vadd.f32 %v1366_v8, %v4421_v39  ;;  %v1434_v23 = vsel %vm838_vm5, %v4425_v50, %v1433_v20  ;;  %v1468_v18 = vsel %vm873_vm6, %v4427_v12, %v1467_v60  ;;  %v1127_v51 = vadd.f32 %v1123_v27, %v1110_v14  ;;  %v4433_v14 = vld [vmem:[#allocation83_spill] sm:$0xff]  ;;  %v4437_v12 = vld [vmem:[#allocation100_spill] sm:$0xff] }
 0x353   : > { %v834_v13 = vmul.f32 %v4377_v62, %v3430_v48  ;;  %v852_v38 = vmul.f32 %v4430_v40, %v3463_v17  ;;  %v4432_v57 = vrot.slane %v4431_v30, 1  ;;  %v807_v34 = vrot.slane %v799_v63, 2 }
 0x354   : > { %v1388_v46 = vadd.f32 %v4429_v35, %v1371_v33  ;;  %v824_v32 = vrot.slane %v817_v54, 2  ;;  %v869_v41 = vmul.f32 %v4379_v43, %v3430_v48  ;;  %v1144_v26 = vadd.f32 %v1140_v59, %v1127_v51  ;;  %v4438_v43 = vld [vmem:[#allocation84_spill] sm:$0xff] }
 0x355   : > { %v790_v21 = vsel %vm768_vm3, %v4432_v57, %v789_v16  ;;  %v842_v27 = vrot.slane %v834_v13, 3  ;;  %v859_v8 = vrot.slane %v852_v38, 3  ;;  %v4434_v39 = vrot.slane %v4433_v14, 2  ;;  %v4440_v54 = vld [vmem:[#allocation104_spill] sm:$0xff] }
 0x356   : > { %v1405_v10 = vadd.f32 %v1400_v1, %v1388_v46  ;;  %v877_v33 = vrot.slane %v869_v41, 4  ;;  %v887_v19 = vmul.f32 %v4435_v47, %v3463_v17  ;;  %v4436_v49 = vstv %s4237_s16 }
 0x357   : > { %v825_v62 = vsel %vm803_vm4, %v4434_v39, %v824_v32  ;;  %v751_v50 = vmul.f32 %v4436_v49, %v3396_v28  ;;  %v1161_v24 = vadd.f32 %v1157_v25, %v1144_v26  ;;  %v4439_v59 = vrot.slane %v4438_v43, 3  ;;  %v4447_v26 = vld [vmem:[#allocation65_spill] sm:$0xff]  ;;  %v4451_v49 = vld [vmem:[#allocation102_spill] sm:$0xff] }
 0x358   : > { %v1422_v16 = vadd.f32 %v4437_v12, %v1405_v10  ;;  %v773_v63 = vsel %vm768_vm3, %v770_v42, %v772_v37  ;;  %v894_v4 = vrot.slane %v887_v19, 4  ;;  %v808_v35 = vsel %vm803_vm4, %v805_v7, %v807_v34  ;;  %v4442_v37 = vld [vmem:[#allocation85_spill] sm:$0xff] }
 0x359   : > { %v860_v1 = vsel %vm838_vm5, %v4439_v59, %v859_v8  ;;  %v759_v51 = vadd.f32 %v4440_v54, %v751_v50  ;;  %v843_v25 = vsel %vm838_vm5, %v840_v9, %v842_v27  ;;  %v1178_v46 = vadd.f32 %v1174_v56, %v1161_v24  ;;  %v4454_v54 = vld [vmem:[#allocation67_spill] sm:$0xff] }
 0x35a   : > { %v1439_v13 = vadd.f32 %v1434_v23, %v1422_v16  ;;  %v878_v40 = vsel %vm873_vm6, %v875_v0, %v877_v33  ;;  %v4441_v29 = vstv %s2767_s5  ;;  %v4443_v38 = vrot.slane %v4442_v37, 4  ;;  %v4445_v23 = vld [vmem:[#allocation101_spill] sm:$0xff]  ;;  %v4452_v16 = vld [vmem:[#allocation95_spill] sm:$0xff]  ;;  %s2295_s5 = smov 96  }
 0x35b   : > { %v1347_v42 = vmul.f32 %v4441_v29, %v3396_v28  ;;  %v777_v44 = vadd.f32 %v773_v63, %v759_v51  ;;  %v1360_v7 = vmul.f32 %v4411_v55, %v3430_v48  ;;  %v1377_v9 = vmul.f32 %v4444_v31, %v3463_v17 }
 0x35c   : > { %v895_v30 = vsel %vm873_vm6, %v4443_v38, %v894_v4  ;;  %v1195_v56 = vadd.f32 %v1191_v53, %v1178_v46  ;;  %v1456_v57 = vadd.f32 %v4445_v23, %v1439_v13  ;;  %v1394_v0 = vmul.f32 %v4414_v52, %v3430_v48  ;;  %v4448_v53 = vld [vmem:[#allocation66_spill] sm:$0xff] }
 0x35d   : > { %v1355_v34 = vadd.f32 %v4446_v3, %v1347_v42  ;;  %v794_v28 = vadd.f32 %v790_v21, %v777_v44  ;;  %v1367_v32 = vrot.slane %v1360_v7, 1  ;;  %v1384_v41 = vrot.slane %v1377_v9, 1  ;;  %v4449_v52 = vld [vmem:[#allocation94_spill] sm:$0xff] }
 0x35e   : > { %v1411_v10 = vmul.f32 %v4447_v26, %v3463_v17  ;;  %v1473_v27 = vadd.f32 %v1468_v18, %v1456_v57  ;;  %v1401_v8 = vrot.slane %v1394_v0, 2  ;;  %v1428_v55 = vmul.f32 %v4415_v2, %v3430_v48 }
 0x35f   : > { %v1445_v14 = vmul.f32 %v4448_v53, %v3463_v17  ;;  %v812_v39 = vadd.f32 %v808_v35, %v794_v28  ;;  %v1368_v33 = vsel %vm768_vm3, %v1365_v5, %v1367_v32  ;;  %v4450_v21 = vrot.slane %v4449_v52, 1 }
 0x360   : > { %v1418_v19 = vrot.slane %v1411_v10, 2  ;;  %v1490_v50 = vadd.f32 %v4451_v49, %v1473_v27  ;;  %v1372_v18 = vadd.f32 %v1368_v33, %v1355_v34  ;;  %v1402_v2 = vsel %vm803_vm4, %v1399_v15, %v1401_v8  ;;  %v4455_v15 = vld [vmem:[#allocation96_spill] sm:$0xff]  ;;  %v4460_v49 = vld [vmem:[#allocation27_spill] sm:$0xff] }
 0x361   : > { %v1385_v47 = vsel %vm768_vm3, %v4450_v21, %v1384_v41  ;;  %v1435_v24 = vrot.slane %v1428_v55, 3  ;;  %v829_v12 = vadd.f32 %v825_v62, %v812_v39  ;;  %v4453_v43 = vrot.slane %v4452_v16, 2 }
 0x362   : > { %v1452_v59 = vrot.slane %v1445_v14, 3  ;;  %v1462_v5 = vmul.f32 %v4416_v45, %v3430_v48  ;;  %v1389_v63 = vadd.f32 %v1385_v47, %v1372_v18  ;;  %v1479_v36 = vmul.f32 %v4454_v54, %v3463_v17 }
 0x363   : > { %v1419_v6 = vsel %vm803_vm4, %v4453_v43, %v1418_v19  ;;  %v1436_v4 = vsel %vm838_vm5, %v1433_v20, %v1435_v24  ;;  %v847_v51 = vadd.f32 %v843_v25, %v829_v12  ;;  %v4456_v35 = vrot.slane %v4455_v15, 3 }
 0x364   : > { %v1469_v46 = vrot.slane %v1462_v5, 4  ;;  %v1406_v13 = vadd.f32 %v1402_v2, %v1389_v63  ;;  %v1486_v29 = vrot.slane %v1479_v36, 4  ;;  %v4458_v37 = vrot.slane %v4457_v22, 4 }
 0x365   : > { %v1453_v62 = vsel %vm838_vm5, %v4456_v35, %v1452_v59  ;;  %v864_v42 = vadd.f32 %v860_v1, %v847_v51  ;;  %v1533_v34 = vstv %s1532_s11  ;;  %v2289_v33 = vmov 1966171168  }
 0x366   : > { %v1470_v48 = vsel %vm873_vm6, %v1467_v60, %v1469_v46  ;;  %v1423_v45 = vadd.f32 %v1419_v6, %v1406_v13  ;;  %v1487_v20 = vsel %vm873_vm6, %v4458_v37, %v1486_v29  ;;  %v1555_v52 = vunpack.c.l.s4 %v2289_v33 }
 0x367   : > { %v882_v38 = vadd.f32 %v878_v40, %v864_v42  ;;  %v4461_v18 = vlaneseq }
 0x368   : > { %v1440_v17 = vadd.f32 %v1436_v4, %v1423_v45  ;;  %v1556_v19 = vunpack.c.0.s8 %v1555_v52 }
 0x369   : > { %v899_v25 = vadd.f32 %v895_v30, %v882_v38  ;;  %vm3813_vm7 = vcmp.lt.s32.totalorder %v4461_v18, 16  ;;  %vm1579_vm8 = vcmp.ge.s32.totalorder %v4461_v18, 16  ;;  %vm1580_vm9 = vcmp.lt.s32.totalorder %v4461_v18, 32 }
 0x36a   : > { %v1457_v44 = vadd.f32 %v1453_v62, %v1440_v17  ;;  %vm1581_vm10 = vmand %vm1579_vm8, %vm1580_vm9  ;;  %vm3830_vm11 = vcmp.ge.s32.totalorder %v4461_v18, 32  ;;  %vm3835_vm12 = vcmp.lt.s32.totalorder %v4461_v18, 48  ;;  %vm3847_vm14 = vcmp.ge.s32.totalorder %v4461_v18, 48 }
 0x36b   : > { %vm1589_vm13 = vmand %vm3830_vm11, %vm3835_vm12  ;;  %vm3852_vm15 = vcmp.lt.s32.totalorder %v4461_v18, 64  ;;  %vm3857_vm0 = vcmp.ge.s32.totalorder %v4461_v18, 64  ;;  %vm3862_vm1 = vcmp.lt.s32.totalorder %v4461_v18, 80  ;;  %vm3876_vm4 = vcmp.ge.s32.totalorder %v4461_v18, 80 }
 0x36c   : > { %v1474_v7 = vadd.f32 %v1470_v48, %v1457_v44  ;;  %vm1597_vm2 = vmand %vm3847_vm14, %vm3852_vm15  ;;  %vm3881_vm5 = vcmp.lt.s32.totalorder %v4461_v18, 96  ;;  %vm3907_vm8 = vcmp.lt.s32.totalorder %v4461_v18, 112  ;;  %vm3933_vm11 = vcmp.lt.s32.totalorder %v4461_v18, 128 }
 0x36d   : > { %vm1619_vm3 = vmand %vm3857_vm0, %vm3862_vm1 }
 0x36e   : > { %v1491_v31 = vadd.f32 %v1487_v20, %v1474_v7  ;;  %vm1634_vm6 = vmand %vm3876_vm4, %vm3881_vm5 }
 0x3a2   : > { %v1505_v9 = vpop.permute.xlu1 %1504 }
 0x3a3   : > { %v1510_v23 = vadd.f32 %v1505_v9, %v3665_v61 }
 0x3a5   : > { %1514 = vrot.lane.b32.xlu1 %v1510_v23, %s2287_s7 }
 0x3a6   : > { %v1495_v60 = vpop.permute.xlu1 %1494 }
 0x3a7   : > { %v1500_v40 = vadd.f32 %v1495_v60, %v3696_v58 }
 0x3a9   : > { %v1507_v1 = vpop.permute.xlu0 %1506  ;;  %1524 = vrot.lane.b32.xlu1 %v1490_v50, %s2288_s9  ;;  %v1559_v50 = vsub.s32 %v1556_v19, %v4460_v49 }
 0x3aa   : > { %v1511_v11 = vadd.f32 %v1507_v1, %v1195_v56 }
 0x3ac   : > { %1516 = vrot.lane.b32.xlu0 %v1511_v11, %s2287_s7 }
 0x3b0   : > { %1526 = vrot.lane.b32.xlu0 %v1491_v31, %s2288_s9 }
 0x3b5   : > { %v1497_v30 = vpop.permute.xlu0 %1496 }
 0x3b6   : > { %v1501_v61 = vadd.f32 %v1497_v30, %v899_v25 }
 0x417   : > { %v1515_v57 = vpop.permute.xlu1 %1514 }
 0x418   : > { %v1520_v3 = vadd.f32 %v1515_v57, %v1500_v40 }
 0x41b   : > { %v1525_v0 = vpop.permute.xlu1 %1524 }
 0x41c   : > { %v1530_v28 = vadd.f32 %v1525_v0, %v1520_v3 }
 0x41e   : > { %v1517_v32 = vpop.permute.xlu0 %1516  ;;  %v1534_v41 = vadd.f32 %v1533_v34, %v1530_v28 }
 0x41f   : > { %v1521_v10 = vadd.f32 %v1517_v32, %v1501_v61 }
 0x420   : > { %v1536_v26 = vsub.f32 0.0, %v1534_v41 }
 0x422   : > { %v1527_v56 = vpop.permute.xlu0 %1526  ;;  %v1538_v27 = vmul.f32 1.442695, %v1536_v26 }
 0x423   : > { %v1531_v8 = vadd.f32 %v1527_v56, %v1521_v10 }
 0x424   : > { %2121 = vpow2.f32 %v1538_v27 }
 0x425   : > { %v1535_v55 = vadd.f32 %v1533_v34, %v1531_v8 }
 0x427   : > { %v1537_v53 = vsub.f32 0.0, %v1535_v55 }
 0x429   : > { %v1540_v14 = vmul.f32 1.442695, %v1537_v53 }
 0x42b   : > { %2123 = vpow2.f32 %v1540_v14 }
 0x431   : > { %v2122_v58 = vpop.eup %2121 }
 0x432   : > { %v1542_v39 = vadd.f32 1.0, %v2122_v58 }
 0x434   : > { %2125 = vrcp.f32 %v1542_v39 }
 0x438   : > { %v2124_v21 = vpop.eup %2123 }
 0x439   : > { %v1543_v47 = vadd.f32 1.0, %v2124_v21 }
 0x43b   : > { %2127 = vrcp.f32 %v1543_v47 }
 0x441   : > { %v2126_v24 = vpop.eup %2125 }
 0x442   : > { %v1560_v12 = vrot.slane %v2126_v24, %v1559_v50  ;;  %v1599_v16 = vcombine.high %v2126_v24, %v2126_v24  ;;  %1552 = vst.msk [vmem:[%s3817_s22] sm:$0x1] %vm3813_vm7, %v2126_v24 }
 0x444   : > { %v1561_v43 = vcombine.high %v1560_v12, %v1560_v12  ;;  %v1568_v6 = vrot.slane %v1560_v12, %v1559_v50  ;;  %v1606_v59 = vrot.slane %v1599_v16, %v1559_v50 }
 0x446   : > { %v1575_v5 = vrot.slane %v1561_v43, %v1559_v50  ;;  %v1613_v63 = vrot.slane %v1606_v59, %v1559_v50  ;;  %v1621_v4 = vcombine.high %v1606_v59, %v1606_v59  ;;  %v1583_v35 = vcombine.high %v1568_v6, %v1568_v6 }
 0x448   : > { %v2128_v54 = vpop.eup %2127  ;;  %1576 = vrot.lane.b32.xlu1 %v1575_v5, %s2290_s23  ;;  %v1628_v15 = vrot.slane %v1621_v4, %v1559_v50  ;;  %v1591_v37 = vcombine.high %v1575_v5, %v1575_v5  ;;  %v1636_v38 = vcombine.high %v1613_v63, %v1613_v63 }
 0x449   : > { %v1660_v36 = vrot.slane %v2128_v54, %v1559_v50  ;;  %v1690_v51 = vcombine.high %v2128_v54, %v2128_v54  ;;  %1652 = vst.msk [vmem:[%s3817_s22 + $0x1] sm:$0x1] %vm3813_vm7, %v2128_v54  ;;  %vm3902_vm7 = vcmp.ge.s32.totalorder %v4461_v18, 96 }
 0x44a   : > { %v1644_v17 = vcombine.high %v1628_v15, %v1628_v15  ;;  %vm1642_vm9 = vmand %vm3902_vm7, %vm3907_vm8 }
 0x44b   : > { %v1661_v62 = vcombine.high %v1660_v36, %v1660_v36  ;;  %v1668_v46 = vrot.slane %v1660_v36, %v1559_v50  ;;  %v1697_v13 = vrot.slane %v1690_v51, %v1559_v50 }
 0x44c   : > { %1584 = vrot.lane.b32.xlu1 %v1583_v35, %s2291_s28 }
 0x44d   : > { %v1675_v29 = vrot.slane %v1661_v62, %v1559_v50  ;;  %v1704_v42 = vrot.slane %v1697_v13, %v1559_v50  ;;  %v1709_v48 = vcombine.high %v1697_v13, %v1697_v13  ;;  %v1680_v22 = vcombine.high %v1668_v46, %v1668_v46 }
 0x44f   : > { %1676 = vrot.lane.b32.xlu0 %v1675_v29, %s2290_s23  ;;  %v1716_v45 = vrot.slane %v1709_v48, %v1559_v50  ;;  %v1685_v20 = vcombine.high %v1675_v29, %v1675_v29  ;;  %v1721_v25 = vcombine.high %v1704_v42, %v1704_v42 }
 0x450   : > { %1614 = vrot.lane.b32.xlu1 %v1613_v63, %s2292_s27 }
 0x451   : > { %v1726_v44 = vcombine.high %v1716_v45, %v1716_v45 }
 0x453   : > { %1681 = vrot.lane.b32.xlu0 %v1680_v22, %s2291_s28 }
 0x454   : > { %1592 = vrot.lane.b32.xlu1 %v1591_v37, %s2293_s24 }
 0x457   : > { %1705 = vrot.lane.b32.xlu0 %v1704_v42, %s2292_s27 }
 0x458   : > { %1629 = vrot.lane.b32.xlu1 %v1628_v15, %s2294_s18 }
 0x45b   : > { %1686 = vrot.lane.b32.xlu0 %v1685_v20, %s2293_s24 }
 0x45c   : > { %1637 = vrot.lane.b32.xlu1 %v1636_v38, %s2295_s5 }
 0x45f   : > { %1717 = vrot.lane.b32.xlu0 %v1716_v45, %s2294_s18 }
 0x460   : > { %1645 = vrot.lane.b32.xlu1 %v1644_v17, %s2296_s17 }
 0x463   : > { %1722 = vrot.lane.b32.xlu0 %v1721_v25, %s2295_s5 }
 0x467   : > { %1727 = vrot.lane.b32.xlu0 %v1726_v44, %s2296_s17 }
 0x4ba   : > { %v1577_v9 = vpop.permute.xlu1 %1576 }
 0x4bb   : > { %1582 = vst.msk [vmem:[%s3817_s22] sm:$0x1] %vm1581_vm10, %v1577_v9 }
 0x4be   : > { %v1585_v23 = vpop.permute.xlu1 %1584 }
 0x4bf   : > { %1590 = vst.msk [vmem:[%s3817_s22] sm:$0x1] %vm1589_vm13, %v1585_v23 }
 0x4c1   : > { %v1677_v1 = vpop.permute.xlu0 %1676 }
 0x4c2   : > { %1679 = vst.msk [vmem:[%s3817_s22 + $0x1] sm:$0x1] %vm1581_vm10, %v1677_v1  ;;  %v1615_v57 = vpop.permute.xlu1 %1614  ;;  %vm3928_vm10 = vcmp.ge.s32.totalorder %v4461_v18, 112 }
 0x4c3   : > { %vm1650_vm12 = vmand %vm3928_vm10, %vm3933_vm11 }
 0x4c5   : > { %v1682_v3 = vpop.permute.xlu0 %1681 }
 0x4c6   : > { %1684 = vst.msk [vmem:[%s3817_s22 + $0x1] sm:$0x1] %vm1589_vm13, %v1682_v3  ;;  %v1593_v28 = vpop.permute.xlu1 %1592 }
 0x4c7   : > { %1598 = vst.msk [vmem:[%s3817_s22] sm:$0x1] %vm1597_vm2, %v1593_v28 }
 0x4c8   : > { %1620 = vst.msk [vmem:[%s3817_s22] sm:$0x1] %vm1619_vm3, %v1615_v57 }
 0x4c9   : > { %v1706_v32 = vpop.permute.xlu0 %1705 }
 0x4ca   : > { %v1630_v26 = vpop.permute.xlu1 %1629 }
 0x4cb   : > { %1635 = vst.msk [vmem:[%s3817_s22] sm:$0x1] %vm1634_vm6, %v1630_v26 }
 0x4cd   : > { %v1687_v10 = vpop.permute.xlu0 %1686 }
 0x4ce   : > { %1689 = vst.msk [vmem:[%s3817_s22 + $0x1] sm:$0x1] %vm1597_vm2, %v1687_v10  ;;  %v1638_v8 = vpop.permute.xlu1 %1637 }
 0x4cf   : > { %1708 = vst.msk [vmem:[%s3817_s22 + $0x1] sm:$0x1] %vm1619_vm3, %v1706_v32 }
 0x4d0   : > { %1643 = vst.msk [vmem:[%s3817_s22] sm:$0x1] %vm1642_vm9, %v1638_v8 }
 0x4d1   : > { %v1718_v55 = vpop.permute.xlu0 %1717 }
 0x4d2   : > { %1720 = vst.msk [vmem:[%s3817_s22 + $0x1] sm:$0x1] %vm1634_vm6, %v1718_v55  ;;  %v1646_v53 = vpop.permute.xlu1 %1645 }
 0x4d3   : > { %1651 = vst.msk [vmem:[%s3817_s22] sm:$0x1] %vm1650_vm12, %v1646_v53 }
 0x4d5   : > { %v1723_v14 = vpop.permute.xlu0 %1722 }
 0x4d6   : > { %1725 = vst.msk [vmem:[%s3817_s22 + $0x1] sm:$0x1] %vm1642_vm9, %v1723_v14 }
 0x4d9   : > { %v1728_v58 = vpop.permute.xlu0 %1727 }
 0x4da   : > { %1730 = vst.msk [vmem:[%s3817_s22 + $0x1] sm:$0x1] %vm1650_vm12, %v1728_v58 }
 0x4db   : > { %2185 = shalt.err (!%p2182_p4)
}
 0x4dc   : > { %s2186_s3 = scalar_lea.hbm %s3961_s26, 32  ;;  %s2190_s0 = scalar_lea.hbm %s4490_s20, 64 }
 0x4dd   : > { %p2187_p11 = scmp.ne.s32.totalorder %s3961_s26, %s2186_s3  ;;  %p2191_p13 = scmp.lt.s32.totalorder %s3961_s26, %s4490_s20 }
 0x4de   : > { %p2192_p3 = scmp.lt.s32.totalorder %s2190_s0, %s2186_s3 }
 0x4df   : > { %p2188_p5 = pnand %p2187_p11, %p4491_p2 }
 0x4e0   : > { %p2193_p12 = por %p2192_p3, %p2191_p13 }
 0x4e1   : > { %p2189_p6 = pneg %p2188_p5 }
 0x4e3   : > { %p2194_p0 = pnand %p2193_p12, %p2189_p6 }
 0x4e5   : > { %2197 = shalt.err (!%p2194_p0)
}
 0x4e6   : > { %2024 = dma.vmem_to_hbm [thread:$0]  (%p4491_p2), %s1804_s25, 32, %s3961_s26, %s1770_s13   ;;  %v1739_v39 = vsub.s32 1, %v4460_v49  ;;  %v1731_v33 = vld [vmem:[%s3817_s22] sm:$0x3]  ;;  %v4492_v52 = vsub.s32 0, %v4460_v49  ;;  %v4494_v19 = vld [vmem:[#allocation30_spill] sm:$0xff] }
 0x4e7   : > { %s2015_s9 = sshll.u32 %s4484_s19, 10  ;;  %s4493_s11 = sshll.u32 %s4459_s14, 6  ;;  %v4495_v18 = vld [vmem:[#allocation35_spill] sm:$0xff]  ;;  %v4496_v24 = vld [vmem:[#allocation29_spill] sm:$0xff]  ;;  %v4499_v49 = vld [vmem:[#allocation28_spill] sm:$0xff] }
 0x4e8   : > { %v1736_v21 = vrot.slane %v1731_v33, %v4492_v52  ;;  %v1740_v47 = vrot.slane %v1731_v33, %v1739_v39  ;;  %s369_s6 = scalar_lea.vmem [#allocation10], %s4493_s11  ;;  %v4497_v16 = vld [vmem:[#allocation33_spill] sm:$0xff]  ;;  %s4498_s22 = sld [smem:[#allocation127_spill]]  ;;  %v4500_v59 = vld [vmem:[#allocation34_spill] sm:$0xff]  ;;  %v4501_v63 = vld [vmem:[#allocation31_spill] sm:$0xff] }
 0x4e9   : > { %s1783_s28 = sshll.u32 %s369_s6, 4  ;;  %v4502_v54 = vld [vmem:[#allocation32_spill] sm:$0xff]  ;;  %s1760_s5 = scalar_lea.sflag [#allocation7], %s4459_s14  ;;  %s4001_s28 = int_to_ptr.vmem [resolvable:$true] %s1783_s28 }
 0x4ea   : > { %v1743_v50 = vmul.f32 %v1736_v21, %v4494_v19  ;;  %v1744_v2 = vmul.f32 %v1740_v47, %v4495_v18  ;;  %v1745_v12 = vmul.f32 %v1736_v21, %v4496_v24  ;;  %v1746_v43 = vmul.f32 %v1740_v47, %v4497_v16  ;;  %s2198_s17 = scalar_lea.vmem %s4001_s28, 1024  ;;  %s2298_s19 = smov [#allocation10]  }
 0x4eb   : > { %v1747_v6 = vmul.f32 %v1736_v21, %v4499_v49  ;;  %v1748_v5 = vmul.f32 %v1740_v47, %v4500_v59  ;;  %v1749_v4 = vmul.f32 %v1736_v21, %v4501_v63  ;;  %v1750_v36 = vmul.f32 %v1740_v47, %v4502_v54  ;;  %p2199_p7 = scmp.ne.s32.totalorder %s4001_s28, %s2198_s17  ;;  %s2202_s30 = sshll.u32 %s2298_s19, 4  ;;  %s2203_s30 = int_to_ptr.vmem [resolvable:$false] %s2202_s30 }
 0x4ec   : > { %1751 = vst [vmem:[%s369_s6] sm:$0xff] %v1743_v50  ;;  %1752 = vst [vmem:[%s369_s6 + $0x8] sm:$0xff] %v1744_v2  ;;  %s2204_s25 = scalar_lea.vmem %s2203_s30, 2048  ;;  %p2205_p10 = scmp.lt.s32.totalorder %s4001_s28, %s2203_s30 }
 0x4ed   : > { %1753 = vst [vmem:[%s369_s6 + $0x10] sm:$0xff] %v1745_v12  ;;  %1754 = vst [vmem:[%s369_s6 + $0x18] sm:$0xff] %v1746_v43  ;;  %p2200_p8 = pnand %p2199_p7, %p4491_p2  ;;  %p2206_p1 = scmp.lt.s32.totalorder %s2204_s25, %s2198_s17 }
 0x4ee   : > { %s3995_s18 = scalar_lea.hbm %s4498_s22, %s2015_s9  ;;  %1755 = vst [vmem:[%s369_s6 + $0x20] sm:$0xff] %v1747_v6  ;;  %1756 = vst [vmem:[%s369_s6 + $0x28] sm:$0xff] %v1748_v5 }
 0x4ef   : > { %1757 = vst [vmem:[%s369_s6 + $0x30] sm:$0xff] %v1749_v4  ;;  %1758 = vst [vmem:[%s369_s6 + $0x38] sm:$0xff] %v1750_v36  ;;  %p2201_p9 = pneg %p2200_p8  ;;  %p2207_p4 = por %p2206_p1, %p2205_p10 }
 0x4f1   : > { %p2208_p11 = pnand %p2207_p4, %p2201_p9 }
 0x4f3   : > { %2211 = shalt.err (!%p2208_p11)
}
 0x4f4   : > { %s2212_s15 = scalar_lea.hbm %s3995_s18, 1024  ;;  %s2216_s13 = scalar_lea.hbm %s4498_s22, 2048 }
 0x4f5   : > { %p2213_p5 = scmp.ne.s32.totalorder %s3995_s18, %s2212_s15  ;;  %p2217_p3 = scmp.lt.s32.totalorder %s3995_s18, %s4498_s22 }
 0x4f6   : > { %p2218_p12 = scmp.lt.s32.totalorder %s2216_s13, %s2212_s15 }
 0x4f7   : > { %p2214_p6 = pnand %p2213_p5, %p4491_p2 }
 0x4f8   : > { %p2219_p0 = por %p2218_p12, %p2217_p3 }
 0x4f9   : > { %p2215_p13 = pneg %p2214_p6 }
 0x4fb   : > { %p2220_p7 = pnand %p2219_p0, %p2215_p13 }
 0x4fd   : > { %2223 = shalt.err (!%p2220_p7)
}
 0x4fe   : > { %s2299_s2 = smov 256  }
 0x4ff   : > { %2023 = dma.vmem_to_hbm [thread:$0]  (%p4491_p2), %s4001_s28, 1024, %s3995_s18, %s1760_s5, %s2299_s2, %s2299_s2, %s2290_s23  }
 0x500 PF: > { %s4503_s12 = sld [smem:[#allocation17_spill]] }
 0x501   : > { %s4504_s3 = sld [smem:[#allocation25_spill]] }
 0x502   : > { %s4505_s4 = sld [smem:[#allocation20_spill]] }
 0x506   : > { %s1815_s16 = sand.u32 1, %s4503_s12  }
 0x507   : > { %p4506_p8 = scmp.ne.s32.totalorder %s4504_s3, 0  ;;  %s1816_s0 = scalar_lea.sflag [#allocation7], %s1815_s16 }
 0x508   : > { %p4507_p9 = scmp.ge.s32.totalorder %s4505_s4, 2 }
 0x50a   : > { %p2036_p10 = pnand %p4507_p9, %p4506_p8 }
 0x50c   : > { %p2037_p1 = pneg %p2036_p10 }
 0x50e   : > { %2249 = dma.done.wait (%p2037_p1), %s1816_s0, 1024  }
 0x50f   : > { %2251 = vsyncadd (%p2037_p1), %s1816_s0, 4294966272  ;;  %s1833_s8 = scalar_lea.sflag [#allocation12], %s1815_s16 }
 0x510   : > { %2253 = dma.done.wait (%p2037_p1), %s1833_s8, 32  }
 0x511   : > { %2255 = vsyncadd (%p2037_p1), %s1833_s8, 4294967264  ;;  %s4508_s14 = sld [smem:[#allocation22_spill]] }
 0x512   : > { %s4509_s11 = sld [smem:[#allocation18_spill]] }
 0x513   : > { %s4510_s12 = sld [smem:[#allocation19_spill]] }
 0x514   : > { %s4511_s13 = sld [smem:[#allocation23_spill]] }
 0x517   : > { %p28_p2 = scmp.ge.s32.totalorder %s4508_s14, 4  }
 0x519   :  { %30 = sbr.rel (!%p28_p2) target bundleno = 19 (0x13), region = 127 }
 0x51e   :  { %1838 = vsyncpa [#allocation6], 1 }
 0x51f   :  { %1840 = vsyncpa [#allocation6 + $0x1], 1 }
 0x520   :  { %1841 = vsyncpa [#allocation7], 1 }
 0x521   :  { %1843 = vsyncpa [#allocation7 + $0x1], 1 }
 0x522   :  { %1844 = vsyncpa [#allocation12], 1 }
 0x523   :  { %1846 = vsyncpa [#allocation12 + $0x1], 1 }
 0x524   :  { %1847 = vsyncpa [#allocation8], 1 }
 0x525   :  { %1849 = vsyncpa [#allocation8 + $0x1], 1 }

</bundles_post_ra>
